<compile_context>
chip_gen: v5e
topology: v5e:2x2
jax: 0.10.0
libtpu: 0.0.40
codegen_flags: <defaults>
</compile_context>

<pallas_src>
import math

import numpy as np
import jax
import jax.numpy as jnp
from jax import lax
from jax.experimental import pallas as pl
from jax.experimental.pallas import tpu as pltpu

# ----------------------------------------------------------------------------
# Static "molecule" definition (stands in for the module's __init__ arguments).
# ----------------------------------------------------------------------------
CART_INDS = [0, 2, 5, 7]                  # atoms kept Cartesian
Z_MAT = [                                 # (atom, ref1, ref2, ref3)
    (1, 0, 2, 5),
    (3, 2, 0, 5),
    (4, 3, 2, 0),
    (6, 5, 7, 2),
    (8, 7, 6, 5),
    (9, 8, 6, 7),
]
N_ATOMS = 10
N_DIM = 3 * N_ATOMS                       # 30
N_CART = len(CART_INDS)                   # 4
L3 = 3 * N_CART                           # 12  (PCA input dim)
N_Z = len(Z_MAT)                          # 6
PCA_OUT = L3 - 6                          # 6   (PCA drops 6 global DOF)
OUT_DIM = PCA_OUT + 3 * N_Z               # 24 = N_DIM - 6

LANE = 128
MAX_SUBLANE_BLOCKS = 64                   # up to 64 * 128 = 8192 batch rows / step
VMEM_LIMIT_BYTES = 48 * 1024 * 1024       # explicit: > v5e's 16 MiB scoped default


def _atom(x, i):
    return x[:, 3 * i:3 * i + 3]


def compute_raw_internal_coords(x):
    """Plain-JAX bond / angle / dihedral per z-matrix row (training statistics and
    reference only; the kernel recomputes this geometry in-kernel).

    TODO(synk): boltzgen's InternalCoordinateTransform source was not provided;
    standard bond/angle/dihedral conventions are used (dihedral sign convention,
    circular-dihedral shifting and default_std fallbacks may differ).
    """
    bonds, angles, dihs = [], [], []
    for (a, r1, r2, r3) in Z_MAT:
        p, p1, p2, p3 = _atom(x, a), _atom(x, r1), _atom(x, r2), _atom(x, r3)
        v1 = p - p1
        v2 = p2 - p1
        bond = jnp.linalg.norm(v1, axis=-1)
        cos_a = jnp.sum(v1 * v2, axis=-1) / (bond * jnp.linalg.norm(v2, axis=-1))
        angle = jnp.arccos(jnp.clip(cos_a, -1.0, 1.0))
        b0 = p1 - p
        b1 = p2 - p1
        b2 = p3 - p2
        n1 = jnp.cross(b0, b1)
        n2 = jnp.cross(b1, b2)
        m1 = jnp.cross(n1, b1 / jnp.linalg.norm(b1, axis=-1, keepdims=True))
        dih = jnp.arctan2(jnp.sum(m1 * n2, axis=-1), jnp.sum(n1 * n2, axis=-1))
        bonds.append(bond)
        angles.append(angle)
        dihs.append(dih)
    return (jnp.stack(bonds, axis=-1),
            jnp.stack(angles, axis=-1),
            jnp.stack(dihs, axis=-1))     # each (batch, N_Z)


def permuted_cart_block(x):
    """x[:, permute][:, :3*len_cart_inds] — static gather (reference only)."""
    return jnp.concatenate([x[:, 3 * c:3 * c + 3] for c in CART_INDS], axis=-1)


# ----------------------------------------------------------------------------
# Deterministic parameter setup (plays the role of __init__ with training data).
# ----------------------------------------------------------------------------
def build_constants(training_data):
    b, a, d = compute_raw_internal_coords(training_data)
    ic_train = np.asarray(
        jnp.stack([b, a, d], axis=-1).reshape(training_data.shape[0], 3 * N_Z),
        dtype=np.float64)
    ic_mean = ic_train.mean(axis=0)
    ic_std = ic_train.std(axis=0)
    # TODO(synk): boltzgen's circular-dihedral shifting / default_std fallback
    # (ind_circ_dih, shift_dih) are not reproduced; library defaults assumed.
    ic_shift = ic_mean
    ic_scale = 1.0 / ic_std

    td = np.asarray(training_data, dtype=np.float64)
    cart_train = np.concatenate([td[:, 3 * c:3 * c + 3] for c in CART_INDS], axis=1)
    pca_mean = cart_train.mean(axis=0, keepdims=True)
    centered = cart_train - pca_mean
    cov = centered.T @ centered / (centered.shape[0] - 1)
    eigvals, eigvecs = np.linalg.eigh(cov)          # ascending
    keep_vals = eigvals[6:]                         # drop 6 global DOF
    keep_vecs = eigvecs[:, 6:]
    pca_w = keep_vecs / np.sqrt(keep_vals)[None, :]  # (L3, PCA_OUT) whitening matrix
    pca_logdet = -0.5 * float(np.sum(np.log(keep_vals)))
    ic_logdet = -float(np.sum(np.log(ic_std)))       # from (ic - mean) / std
    const_logdet = pca_logdet + ic_logdet
    return dict(
        # reference / batch-major layout
        ic_shift=jnp.asarray(ic_shift[None, :], jnp.float32),            # (1, 3*N_Z)
        ic_scale=jnp.asarray(ic_scale[None, :], jnp.float32),            # (1, 3*N_Z)
        pca_mean=jnp.asarray(pca_mean, jnp.float32),                     # (1, L3)
        pca_w=jnp.asarray(pca_w, jnp.float32),                           # (L3, PCA_OUT)
        const_logdet=const_logdet,                                       # python float
        # kernel layout (SMEM-scalar friendly)
        k_ic_shift=jnp.asarray(ic_shift, jnp.float32),                   # (3*N_Z,)
        k_ic_scale=jnp.asarray(ic_scale, jnp.float32),                   # (3*N_Z,)
        k_pca_wT=jnp.asarray(pca_w.T.reshape(-1), jnp.float32),          # (PCA_OUT*L3,)
        k_pca_bias=jnp.asarray((-pca_mean @ pca_w).reshape(-1),
                               jnp.float32),                             # (PCA_OUT,)
        k_const=jnp.asarray([const_logdet], jnp.float32),                # (1,)
    )


# ----------------------------------------------------------------------------
# In-kernel math helpers (only +,-,*,sqrt,rsqrt,recip,log,where,compare).
# ----------------------------------------------------------------------------
def _fit_atan01_coeffs(n_terms=10):
    """Odd polynomial atan(r) ~= r * P(r^2) on [0, 1]; least-squares fit on
    Chebyshev-distributed nodes at import time (max error ~1e-6, far below the
    2e-3 parity tolerance)."""
    theta = np.linspace(0.0, np.pi, 4097)
    r = 0.5 * (1.0 - np.cos(theta))
    s = r * r
    A = np.stack([r * s ** k for k in range(n_terms)], axis=1)
    c, *_ = np.linalg.lstsq(A, np.arctan(r), rcond=None)
    return [float(v) for v in c]


_ATAN01_COEFFS = _fit_atan01_coeffs()


def _recip(x):
    """Approx EUP reciprocal + one Newton step (keeps the slow full-divide off the
    critical path while retaining ~f32 accuracy)."""
    y = pl.reciprocal(x, approx=True)
    return y * (2.0 - x * y)


def _atan01(r):
    """arctan(r) for r in [0, 1] via an odd polynomial (pure VPU mul/add)."""
    s = r * r
    p = _ATAN01_COEFFS[-1]
    for c in reversed(_ATAN01_COEFFS[:-1]):
        p = p * s + c
    return p * r


def _atan2(y, x):
    """Four-quadrant arctan(y/x) matching jnp.arctan2 (away from y == x == 0).
    One reciprocal per call (swap trick keeps the ratio in [0, 1])."""
    ay = jnp.abs(y)
    ax = jnp.abs(x)
    hi = jnp.maximum(ay, ax)
    lo = jnp.minimum(ay, ax)
    r = lo * _recip(hi)
    a = _atan01(r)
    a = jnp.where(ay > ax, 0.5 * math.pi - a, a)     # angle of (|y|, |x|) in [0, pi/2]
    a = jnp.where(x >= 0.0, a, math.pi - a)
    return jnp.where(y >= 0.0, a, -a)


def _acos(c):
    """arccos(c) for c in [-1, 1] via atan2(sqrt(1 - c^2), c)."""
    s = jnp.sqrt(jnp.maximum(1.0 - c * c, 0.0))
    return _atan2(s, c)


def _vsub(a, b):
    return tuple(ai - bi for ai, bi in zip(a, b))


def _vdot(a, b):
    return a[0] * b[0] + a[1] * b[1] + a[2] * b[2]


def _vcross(a, b):
    return (a[1] * b[2] - a[2] * b[1],
            a[2] * b[0] - a[0] * b[2],
            a[0] * b[1] - a[1] * b[0])


# ----------------------------------------------------------------------------
# Fused Pallas kernel.
# ----------------------------------------------------------------------------
def mixed_forward_kernel(xt_ref, w_ref, bias_ref, shift_ref, scale_ref,
                         const_ref, out_ref):
    """Fused MixedTransform forward on one batch tile.

    xt_ref   : (N_DIM, sb, 128)       VMEM  transposed coordinates (lane = batch)
    w_ref    : (PCA_OUT*L3,)          SMEM  whitening matrix W.T, row-major
    bias_ref : (PCA_OUT,)             SMEM  -pca_mean @ W
    shift_ref: (3*N_Z,)               SMEM  IC mean  (interleaved bond,angle,dih)
    scale_ref: (3*N_Z,)               SMEM  1 / IC std
    const_ref: (1,)                   SMEM  constant part of log|det J|
    out_ref  : (OUT_DIM+1, sb, 128)   VMEM  rows = [pca | ic_norm | logdet]
    """
    def coord(j):
        return xt_ref[j]                       # (sb, 128) -- full lane-dense vregs

    def atom(i):
        return (coord(3 * i), coord(3 * i + 1), coord(3 * i + 2))

    jac_logs = None
    for k, (a, r1, r2, r3) in enumerate(Z_MAT):
        p, p1, p2, p3 = atom(a), atom(r1), atom(r2), atom(r3)

        v1 = _vsub(p, p1)                      # p  - p1
        v2 = _vsub(p2, p1)                     # p2 - p1  (== b1)
        bond_sq = _vdot(v1, v1)
        v2_sq = _vdot(v2, v2)
        bond = jnp.sqrt(bond_sq)

        cos_a = _vdot(v1, v2) * lax.rsqrt(bond_sq * v2_sq)
        angle = _acos(jnp.clip(cos_a, -1.0, 1.0))

        b0 = _vsub(p1, p)
        b2 = _vsub(p3, p2)
        n1 = _vcross(b0, v2)
        n2 = _vcross(v2, b2)
        m1 = _vcross(n1, v2)                   # un-normalized; rescaled in the dot
        rs_v2 = lax.rsqrt(v2_sq)
        dih = _atan2(_vdot(m1, n2) * rs_v2, _vdot(n1, n2))

        # Folded log-det (one log per z-row, no extra divide):
        #   2 ln r + ln|sin th| = 0.5 * ln( r^2 * |n1|^2 / |v2|^2 )
        n1_sq = _vdot(n1, n1)
        contrib = jnp.log(bond_sq * n1_sq * (rs_v2 * rs_v2))
        jac_logs = contrib if jac_logs is None else jac_logs + contrib

        # normalized internal coordinates -> full-tile (sb,128) unmasked stores
        row = PCA_OUT + 3 * k
        out_ref[row + 0] = (bond - shift_ref[3 * k + 0]) * scale_ref[3 * k + 0]
        out_ref[row + 1] = (angle - shift_ref[3 * k + 1]) * scale_ref[3 * k + 1]
        out_ref[row + 2] = (dih - shift_ref[3 * k + 2]) * scale_ref[3 * k + 2]

    # PCA whitening of the Cartesian block: out_m = sum_j W[j,m] * cart_j + bias_m.
    # Scalar-broadcast VPU FMAs (an MXU dot would need a sublane->lane relayout for a
    # matmul that is ~0.1% of an MXU).  3 partial sums per row for extra VALU ILP.
    cart_rows = [coord(3 * c + d) for c in CART_INDS for d in range(3)]   # L3 rows
    for m in range(PCA_OUT):
        partials = []
        for g in range(0, L3, 4):
            acc = cart_rows[g] * w_ref[m * L3 + g]
            if g == 0:
                acc = acc + bias_ref[m]          # fold bias into the first partial
            for j in range(g + 1, g + 4):
                acc = acc + cart_rows[j] * w_ref[m * L3 + j]
            partials.append(acc)
        out_ref[m] = (partials[0] + partials[1]) + partials[2]

    # log|det J| row:  const - 0.5 * sum_k ln( r_k^2 |n1_k|^2 / |v2_k|^2 )
    out_ref[OUT_DIM] = const_ref[0] - 0.5 * jac_logs


# ----------------------------------------------------------------------------
# Host-side wrappers.
# ----------------------------------------------------------------------------
def _pick_tiling(batch):
    """Choose sublane blocks per grid step: as large as possible (amortize the
    ~600-cycle per-step overhead) while keeping padding waste minimal."""
    nb = pl.cdiv(batch, LANE)                  # number of 128-row lane groups
    if nb <= MAX_SUBLANE_BLOCKS:
        sb = nb                                # one grid step; block == full dim is OK
    else:
        sb, best_waste = 8, (-nb) % 8
        for cand in range(16, MAX_SUBLANE_BLOCKS + 1, 8):
            waste = (-nb) % cand
            if waste <= best_waste:            # prefer larger tiles on ties
                sb, best_waste = cand, waste
    n_blocks = pl.cdiv(nb, sb)
    return sb, n_blocks, n_blocks * sb * LANE


def _dimension_semantics(n_blocks):
    """On v7x (2 TensorCores) shard the batch grid across cores explicitly; plain
    "parallel" on single-TC chips (v5e/v6e)."""
    core_parallel = getattr(pltpu, "CORE_PARALLEL", None)
    try:
        kind = jax.devices()[0].device_kind.lower()
    except Exception:
        kind = ""
    if core_parallel is not None and "v7" in kind and n_blocks >= 2 and n_blocks % 2 == 0:
        return (core_parallel,)
    return ("parallel",)


def mixed_transform_forward_fm(xt, params):
    """Feature-major entry point (preferred): xt (N_DIM, B) -> (out (OUT_DIM, B),
    jac (B,)).  No host-side transposes; the reshape below only splits the minor
    dimension (no data movement)."""
    n_dim, B = xt.shape
    assert n_dim == N_DIM
    sb, n_blocks, b_pad = _pick_tiling(B)

    xt = xt.astype(jnp.float32)
    if b_pad != B:
        # ragged tail: replicate the last batch column (single pad op, no concat copy)
        xt = jnp.pad(xt, ((0, 0), (0, b_pad - B)), mode="edge")
    xt3 = xt.reshape(N_DIM, b_pad // LANE, LANE)

    smem_spec = pl.BlockSpec(memory_space=pltpu.MemorySpace.SMEM)
    out3 = pl.pallas_call(
        mixed_forward_kernel,
        out_shape=jax.ShapeDtypeStruct((OUT_DIM + 1, b_pad // LANE, LANE),
                                       jnp.float32),
        grid=(n_blocks,),
        in_specs=[
            pl.BlockSpec((N_DIM, sb, LANE), lambda i: (0, i, 0)),   # coordinates
            smem_spec,    # W.T (flattened)
            smem_spec,    # pca bias
            smem_spec,    # ic shift
            smem_spec,    # ic scale
            smem_spec,    # const log-det
        ],
        out_specs=pl.BlockSpec((OUT_DIM + 1, sb, LANE), lambda i: (0, i, 0)),
        compiler_params=pltpu.CompilerParams(
            dimension_semantics=_dimension_semantics(n_blocks),
            vmem_limit_bytes=VMEM_LIMIT_BYTES),
    )(xt3, params["k_pca_wT"], params["k_pca_bias"],
      params["k_ic_shift"], params["k_ic_scale"], params["k_const"])

    flat = out3.reshape(OUT_DIM + 1, b_pad)
    return flat[:OUT_DIM, :B], flat[OUT_DIM, :B]


def mixed_transform_forward(x, params):
    """Batch-major wrapper matching the PyTorch module: x (B, N_DIM) ->
    (out (B, N_DIM-6), jac (B,)).  NOTE: the two transposes here are wrapper-side
    HBM relayouts; feature-major pipelines should call mixed_transform_forward_fm."""
    out_fm, jac = mixed_transform_forward_fm(x.astype(jnp.float32).T, params)
    return out_fm.T, jac


# ----------------------------------------------------------------------------
# Plain-JAX reference (same semantics) for a correctness sanity check.
# ----------------------------------------------------------------------------
def reference_forward(x, params):
    B = x.shape[0]
    bonds, angles, dihs = compute_raw_internal_coords(x)
    jac_geom = -jnp.sum(2.0 * jnp.log(bonds)
                        + jnp.log(jnp.abs(jnp.sin(angles))), axis=-1)
    ic_raw = jnp.stack([bonds, angles, dihs], axis=-1).reshape(B, 3 * N_Z)
    ic_norm = (ic_raw - params["ic_shift"]) * params["ic_scale"]
    cart = permuted_cart_block(x)
    pca_out = jnp.dot(cart - params["pca_mean"], params["pca_w"],
                      precision=jax.lax.Precision.HIGHEST)
    out = jnp.concatenate([pca_out, ic_norm], axis=-1)
    jac = jac_geom + params["const_logdet"]
    return out, jac


if __name__ == "__main__":
    key = jax.random.PRNGKey(0)
    k_train, k_x = jax.random.split(key)

    training_data = jax.random.normal(k_train, (64, N_DIM), dtype=jnp.float32)
    params = build_constants(training_data)

    x = jax.random.normal(k_x, (8, N_DIM), dtype=jnp.float32)

    # batch-major wrapper (module-compatible signature)
    out, jac = mixed_transform_forward(x, params)
    out, jac = jax.block_until_ready((out, jac))

    # feature-major fast path gives identical results
    out_fm, jac_fm = mixed_transform_forward_fm(x.T, params)
    out_fm, jac_fm = jax.block_until_ready((out_fm, jac_fm))

    ref_out, ref_jac = reference_forward(x, params)
    np.testing.assert_allclose(np.asarray(out), np.asarray(ref_out),
                               rtol=2e-3, atol=2e-3)
    np.testing.assert_allclose(np.asarray(jac), np.asarray(ref_jac),
                               rtol=2e-3, atol=2e-3)
    np.testing.assert_allclose(np.asarray(out_fm.T), np.asarray(out),
                               rtol=1e-6, atol=1e-6)
    np.testing.assert_allclose(np.asarray(jac_fm), np.asarray(jac),
                               rtol=1e-6, atol=1e-6)
    assert out.shape == (8, N_DIM - 6) and jac.shape == (8,)

    print("KERNEL_OK")
</pallas_src>

<mosaic_0001>
module attributes {stable_mosaic.version = 11 : i64} {
  func.func @mixed_forward_kernel(%arg0: i32, %arg1: memref<30x1x128xf32, #tpu.memory_space<vmem>>, %arg2: memref<72xf32, #tpu.memory_space<smem>>, %arg3: memref<6xf32, #tpu.memory_space<smem>>, %arg4: memref<18xf32, #tpu.memory_space<smem>>, %arg5: memref<18xf32, #tpu.memory_space<smem>>, %arg6: memref<1xf32, #tpu.memory_space<smem>>, %arg7: memref<25x1x128xf32, #tpu.memory_space<vmem>>) attributes {dimension_semantics = [#tpu.dimension_semantics<parallel>], iteration_bounds = array<i64: 1>, scalar_prefetch = 0 : i64, scratch_operands = 0 : i64, tpu.core_type = #tpu.core_type<tc>, window_params = [{transform_indices = @transform_0, window_bounds = array<i64: 30, 1, 128>}, {transform_indices = @transform_1, window_bounds = array<i64: 72>}, {transform_indices = @transform_2, window_bounds = array<i64: 6>}, {transform_indices = @transform_3, window_bounds = array<i64: 18>}, {transform_indices = @transform_4, window_bounds = array<i64: 18>}, {transform_indices = @transform_5, window_bounds = array<i64: 1>}, {transform_indices = @transform_6, window_bounds = array<i64: 25, 1, 128>}]} {
    %c3 = arith.constant 3 : index
    %c0 = arith.constant 0 : index
    %c0_0 = arith.constant 0 : index
    %0 = vector.load %arg1[%c3, %c0, %c0_0] : memref<30x1x128xf32, #tpu.memory_space<vmem>>, vector<1x1x128xf32>
    %1 = vector.shape_cast %0 : vector<1x1x128xf32> to vector<1x128xf32>
    %c4 = arith.constant 4 : index
    %c0_1 = arith.constant 0 : index
    %c0_2 = arith.constant 0 : index
    %2 = vector.load %arg1[%c4, %c0_1, %c0_2] : memref<30x1x128xf32, #tpu.memory_space<vmem>>, vector<1x1x128xf32>
    %3 = vector.shape_cast %2 : vector<1x1x128xf32> to vector<1x128xf32>
    %c5 = arith.constant 5 : index
    %c0_3 = arith.constant 0 : index
    %c0_4 = arith.constant 0 : index
    %4 = vector.load %arg1[%c5, %c0_3, %c0_4] : memref<30x1x128xf32, #tpu.memory_space<vmem>>, vector<1x1x128xf32>
    %5 = vector.shape_cast %4 : vector<1x1x128xf32> to vector<1x128xf32>
    %c0_5 = arith.constant 0 : index
    %c0_6 = arith.constant 0 : index
    %c0_7 = arith.constant 0 : index
    %6 = vector.load %arg1[%c0_5, %c0_6, %c0_7] : memref<30x1x128xf32, #tpu.memory_space<vmem>>, vector<1x1x128xf32>
    %7 = vector.shape_cast %6 : vector<1x1x128xf32> to vector<1x128xf32>
    %c1 = arith.constant 1 : index
    %c0_8 = arith.constant 0 : index
    %c0_9 = arith.constant 0 : index
    %8 = vector.load %arg1[%c1, %c0_8, %c0_9] : memref<30x1x128xf32, #tpu.memory_space<vmem>>, vector<1x1x128xf32>
    %9 = vector.shape_cast %8 : vector<1x1x128xf32> to vector<1x128xf32>
    %c2 = arith.constant 2 : index
    %c0_10 = arith.constant 0 : index
    %c0_11 = arith.constant 0 : index
    %10 = vector.load %arg1[%c2, %c0_10, %c0_11] : memref<30x1x128xf32, #tpu.memory_space<vmem>>, vector<1x1x128xf32>
    %11 = vector.shape_cast %10 : vector<1x1x128xf32> to vector<1x128xf32>
    %c6 = arith.constant 6 : index
    %c0_12 = arith.constant 0 : index
    %c0_13 = arith.constant 0 : index
    %12 = vector.load %arg1[%c6, %c0_12, %c0_13] : memref<30x1x128xf32, #tpu.memory_space<vmem>>, vector<1x1x128xf32>
    %13 = vector.shape_cast %12 : vector<1x1x128xf32> to vector<1x128xf32>
    %c7 = arith.constant 7 : index
    %c0_14 = arith.constant 0 : index
    %c0_15 = arith.constant 0 : index
    %14 = vector.load %arg1[%c7, %c0_14, %c0_15] : memref<30x1x128xf32, #tpu.memory_space<vmem>>, vector<1x1x128xf32>
    %15 = vector.shape_cast %14 : vector<1x1x128xf32> to vector<1x128xf32>
    %c8 = arith.constant 8 : index
    %c0_16 = arith.constant 0 : index
    %c0_17 = arith.constant 0 : index
    %16 = vector.load %arg1[%c8, %c0_16, %c0_17] : memref<30x1x128xf32, #tpu.memory_space<vmem>>, vector<1x1x128xf32>
    %17 = vector.shape_cast %16 : vector<1x1x128xf32> to vector<1x128xf32>
    %c15 = arith.constant 15 : index
    %c0_18 = arith.constant 0 : index
    %c0_19 = arith.constant 0 : index
    %18 = vector.load %arg1[%c15, %c0_18, %c0_19] : memref<30x1x128xf32, #tpu.memory_space<vmem>>, vector<1x1x128xf32>
    %19 = vector.shape_cast %18 : vector<1x1x128xf32> to vector<1x128xf32>
    %c16 = arith.constant 16 : index
    %c0_20 = arith.constant 0 : index
    %c0_21 = arith.constant 0 : index
    %20 = vector.load %arg1[%c16, %c0_20, %c0_21] : memref<30x1x128xf32, #tpu.memory_space<vmem>>, vector<1x1x128xf32>
    %21 = vector.shape_cast %20 : vector<1x1x128xf32> to vector<1x128xf32>
    %c17 = arith.constant 17 : index
    %c0_22 = arith.constant 0 : index
    %c0_23 = arith.constant 0 : index
    %22 = vector.load %arg1[%c17, %c0_22, %c0_23] : memref<30x1x128xf32, #tpu.memory_space<vmem>>, vector<1x1x128xf32>
    %23 = vector.shape_cast %22 : vector<1x1x128xf32> to vector<1x128xf32>
    %24 = arith.subf %1, %7 : vector<1x128xf32>
    %25 = arith.subf %3, %9 : vector<1x128xf32>
    %26 = arith.subf %5, %11 : vector<1x128xf32>
    %27 = arith.subf %13, %7 : vector<1x128xf32>
    %28 = arith.subf %15, %9 : vector<1x128xf32>
    %29 = arith.subf %17, %11 : vector<1x128xf32>
    %30 = arith.mulf %24, %24 : vector<1x128xf32>
    %31 = arith.mulf %25, %25 : vector<1x128xf32>
    %32 = arith.addf %30, %31 : vector<1x128xf32>
    %33 = arith.mulf %26, %26 : vector<1x128xf32>
    %34 = arith.addf %32, %33 : vector<1x128xf32>
    %35 = arith.mulf %27, %27 : vector<1x128xf32>
    %36 = arith.mulf %28, %28 : vector<1x128xf32>
    %37 = arith.addf %35, %36 : vector<1x128xf32>
    %38 = arith.mulf %29, %29 : vector<1x128xf32>
    %39 = arith.addf %37, %38 : vector<1x128xf32>
    %40 = math.sqrt %34 : vector<1x128xf32>
    %41 = arith.mulf %24, %27 : vector<1x128xf32>
    %42 = arith.mulf %25, %28 : vector<1x128xf32>
    %43 = arith.addf %41, %42 : vector<1x128xf32>
    %44 = arith.mulf %26, %29 : vector<1x128xf32>
    %45 = arith.addf %43, %44 : vector<1x128xf32>
    %46 = arith.mulf %34, %39 : vector<1x128xf32>
    %47 = math.rsqrt %46 : vector<1x128xf32>
    %48 = arith.mulf %45, %47 : vector<1x128xf32>
    %cst = arith.constant -1.000000e+00 : f32
    %cst_24 = arith.constant 1.000000e+00 : f32
    %49 = vector.broadcast %cst : f32 to vector<1x128xf32>
    %50 = arith.maximumf %49, %48 : vector<1x128xf32>
    %51 = vector.broadcast %cst_24 : f32 to vector<1x128xf32>
    %52 = arith.minimumf %51, %50 : vector<1x128xf32>
    %53 = arith.mulf %52, %52 : vector<1x128xf32>
    %cst_25 = arith.constant 1.000000e+00 : f32
    %54 = vector.broadcast %cst_25 : f32 to vector<1x128xf32>
    %55 = arith.subf %54, %53 : vector<1x128xf32>
    %cst_26 = arith.constant 0.000000e+00 : f32
    %56 = vector.broadcast %cst_26 : f32 to vector<1x128xf32>
    %57 = arith.maximumf %55, %56 : vector<1x128xf32>
    %58 = math.sqrt %57 : vector<1x128xf32>
    %59 = math.absf %58 : vector<1x128xf32>
    %60 = math.absf %52 : vector<1x128xf32>
    %61 = arith.maximumf %59, %60 : vector<1x128xf32>
    %62 = arith.minimumf %59, %60 : vector<1x128xf32>
    %63 = tpu.reciprocal %61 {approx = true} : vector<1x128xf32> -> vector<1x128xf32>
    %64 = arith.mulf %61, %63 : vector<1x128xf32>
    %cst_27 = arith.constant 2.000000e+00 : f32
    %65 = vector.broadcast %cst_27 : f32 to vector<1x128xf32>
    %66 = arith.subf %65, %64 : vector<1x128xf32>
    %67 = arith.mulf %63, %66 : vector<1x128xf32>
    %68 = arith.mulf %62, %67 : vector<1x128xf32>
    %69 = arith.mulf %68, %68 : vector<1x128xf32>
    %cst_28 = arith.constant -0.00151638396 : f32
    %70 = vector.broadcast %cst_28 : f32 to vector<1x128xf32>
    %71 = arith.mulf %70, %69 : vector<1x128xf32>
    %cst_29 = arith.constant 0.00960627105 : f32
    %72 = vector.broadcast %cst_29 : f32 to vector<1x128xf32>
    %73 = arith.addf %71, %72 : vector<1x128xf32>
    %74 = arith.mulf %73, %69 : vector<1x128xf32>
    %cst_30 = arith.constant -0.0285813473 : f32
    %75 = vector.broadcast %cst_30 : f32 to vector<1x128xf32>
    %76 = arith.addf %74, %75 : vector<1x128xf32>
    %77 = arith.mulf %76, %69 : vector<1x128xf32>
    %cst_31 = arith.constant 0.0551441759 : f32
    %78 = vector.broadcast %cst_31 : f32 to vector<1x128xf32>
    %79 = arith.addf %77, %78 : vector<1x128xf32>
    %80 = arith.mulf %79, %69 : vector<1x128xf32>
    %cst_32 = arith.constant -0.0822269394 : f32
    %81 = vector.broadcast %cst_32 : f32 to vector<1x128xf32>
    %82 = arith.addf %80, %81 : vector<1x128xf32>
    %83 = arith.mulf %82, %69 : vector<1x128xf32>
    %cst_33 = arith.constant 0.108822249 : f32
    %84 = vector.broadcast %cst_33 : f32 to vector<1x128xf32>
    %85 = arith.addf %83, %84 : vector<1x128xf32>
    %86 = arith.mulf %85, %69 : vector<1x128xf32>
    %cst_34 = arith.constant -0.142484158 : f32
    %87 = vector.broadcast %cst_34 : f32 to vector<1x128xf32>
    %88 = arith.addf %86, %87 : vector<1x128xf32>
    %89 = arith.mulf %88, %69 : vector<1x128xf32>
    %cst_35 = arith.constant 0.199966252 : f32
    %90 = vector.broadcast %cst_35 : f32 to vector<1x128xf32>
    %91 = arith.addf %89, %90 : vector<1x128xf32>
    %92 = arith.mulf %91, %69 : vector<1x128xf32>
    %cst_36 = arith.constant -0.333331943 : f32
    %93 = vector.broadcast %cst_36 : f32 to vector<1x128xf32>
    %94 = arith.addf %92, %93 : vector<1x128xf32>
    %95 = arith.mulf %94, %69 : vector<1x128xf32>
    %cst_37 = arith.constant 1.000000e+00 : f32
    %96 = vector.broadcast %cst_37 : f32 to vector<1x128xf32>
    %97 = arith.addf %95, %96 : vector<1x128xf32>
    %98 = arith.mulf %97, %68 : vector<1x128xf32>
    %99 = arith.cmpf ogt, %59, %60 : vector<1x128xf32>
    %cst_38 = arith.constant 1.57079637 : f32
    %100 = vector.broadcast %cst_38 : f32 to vector<1x128xf32>
    %101 = arith.subf %100, %98 : vector<1x128xf32>
    %102 = arith.select %99, %101, %98 : vector<1x128xi1>, vector<1x128xf32>
    %cst_39 = arith.constant 0.000000e+00 : f32
    %103 = vector.broadcast %cst_39 : f32 to vector<1x128xf32>
    %104 = arith.cmpf oge, %52, %103 : vector<1x128xf32>
    %cst_40 = arith.constant 3.14159274 : f32
    %105 = vector.broadcast %cst_40 : f32 to vector<1x128xf32>
    %106 = arith.subf %105, %102 : vector<1x128xf32>
    %107 = arith.select %104, %102, %106 : vector<1x128xi1>, vector<1x128xf32>
    %cst_41 = arith.constant 0.000000e+00 : f32
    %108 = vector.broadcast %cst_41 : f32 to vector<1x128xf32>
    %109 = arith.cmpf oge, %58, %108 : vector<1x128xf32>
    %cst_42 = arith.constant 0.000000e+00 : f32
    %110 = vector.broadcast %cst_42 : f32 to vector<1x128xf32>
    %111 = arith.subf %110, %107 : vector<1x128xf32>
    %112 = arith.select %109, %107, %111 : vector<1x128xi1>, vector<1x128xf32>
    %113 = arith.subf %7, %1 : vector<1x128xf32>
    %114 = arith.subf %9, %3 : vector<1x128xf32>
    %115 = arith.subf %11, %5 : vector<1x128xf32>
    %116 = arith.subf %19, %13 : vector<1x128xf32>
    %117 = arith.subf %21, %15 : vector<1x128xf32>
    %118 = arith.subf %23, %17 : vector<1x128xf32>
    %119 = arith.mulf %114, %29 : vector<1x128xf32>
    %120 = arith.mulf %115, %28 : vector<1x128xf32>
    %121 = arith.subf %119, %120 : vector<1x128xf32>
    %122 = arith.mulf %115, %27 : vector<1x128xf32>
    %123 = arith.mulf %113, %29 : vector<1x128xf32>
    %124 = arith.subf %122, %123 : vector<1x128xf32>
    %125 = arith.mulf %113, %28 : vector<1x128xf32>
    %126 = arith.mulf %114, %27 : vector<1x128xf32>
    %127 = arith.subf %125, %126 : vector<1x128xf32>
    %128 = arith.mulf %28, %118 : vector<1x128xf32>
    %129 = arith.mulf %29, %117 : vector<1x128xf32>
    %130 = arith.subf %128, %129 : vector<1x128xf32>
    %131 = arith.mulf %29, %116 : vector<1x128xf32>
    %132 = arith.mulf %27, %118 : vector<1x128xf32>
    %133 = arith.subf %131, %132 : vector<1x128xf32>
    %134 = arith.mulf %27, %117 : vector<1x128xf32>
    %135 = arith.mulf %28, %116 : vector<1x128xf32>
    %136 = arith.subf %134, %135 : vector<1x128xf32>
    %137 = arith.mulf %124, %29 : vector<1x128xf32>
    %138 = arith.mulf %127, %28 : vector<1x128xf32>
    %139 = arith.subf %137, %138 : vector<1x128xf32>
    %140 = arith.mulf %127, %27 : vector<1x128xf32>
    %141 = arith.mulf %121, %29 : vector<1x128xf32>
    %142 = arith.subf %140, %141 : vector<1x128xf32>
    %143 = arith.mulf %121, %28 : vector<1x128xf32>
    %144 = arith.mulf %124, %27 : vector<1x128xf32>
    %145 = arith.subf %143, %144 : vector<1x128xf32>
    %146 = math.rsqrt %39 : vector<1x128xf32>
    %147 = arith.mulf %139, %130 : vector<1x128xf32>
    %148 = arith.mulf %142, %133 : vector<1x128xf32>
    %149 = arith.addf %147, %148 : vector<1x128xf32>
    %150 = arith.mulf %145, %136 : vector<1x128xf32>
    %151 = arith.addf %149, %150 : vector<1x128xf32>
    %152 = arith.mulf %151, %146 : vector<1x128xf32>
    %153 = arith.mulf %121, %130 : vector<1x128xf32>
    %154 = arith.mulf %124, %133 : vector<1x128xf32>
    %155 = arith.addf %153, %154 : vector<1x128xf32>
    %156 = arith.mulf %127, %136 : vector<1x128xf32>
    %157 = arith.addf %155, %156 : vector<1x128xf32>
    %158 = math.absf %152 : vector<1x128xf32>
    %159 = math.absf %157 : vector<1x128xf32>
    %160 = arith.maximumf %158, %159 : vector<1x128xf32>
    %161 = arith.minimumf %158, %159 : vector<1x128xf32>
    %162 = tpu.reciprocal %160 {approx = true} : vector<1x128xf32> -> vector<1x128xf32>
    %163 = arith.mulf %160, %162 : vector<1x128xf32>
    %cst_43 = arith.constant 2.000000e+00 : f32
    %164 = vector.broadcast %cst_43 : f32 to vector<1x128xf32>
    %165 = arith.subf %164, %163 : vector<1x128xf32>
    %166 = arith.mulf %162, %165 : vector<1x128xf32>
    %167 = arith.mulf %161, %166 : vector<1x128xf32>
    %168 = arith.mulf %167, %167 : vector<1x128xf32>
    %cst_44 = arith.constant -0.00151638396 : f32
    %169 = vector.broadcast %cst_44 : f32 to vector<1x128xf32>
    %170 = arith.mulf %169, %168 : vector<1x128xf32>
    %cst_45 = arith.constant 0.00960627105 : f32
    %171 = vector.broadcast %cst_45 : f32 to vector<1x128xf32>
    %172 = arith.addf %170, %171 : vector<1x128xf32>
    %173 = arith.mulf %172, %168 : vector<1x128xf32>
    %cst_46 = arith.constant -0.0285813473 : f32
    %174 = vector.broadcast %cst_46 : f32 to vector<1x128xf32>
    %175 = arith.addf %173, %174 : vector<1x128xf32>
    %176 = arith.mulf %175, %168 : vector<1x128xf32>
    %cst_47 = arith.constant 0.0551441759 : f32
    %177 = vector.broadcast %cst_47 : f32 to vector<1x128xf32>
    %178 = arith.addf %176, %177 : vector<1x128xf32>
    %179 = arith.mulf %178, %168 : vector<1x128xf32>
    %cst_48 = arith.constant -0.0822269394 : f32
    %180 = vector.broadcast %cst_48 : f32 to vector<1x128xf32>
    %181 = arith.addf %179, %180 : vector<1x128xf32>
    %182 = arith.mulf %181, %168 : vector<1x128xf32>
    %cst_49 = arith.constant 0.108822249 : f32
    %183 = vector.broadcast %cst_49 : f32 to vector<1x128xf32>
    %184 = arith.addf %182, %183 : vector<1x128xf32>
    %185 = arith.mulf %184, %168 : vector<1x128xf32>
    %cst_50 = arith.constant -0.142484158 : f32
    %186 = vector.broadcast %cst_50 : f32 to vector<1x128xf32>
    %187 = arith.addf %185, %186 : vector<1x128xf32>
    %188 = arith.mulf %187, %168 : vector<1x128xf32>
    %cst_51 = arith.constant 0.199966252 : f32
    %189 = vector.broadcast %cst_51 : f32 to vector<1x128xf32>
    %190 = arith.addf %188, %189 : vector<1x128xf32>
    %191 = arith.mulf %190, %168 : vector<1x128xf32>
    %cst_52 = arith.constant -0.333331943 : f32
    %192 = vector.broadcast %cst_52 : f32 to vector<1x128xf32>
    %193 = arith.addf %191, %192 : vector<1x128xf32>
    %194 = arith.mulf %193, %168 : vector<1x128xf32>
    %cst_53 = arith.constant 1.000000e+00 : f32
    %195 = vector.broadcast %cst_53 : f32 to vector<1x128xf32>
    %196 = arith.addf %194, %195 : vector<1x128xf32>
    %197 = arith.mulf %196, %167 : vector<1x128xf32>
    %198 = arith.cmpf ogt, %158, %159 : vector<1x128xf32>
    %cst_54 = arith.constant 1.57079637 : f32
    %199 = vector.broadcast %cst_54 : f32 to vector<1x128xf32>
    %200 = arith.subf %199, %197 : vector<1x128xf32>
    %201 = arith.select %198, %200, %197 : vector<1x128xi1>, vector<1x128xf32>
    %cst_55 = arith.constant 0.000000e+00 : f32
    %202 = vector.broadcast %cst_55 : f32 to vector<1x128xf32>
    %203 = arith.cmpf oge, %157, %202 : vector<1x128xf32>
    %cst_56 = arith.constant 3.14159274 : f32
    %204 = vector.broadcast %cst_56 : f32 to vector<1x128xf32>
    %205 = arith.subf %204, %201 : vector<1x128xf32>
    %206 = arith.select %203, %201, %205 : vector<1x128xi1>, vector<1x128xf32>
    %cst_57 = arith.constant 0.000000e+00 : f32
    %207 = vector.broadcast %cst_57 : f32 to vector<1x128xf32>
    %208 = arith.cmpf oge, %152, %207 : vector<1x128xf32>
    %cst_58 = arith.constant 0.000000e+00 : f32
    %209 = vector.broadcast %cst_58 : f32 to vector<1x128xf32>
    %210 = arith.subf %209, %206 : vector<1x128xf32>
    %211 = arith.select %208, %206, %210 : vector<1x128xi1>, vector<1x128xf32>
    %212 = arith.mulf %121, %121 : vector<1x128xf32>
    %213 = arith.mulf %124, %124 : vector<1x128xf32>
    %214 = arith.addf %212, %213 : vector<1x128xf32>
    %215 = arith.mulf %127, %127 : vector<1x128xf32>
    %216 = arith.addf %214, %215 : vector<1x128xf32>
    %217 = arith.mulf %34, %216 : vector<1x128xf32>
    %218 = arith.mulf %146, %146 : vector<1x128xf32>
    %219 = arith.mulf %217, %218 : vector<1x128xf32>
    %220 = math.log %219 : vector<1x128xf32>
    %c0_59 = arith.constant 0 : index
    %221 = memref.load %arg4[%c0_59] : memref<18xf32, #tpu.memory_space<smem>>
    %222 = vector.broadcast %221 : f32 to vector<1x128xf32>
    %223 = arith.subf %40, %222 : vector<1x128xf32>
    %c0_60 = arith.constant 0 : index
    %224 = memref.load %arg5[%c0_60] : memref<18xf32, #tpu.memory_space<smem>>
    %225 = vector.broadcast %224 : f32 to vector<1x128xf32>
    %226 = arith.mulf %223, %225 : vector<1x128xf32>
    %c6_61 = arith.constant 6 : index
    %c0_62 = arith.constant 0 : index
    %c0_63 = arith.constant 0 : index
    %227 = vector.load %arg7[%c6_61, %c0_62, %c0_63] : memref<25x1x128xf32, #tpu.memory_space<vmem>>, vector<1x1x128xf32>
    %228 = vector.shape_cast %227 : vector<1x1x128xf32> to vector<1x128xf32>
    %229 = vector.shape_cast %226 : vector<1x128xf32> to vector<1x1x128xf32>
    tpu.vector_store %arg7[%c6_61, %c0_62, %c0_63], %229 {strides = array<i32>} : memref<25x1x128xf32, #tpu.memory_space<vmem>>, vector<1x1x128xf32>,
    %c1_64 = arith.constant 1 : index
    %230 = memref.load %arg4[%c1_64] : memref<18xf32, #tpu.memory_space<smem>>
    %231 = vector.broadcast %230 : f32 to vector<1x128xf32>
    %232 = arith.subf %112, %231 : vector<1x128xf32>
    %c1_65 = arith.constant 1 : index
    %233 = memref.load %arg5[%c1_65] : memref<18xf32, #tpu.memory_space<smem>>
    %234 = vector.broadcast %233 : f32 to vector<1x128xf32>
    %235 = arith.mulf %232, %234 : vector<1x128xf32>
    %c7_66 = arith.constant 7 : index
    %c0_67 = arith.constant 0 : index
    %c0_68 = arith.constant 0 : index
    %236 = vector.load %arg7[%c7_66, %c0_67, %c0_68] : memref<25x1x128xf32, #tpu.memory_space<vmem>>, vector<1x1x128xf32>
    %237 = vector.shape_cast %236 : vector<1x1x128xf32> to vector<1x128xf32>
    %238 = vector.shape_cast %235 : vector<1x128xf32> to vector<1x1x128xf32>
    tpu.vector_store %arg7[%c7_66, %c0_67, %c0_68], %238 {strides = array<i32>} : memref<25x1x128xf32, #tpu.memory_space<vmem>>, vector<1x1x128xf32>,
    %c2_69 = arith.constant 2 : index
    %239 = memref.load %arg4[%c2_69] : memref<18xf32, #tpu.memory_space<smem>>
    %240 = vector.broadcast %239 : f32 to vector<1x128xf32>
    %241 = arith.subf %211, %240 : vector<1x128xf32>
    %c2_70 = arith.constant 2 : index
    %242 = memref.load %arg5[%c2_70] : memref<18xf32, #tpu.memory_space<smem>>
    %243 = vector.broadcast %242 : f32 to vector<1x128xf32>
    %244 = arith.mulf %241, %243 : vector<1x128xf32>
    %c8_71 = arith.constant 8 : index
    %c0_72 = arith.constant 0 : index
    %c0_73 = arith.constant 0 : index
    %245 = vector.load %arg7[%c8_71, %c0_72, %c0_73] : memref<25x1x128xf32, #tpu.memory_space<vmem>>, vector<1x1x128xf32>
    %246 = vector.shape_cast %245 : vector<1x1x128xf32> to vector<1x128xf32>
    %247 = vector.shape_cast %244 : vector<1x128xf32> to vector<1x1x128xf32>
    tpu.vector_store %arg7[%c8_71, %c0_72, %c0_73], %247 {strides = array<i32>} : memref<25x1x128xf32, #tpu.memory_space<vmem>>, vector<1x1x128xf32>,
    %c9 = arith.constant 9 : index
    %c0_74 = arith.constant 0 : index
    %c0_75 = arith.constant 0 : index
    %248 = vector.load %arg1[%c9, %c0_74, %c0_75] : memref<30x1x128xf32, #tpu.memory_space<vmem>>, vector<1x1x128xf32>
    %249 = vector.shape_cast %248 : vector<1x1x128xf32> to vector<1x128xf32>
    %c10 = arith.constant 10 : index
    %c0_76 = arith.constant 0 : index
    %c0_77 = arith.constant 0 : index
    %250 = vector.load %arg1[%c10, %c0_76, %c0_77] : memref<30x1x128xf32, #tpu.memory_space<vmem>>, vector<1x1x128xf32>
    %251 = vector.shape_cast %250 : vector<1x1x128xf32> to vector<1x128xf32>
    %c11 = arith.constant 11 : index
    %c0_78 = arith.constant 0 : index
    %c0_79 = arith.constant 0 : index
    %252 = vector.load %arg1[%c11, %c0_78, %c0_79] : memref<30x1x128xf32, #tpu.memory_space<vmem>>, vector<1x1x128xf32>
    %253 = vector.shape_cast %252 : vector<1x1x128xf32> to vector<1x128xf32>
    %c6_80 = arith.constant 6 : index
    %c0_81 = arith.constant 0 : index
    %c0_82 = arith.constant 0 : index
    %254 = vector.load %arg1[%c6_80, %c0_81, %c0_82] : memref<30x1x128xf32, #tpu.memory_space<vmem>>, vector<1x1x128xf32>
    %255 = vector.shape_cast %254 : vector<1x1x128xf32> to vector<1x128xf32>
    %c7_83 = arith.constant 7 : index
    %c0_84 = arith.constant 0 : index
    %c0_85 = arith.constant 0 : index
    %256 = vector.load %arg1[%c7_83, %c0_84, %c0_85] : memref<30x1x128xf32, #tpu.memory_space<vmem>>, vector<1x1x128xf32>
    %257 = vector.shape_cast %256 : vector<1x1x128xf32> to vector<1x128xf32>
    %c8_86 = arith.constant 8 : index
    %c0_87 = arith.constant 0 : index
    %c0_88 = arith.constant 0 : index
    %258 = vector.load %arg1[%c8_86, %c0_87, %c0_88] : memref<30x1x128xf32, #tpu.memory_space<vmem>>, vector<1x1x128xf32>
    %259 = vector.shape_cast %258 : vector<1x1x128xf32> to vector<1x128xf32>
    %c0_89 = arith.constant 0 : index
    %c0_90 = arith.constant 0 : index
    %c0_91 = arith.constant 0 : index
    %260 = vector.load %arg1[%c0_89, %c0_90, %c0_91] : memref<30x1x128xf32, #tpu.memory_space<vmem>>, vector<1x1x128xf32>
    %261 = vector.shape_cast %260 : vector<1x1x128xf32> to vector<1x128xf32>
    %c1_92 = arith.constant 1 : index
    %c0_93 = arith.constant 0 : index
    %c0_94 = arith.constant 0 : index
    %262 = vector.load %arg1[%c1_92, %c0_93, %c0_94] : memref<30x1x128xf32, #tpu.memory_space<vmem>>, vector<1x1x128xf32>
    %263 = vector.shape_cast %262 : vector<1x1x128xf32> to vector<1x128xf32>
    %c2_95 = arith.constant 2 : index
    %c0_96 = arith.constant 0 : index
    %c0_97 = arith.constant 0 : index
    %264 = vector.load %arg1[%c2_95, %c0_96, %c0_97] : memref<30x1x128xf32, #tpu.memory_space<vmem>>, vector<1x1x128xf32>
    %265 = vector.shape_cast %264 : vector<1x1x128xf32> to vector<1x128xf32>
    %c15_98 = arith.constant 15 : index
    %c0_99 = arith.constant 0 : index
    %c0_100 = arith.constant 0 : index
    %266 = vector.load %arg1[%c15_98, %c0_99, %c0_100] : memref<30x1x128xf32, #tpu.memory_space<vmem>>, vector<1x1x128xf32>
    %267 = vector.shape_cast %266 : vector<1x1x128xf32> to vector<1x128xf32>
    %c16_101 = arith.constant 16 : index
    %c0_102 = arith.constant 0 : index
    %c0_103 = arith.constant 0 : index
    %268 = vector.load %arg1[%c16_101, %c0_102, %c0_103] : memref<30x1x128xf32, #tpu.memory_space<vmem>>, vector<1x1x128xf32>
    %269 = vector.shape_cast %268 : vector<1x1x128xf32> to vector<1x128xf32>
    %c17_104 = arith.constant 17 : index
    %c0_105 = arith.constant 0 : index
    %c0_106 = arith.constant 0 : index
    %270 = vector.load %arg1[%c17_104, %c0_105, %c0_106] : memref<30x1x128xf32, #tpu.memory_space<vmem>>, vector<1x1x128xf32>
    %271 = vector.shape_cast %270 : vector<1x1x128xf32> to vector<1x128xf32>
    %272 = arith.subf %249, %255 : vector<1x128xf32>
    %273 = arith.subf %251, %257 : vector<1x128xf32>
    %274 = arith.subf %253, %259 : vector<1x128xf32>
    %275 = arith.subf %261, %255 : vector<1x128xf32>
    %276 = arith.subf %263, %257 : vector<1x128xf32>
    %277 = arith.subf %265, %259 : vector<1x128xf32>
    %278 = arith.mulf %272, %272 : vector<1x128xf32>
    %279 = arith.mulf %273, %273 : vector<1x128xf32>
    %280 = arith.addf %278, %279 : vector<1x128xf32>
    %281 = arith.mulf %274, %274 : vector<1x128xf32>
    %282 = arith.addf %280, %281 : vector<1x128xf32>
    %283 = arith.mulf %275, %275 : vector<1x128xf32>
    %284 = arith.mulf %276, %276 : vector<1x128xf32>
    %285 = arith.addf %283, %284 : vector<1x128xf32>
    %286 = arith.mulf %277, %277 : vector<1x128xf32>
    %287 = arith.addf %285, %286 : vector<1x128xf32>
    %288 = math.sqrt %282 : vector<1x128xf32>
    %289 = arith.mulf %272, %275 : vector<1x128xf32>
    %290 = arith.mulf %273, %276 : vector<1x128xf32>
    %291 = arith.addf %289, %290 : vector<1x128xf32>
    %292 = arith.mulf %274, %277 : vector<1x128xf32>
    %293 = arith.addf %291, %292 : vector<1x128xf32>
    %294 = arith.mulf %282, %287 : vector<1x128xf32>
    %295 = math.rsqrt %294 : vector<1x128xf32>
    %296 = arith.mulf %293, %295 : vector<1x128xf32>
    %cst_107 = arith.constant -1.000000e+00 : f32
    %cst_108 = arith.constant 1.000000e+00 : f32
    %297 = vector.broadcast %cst_107 : f32 to vector<1x128xf32>
    %298 = arith.maximumf %297, %296 : vector<1x128xf32>
    %299 = vector.broadcast %cst_108 : f32 to vector<1x128xf32>
    %300 = arith.minimumf %299, %298 : vector<1x128xf32>
    %301 = arith.mulf %300, %300 : vector<1x128xf32>
    %cst_109 = arith.constant 1.000000e+00 : f32
    %302 = vector.broadcast %cst_109 : f32 to vector<1x128xf32>
    %303 = arith.subf %302, %301 : vector<1x128xf32>
    %cst_110 = arith.constant 0.000000e+00 : f32
    %304 = vector.broadcast %cst_110 : f32 to vector<1x128xf32>
    %305 = arith.maximumf %303, %304 : vector<1x128xf32>
    %306 = math.sqrt %305 : vector<1x128xf32>
    %307 = math.absf %306 : vector<1x128xf32>
    %308 = math.absf %300 : vector<1x128xf32>
    %309 = arith.maximumf %307, %308 : vector<1x128xf32>
    %310 = arith.minimumf %307, %308 : vector<1x128xf32>
    %311 = tpu.reciprocal %309 {approx = true} : vector<1x128xf32> -> vector<1x128xf32>
    %312 = arith.mulf %309, %311 : vector<1x128xf32>
    %cst_111 = arith.constant 2.000000e+00 : f32
    %313 = vector.broadcast %cst_111 : f32 to vector<1x128xf32>
    %314 = arith.subf %313, %312 : vector<1x128xf32>
    %315 = arith.mulf %311, %314 : vector<1x128xf32>
    %316 = arith.mulf %310, %315 : vector<1x128xf32>
    %317 = arith.mulf %316, %316 : vector<1x128xf32>
    %cst_112 = arith.constant -0.00151638396 : f32
    %318 = vector.broadcast %cst_112 : f32 to vector<1x128xf32>
    %319 = arith.mulf %318, %317 : vector<1x128xf32>
    %cst_113 = arith.constant 0.00960627105 : f32
    %320 = vector.broadcast %cst_113 : f32 to vector<1x128xf32>
    %321 = arith.addf %319, %320 : vector<1x128xf32>
    %322 = arith.mulf %321, %317 : vector<1x128xf32>
    %cst_114 = arith.constant -0.0285813473 : f32
    %323 = vector.broadcast %cst_114 : f32 to vector<1x128xf32>
    %324 = arith.addf %322, %323 : vector<1x128xf32>
    %325 = arith.mulf %324, %317 : vector<1x128xf32>
    %cst_115 = arith.constant 0.0551441759 : f32
    %326 = vector.broadcast %cst_115 : f32 to vector<1x128xf32>
    %327 = arith.addf %325, %326 : vector<1x128xf32>
    %328 = arith.mulf %327, %317 : vector<1x128xf32>
    %cst_116 = arith.constant -0.0822269394 : f32
    %329 = vector.broadcast %cst_116 : f32 to vector<1x128xf32>
    %330 = arith.addf %328, %329 : vector<1x128xf32>
    %331 = arith.mulf %330, %317 : vector<1x128xf32>
    %cst_117 = arith.constant 0.108822249 : f32
    %332 = vector.broadcast %cst_117 : f32 to vector<1x128xf32>
    %333 = arith.addf %331, %332 : vector<1x128xf32>
    %334 = arith.mulf %333, %317 : vector<1x128xf32>
    %cst_118 = arith.constant -0.142484158 : f32
    %335 = vector.broadcast %cst_118 : f32 to vector<1x128xf32>
    %336 = arith.addf %334, %335 : vector<1x128xf32>
    %337 = arith.mulf %336, %317 : vector<1x128xf32>
    %cst_119 = arith.constant 0.199966252 : f32
    %338 = vector.broadcast %cst_119 : f32 to vector<1x128xf32>
    %339 = arith.addf %337, %338 : vector<1x128xf32>
    %340 = arith.mulf %339, %317 : vector<1x128xf32>
    %cst_120 = arith.constant -0.333331943 : f32
    %341 = vector.broadcast %cst_120 : f32 to vector<1x128xf32>
    %342 = arith.addf %340, %341 : vector<1x128xf32>
    %343 = arith.mulf %342, %317 : vector<1x128xf32>
    %cst_121 = arith.constant 1.000000e+00 : f32
    %344 = vector.broadcast %cst_121 : f32 to vector<1x128xf32>
    %345 = arith.addf %343, %344 : vector<1x128xf32>
    %346 = arith.mulf %345, %316 : vector<1x128xf32>
    %347 = arith.cmpf ogt, %307, %308 : vector<1x128xf32>
    %cst_122 = arith.constant 1.57079637 : f32
    %348 = vector.broadcast %cst_122 : f32 to vector<1x128xf32>
    %349 = arith.subf %348, %346 : vector<1x128xf32>
    %350 = arith.select %347, %349, %346 : vector<1x128xi1>, vector<1x128xf32>
    %cst_123 = arith.constant 0.000000e+00 : f32
    %351 = vector.broadcast %cst_123 : f32 to vector<1x128xf32>
    %352 = arith.cmpf oge, %300, %351 : vector<1x128xf32>
    %cst_124 = arith.constant 3.14159274 : f32
    %353 = vector.broadcast %cst_124 : f32 to vector<1x128xf32>
    %354 = arith.subf %353, %350 : vector<1x128xf32>
    %355 = arith.select %352, %350, %354 : vector<1x128xi1>, vector<1x128xf32>
    %cst_125 = arith.constant 0.000000e+00 : f32
    %356 = vector.broadcast %cst_125 : f32 to vector<1x128xf32>
    %357 = arith.cmpf oge, %306, %356 : vector<1x128xf32>
    %cst_126 = arith.constant 0.000000e+00 : f32
    %358 = vector.broadcast %cst_126 : f32 to vector<1x128xf32>
    %359 = arith.subf %358, %355 : vector<1x128xf32>
    %360 = arith.select %357, %355, %359 : vector<1x128xi1>, vector<1x128xf32>
    %361 = arith.subf %255, %249 : vector<1x128xf32>
    %362 = arith.subf %257, %251 : vector<1x128xf32>
    %363 = arith.subf %259, %253 : vector<1x128xf32>
    %364 = arith.subf %267, %261 : vector<1x128xf32>
    %365 = arith.subf %269, %263 : vector<1x128xf32>
    %366 = arith.subf %271, %265 : vector<1x128xf32>
    %367 = arith.mulf %362, %277 : vector<1x128xf32>
    %368 = arith.mulf %363, %276 : vector<1x128xf32>
    %369 = arith.subf %367, %368 : vector<1x128xf32>
    %370 = arith.mulf %363, %275 : vector<1x128xf32>
    %371 = arith.mulf %361, %277 : vector<1x128xf32>
    %372 = arith.subf %370, %371 : vector<1x128xf32>
    %373 = arith.mulf %361, %276 : vector<1x128xf32>
    %374 = arith.mulf %362, %275 : vector<1x128xf32>
    %375 = arith.subf %373, %374 : vector<1x128xf32>
    %376 = arith.mulf %276, %366 : vector<1x128xf32>
    %377 = arith.mulf %277, %365 : vector<1x128xf32>
    %378 = arith.subf %376, %377 : vector<1x128xf32>
    %379 = arith.mulf %277, %364 : vector<1x128xf32>
    %380 = arith.mulf %275, %366 : vector<1x128xf32>
    %381 = arith.subf %379, %380 : vector<1x128xf32>
    %382 = arith.mulf %275, %365 : vector<1x128xf32>
    %383 = arith.mulf %276, %364 : vector<1x128xf32>
    %384 = arith.subf %382, %383 : vector<1x128xf32>
    %385 = arith.mulf %372, %277 : vector<1x128xf32>
    %386 = arith.mulf %375, %276 : vector<1x128xf32>
    %387 = arith.subf %385, %386 : vector<1x128xf32>
    %388 = arith.mulf %375, %275 : vector<1x128xf32>
    %389 = arith.mulf %369, %277 : vector<1x128xf32>
    %390 = arith.subf %388, %389 : vector<1x128xf32>
    %391 = arith.mulf %369, %276 : vector<1x128xf32>
    %392 = arith.mulf %372, %275 : vector<1x128xf32>
    %393 = arith.subf %391, %392 : vector<1x128xf32>
    %394 = math.rsqrt %287 : vector<1x128xf32>
    %395 = arith.mulf %387, %378 : vector<1x128xf32>
    %396 = arith.mulf %390, %381 : vector<1x128xf32>
    %397 = arith.addf %395, %396 : vector<1x128xf32>
    %398 = arith.mulf %393, %384 : vector<1x128xf32>
    %399 = arith.addf %397, %398 : vector<1x128xf32>
    %400 = arith.mulf %399, %394 : vector<1x128xf32>
    %401 = arith.mulf %369, %378 : vector<1x128xf32>
    %402 = arith.mulf %372, %381 : vector<1x128xf32>
    %403 = arith.addf %401, %402 : vector<1x128xf32>
    %404 = arith.mulf %375, %384 : vector<1x128xf32>
    %405 = arith.addf %403, %404 : vector<1x128xf32>
    %406 = math.absf %400 : vector<1x128xf32>
    %407 = math.absf %405 : vector<1x128xf32>
    %408 = arith.maximumf %406, %407 : vector<1x128xf32>
    %409 = arith.minimumf %406, %407 : vector<1x128xf32>
    %410 = tpu.reciprocal %408 {approx = true} : vector<1x128xf32> -> vector<1x128xf32>
    %411 = arith.mulf %408, %410 : vector<1x128xf32>
    %cst_127 = arith.constant 2.000000e+00 : f32
    %412 = vector.broadcast %cst_127 : f32 to vector<1x128xf32>
    %413 = arith.subf %412, %411 : vector<1x128xf32>
    %414 = arith.mulf %410, %413 : vector<1x128xf32>
    %415 = arith.mulf %409, %414 : vector<1x128xf32>
    %416 = arith.mulf %415, %415 : vector<1x128xf32>
    %cst_128 = arith.constant -0.00151638396 : f32
    %417 = vector.broadcast %cst_128 : f32 to vector<1x128xf32>
    %418 = arith.mulf %417, %416 : vector<1x128xf32>
    %cst_129 = arith.constant 0.00960627105 : f32
    %419 = vector.broadcast %cst_129 : f32 to vector<1x128xf32>
    %420 = arith.addf %418, %419 : vector<1x128xf32>
    %421 = arith.mulf %420, %416 : vector<1x128xf32>
    %cst_130 = arith.constant -0.0285813473 : f32
    %422 = vector.broadcast %cst_130 : f32 to vector<1x128xf32>
    %423 = arith.addf %421, %422 : vector<1x128xf32>
    %424 = arith.mulf %423, %416 : vector<1x128xf32>
    %cst_131 = arith.constant 0.0551441759 : f32
    %425 = vector.broadcast %cst_131 : f32 to vector<1x128xf32>
    %426 = arith.addf %424, %425 : vector<1x128xf32>
    %427 = arith.mulf %426, %416 : vector<1x128xf32>
    %cst_132 = arith.constant -0.0822269394 : f32
    %428 = vector.broadcast %cst_132 : f32 to vector<1x128xf32>
    %429 = arith.addf %427, %428 : vector<1x128xf32>
    %430 = arith.mulf %429, %416 : vector<1x128xf32>
    %cst_133 = arith.constant 0.108822249 : f32
    %431 = vector.broadcast %cst_133 : f32 to vector<1x128xf32>
    %432 = arith.addf %430, %431 : vector<1x128xf32>
    %433 = arith.mulf %432, %416 : vector<1x128xf32>
    %cst_134 = arith.constant -0.142484158 : f32
    %434 = vector.broadcast %cst_134 : f32 to vector<1x128xf32>
    %435 = arith.addf %433, %434 : vector<1x128xf32>
    %436 = arith.mulf %435, %416 : vector<1x128xf32>
    %cst_135 = arith.constant 0.199966252 : f32
    %437 = vector.broadcast %cst_135 : f32 to vector<1x128xf32>
    %438 = arith.addf %436, %437 : vector<1x128xf32>
    %439 = arith.mulf %438, %416 : vector<1x128xf32>
    %cst_136 = arith.constant -0.333331943 : f32
    %440 = vector.broadcast %cst_136 : f32 to vector<1x128xf32>
    %441 = arith.addf %439, %440 : vector<1x128xf32>
    %442 = arith.mulf %441, %416 : vector<1x128xf32>
    %cst_137 = arith.constant 1.000000e+00 : f32
    %443 = vector.broadcast %cst_137 : f32 to vector<1x128xf32>
    %444 = arith.addf %442, %443 : vector<1x128xf32>
    %445 = arith.mulf %444, %415 : vector<1x128xf32>
    %446 = arith.cmpf ogt, %406, %407 : vector<1x128xf32>
    %cst_138 = arith.constant 1.57079637 : f32
    %447 = vector.broadcast %cst_138 : f32 to vector<1x128xf32>
    %448 = arith.subf %447, %445 : vector<1x128xf32>
    %449 = arith.select %446, %448, %445 : vector<1x128xi1>, vector<1x128xf32>
    %cst_139 = arith.constant 0.000000e+00 : f32
    %450 = vector.broadcast %cst_139 : f32 to vector<1x128xf32>
    %451 = arith.cmpf oge, %405, %450 : vector<1x128xf32>
    %cst_140 = arith.constant 3.14159274 : f32
    %452 = vector.broadcast %cst_140 : f32 to vector<1x128xf32>
    %453 = arith.subf %452, %449 : vector<1x128xf32>
    %454 = arith.select %451, %449, %453 : vector<1x128xi1>, vector<1x128xf32>
    %cst_141 = arith.constant 0.000000e+00 : f32
    %455 = vector.broadcast %cst_141 : f32 to vector<1x128xf32>
    %456 = arith.cmpf oge, %400, %455 : vector<1x128xf32>
    %cst_142 = arith.constant 0.000000e+00 : f32
    %457 = vector.broadcast %cst_142 : f32 to vector<1x128xf32>
    %458 = arith.subf %457, %454 : vector<1x128xf32>
    %459 = arith.select %456, %454, %458 : vector<1x128xi1>, vector<1x128xf32>
    %460 = arith.mulf %369, %369 : vector<1x128xf32>
    %461 = arith.mulf %372, %372 : vector<1x128xf32>
    %462 = arith.addf %460, %461 : vector<1x128xf32>
    %463 = arith.mulf %375, %375 : vector<1x128xf32>
    %464 = arith.addf %462, %463 : vector<1x128xf32>
    %465 = arith.mulf %282, %464 : vector<1x128xf32>
    %466 = arith.mulf %394, %394 : vector<1x128xf32>
    %467 = arith.mulf %465, %466 : vector<1x128xf32>
    %468 = math.log %467 : vector<1x128xf32>
    %469 = arith.addf %220, %468 : vector<1x128xf32>
    %c3_143 = arith.constant 3 : index
    %470 = memref.load %arg4[%c3_143] : memref<18xf32, #tpu.memory_space<smem>>
    %471 = vector.broadcast %470 : f32 to vector<1x128xf32>
    %472 = arith.subf %288, %471 : vector<1x128xf32>
    %c3_144 = arith.constant 3 : index
    %473 = memref.load %arg5[%c3_144] : memref<18xf32, #tpu.memory_space<smem>>
    %474 = vector.broadcast %473 : f32 to vector<1x128xf32>
    %475 = arith.mulf %472, %474 : vector<1x128xf32>
    %c9_145 = arith.constant 9 : index
    %c0_146 = arith.constant 0 : index
    %c0_147 = arith.constant 0 : index
    %476 = vector.load %arg7[%c9_145, %c0_146, %c0_147] : memref<25x1x128xf32, #tpu.memory_space<vmem>>, vector<1x1x128xf32>
    %477 = vector.shape_cast %476 : vector<1x1x128xf32> to vector<1x128xf32>
    %478 = vector.shape_cast %475 : vector<1x128xf32> to vector<1x1x128xf32>
    tpu.vector_store %arg7[%c9_145, %c0_146, %c0_147], %478 {strides = array<i32>} : memref<25x1x128xf32, #tpu.memory_space<vmem>>, vector<1x1x128xf32>,
    %c4_148 = arith.constant 4 : index
    %479 = memref.load %arg4[%c4_148] : memref<18xf32, #tpu.memory_space<smem>>
    %480 = vector.broadcast %479 : f32 to vector<1x128xf32>
    %481 = arith.subf %360, %480 : vector<1x128xf32>
    %c4_149 = arith.constant 4 : index
    %482 = memref.load %arg5[%c4_149] : memref<18xf32, #tpu.memory_space<smem>>
    %483 = vector.broadcast %482 : f32 to vector<1x128xf32>
    %484 = arith.mulf %481, %483 : vector<1x128xf32>
    %c10_150 = arith.constant 10 : index
    %c0_151 = arith.constant 0 : index
    %c0_152 = arith.constant 0 : index
    %485 = vector.load %arg7[%c10_150, %c0_151, %c0_152] : memref<25x1x128xf32, #tpu.memory_space<vmem>>, vector<1x1x128xf32>
    %486 = vector.shape_cast %485 : vector<1x1x128xf32> to vector<1x128xf32>
    %487 = vector.shape_cast %484 : vector<1x128xf32> to vector<1x1x128xf32>
    tpu.vector_store %arg7[%c10_150, %c0_151, %c0_152], %487 {strides = array<i32>} : memref<25x1x128xf32, #tpu.memory_space<vmem>>, vector<1x1x128xf32>,
    %c5_153 = arith.constant 5 : index
    %488 = memref.load %arg4[%c5_153] : memref<18xf32, #tpu.memory_space<smem>>
    %489 = vector.broadcast %488 : f32 to vector<1x128xf32>
    %490 = arith.subf %459, %489 : vector<1x128xf32>
    %c5_154 = arith.constant 5 : index
    %491 = memref.load %arg5[%c5_154] : memref<18xf32, #tpu.memory_space<smem>>
    %492 = vector.broadcast %491 : f32 to vector<1x128xf32>
    %493 = arith.mulf %490, %492 : vector<1x128xf32>
    %c11_155 = arith.constant 11 : index
    %c0_156 = arith.constant 0 : index
    %c0_157 = arith.constant 0 : index
    %494 = vector.load %arg7[%c11_155, %c0_156, %c0_157] : memref<25x1x128xf32, #tpu.memory_space<vmem>>, vector<1x1x128xf32>
    %495 = vector.shape_cast %494 : vector<1x1x128xf32> to vector<1x128xf32>
    %496 = vector.shape_cast %493 : vector<1x128xf32> to vector<1x1x128xf32>
    tpu.vector_store %arg7[%c11_155, %c0_156, %c0_157], %496 {strides = array<i32>} : memref<25x1x128xf32, #tpu.memory_space<vmem>>, vector<1x1x128xf32>,
    %c12 = arith.constant 12 : index
    %c0_158 = arith.constant 0 : index
    %c0_159 = arith.constant 0 : index
    %497 = vector.load %arg1[%c12, %c0_158, %c0_159] : memref<30x1x128xf32, #tpu.memory_space<vmem>>, vector<1x1x128xf32>
    %498 = vector.shape_cast %497 : vector<1x1x128xf32> to vector<1x128xf32>
    %c13 = arith.constant 13 : index
    %c0_160 = arith.constant 0 : index
    %c0_161 = arith.constant 0 : index
    %499 = vector.load %arg1[%c13, %c0_160, %c0_161] : memref<30x1x128xf32, #tpu.memory_space<vmem>>, vector<1x1x128xf32>
    %500 = vector.shape_cast %499 : vector<1x1x128xf32> to vector<1x128xf32>
    %c14 = arith.constant 14 : index
    %c0_162 = arith.constant 0 : index
    %c0_163 = arith.constant 0 : index
    %501 = vector.load %arg1[%c14, %c0_162, %c0_163] : memref<30x1x128xf32, #tpu.memory_space<vmem>>, vector<1x1x128xf32>
    %502 = vector.shape_cast %501 : vector<1x1x128xf32> to vector<1x128xf32>
    %c9_164 = arith.constant 9 : index
    %c0_165 = arith.constant 0 : index
    %c0_166 = arith.constant 0 : index
    %503 = vector.load %arg1[%c9_164, %c0_165, %c0_166] : memref<30x1x128xf32, #tpu.memory_space<vmem>>, vector<1x1x128xf32>
    %504 = vector.shape_cast %503 : vector<1x1x128xf32> to vector<1x128xf32>
    %c10_167 = arith.constant 10 : index
    %c0_168 = arith.constant 0 : index
    %c0_169 = arith.constant 0 : index
    %505 = vector.load %arg1[%c10_167, %c0_168, %c0_169] : memref<30x1x128xf32, #tpu.memory_space<vmem>>, vector<1x1x128xf32>
    %506 = vector.shape_cast %505 : vector<1x1x128xf32> to vector<1x128xf32>
    %c11_170 = arith.constant 11 : index
    %c0_171 = arith.constant 0 : index
    %c0_172 = arith.constant 0 : index
    %507 = vector.load %arg1[%c11_170, %c0_171, %c0_172] : memref<30x1x128xf32, #tpu.memory_space<vmem>>, vector<1x1x128xf32>
    %508 = vector.shape_cast %507 : vector<1x1x128xf32> to vector<1x128xf32>
    %c6_173 = arith.constant 6 : index
    %c0_174 = arith.constant 0 : index
    %c0_175 = arith.constant 0 : index
    %509 = vector.load %arg1[%c6_173, %c0_174, %c0_175] : memref<30x1x128xf32, #tpu.memory_space<vmem>>, vector<1x1x128xf32>
    %510 = vector.shape_cast %509 : vector<1x1x128xf32> to vector<1x128xf32>
    %c7_176 = arith.constant 7 : index
    %c0_177 = arith.constant 0 : index
    %c0_178 = arith.constant 0 : index
    %511 = vector.load %arg1[%c7_176, %c0_177, %c0_178] : memref<30x1x128xf32, #tpu.memory_space<vmem>>, vector<1x1x128xf32>
    %512 = vector.shape_cast %511 : vector<1x1x128xf32> to vector<1x128xf32>
    %c8_179 = arith.constant 8 : index
    %c0_180 = arith.constant 0 : index
    %c0_181 = arith.constant 0 : index
    %513 = vector.load %arg1[%c8_179, %c0_180, %c0_181] : memref<30x1x128xf32, #tpu.memory_space<vmem>>, vector<1x1x128xf32>
    %514 = vector.shape_cast %513 : vector<1x1x128xf32> to vector<1x128xf32>
    %c0_182 = arith.constant 0 : index
    %c0_183 = arith.constant 0 : index
    %c0_184 = arith.constant 0 : index
    %515 = vector.load %arg1[%c0_182, %c0_183, %c0_184] : memref<30x1x128xf32, #tpu.memory_space<vmem>>, vector<1x1x128xf32>
    %516 = vector.shape_cast %515 : vector<1x1x128xf32> to vector<1x128xf32>
    %c1_185 = arith.constant 1 : index
    %c0_186 = arith.constant 0 : index
    %c0_187 = arith.constant 0 : index
    %517 = vector.load %arg1[%c1_185, %c0_186, %c0_187] : memref<30x1x128xf32, #tpu.memory_space<vmem>>, vector<1x1x128xf32>
    %518 = vector.shape_cast %517 : vector<1x1x128xf32> to vector<1x128xf32>
    %c2_188 = arith.constant 2 : index
    %c0_189 = arith.constant 0 : index
    %c0_190 = arith.constant 0 : index
    %519 = vector.load %arg1[%c2_188, %c0_189, %c0_190] : memref<30x1x128xf32, #tpu.memory_space<vmem>>, vector<1x1x128xf32>
    %520 = vector.shape_cast %519 : vector<1x1x128xf32> to vector<1x128xf32>
    %521 = arith.subf %498, %504 : vector<1x128xf32>
    %522 = arith.subf %500, %506 : vector<1x128xf32>
    %523 = arith.subf %502, %508 : vector<1x128xf32>
    %524 = arith.subf %510, %504 : vector<1x128xf32>
    %525 = arith.subf %512, %506 : vector<1x128xf32>
    %526 = arith.subf %514, %508 : vector<1x128xf32>
    %527 = arith.mulf %521, %521 : vector<1x128xf32>
    %528 = arith.mulf %522, %522 : vector<1x128xf32>
    %529 = arith.addf %527, %528 : vector<1x128xf32>
    %530 = arith.mulf %523, %523 : vector<1x128xf32>
    %531 = arith.addf %529, %530 : vector<1x128xf32>
    %532 = arith.mulf %524, %524 : vector<1x128xf32>
    %533 = arith.mulf %525, %525 : vector<1x128xf32>
    %534 = arith.addf %532, %533 : vector<1x128xf32>
    %535 = arith.mulf %526, %526 : vector<1x128xf32>
    %536 = arith.addf %534, %535 : vector<1x128xf32>
    %537 = math.sqrt %531 : vector<1x128xf32>
    %538 = arith.mulf %521, %524 : vector<1x128xf32>
    %539 = arith.mulf %522, %525 : vector<1x128xf32>
    %540 = arith.addf %538, %539 : vector<1x128xf32>
    %541 = arith.mulf %523, %526 : vector<1x128xf32>
    %542 = arith.addf %540, %541 : vector<1x128xf32>
    %543 = arith.mulf %531, %536 : vector<1x128xf32>
    %544 = math.rsqrt %543 : vector<1x128xf32>
    %545 = arith.mulf %542, %544 : vector<1x128xf32>
    %cst_191 = arith.constant -1.000000e+00 : f32
    %cst_192 = arith.constant 1.000000e+00 : f32
    %546 = vector.broadcast %cst_191 : f32 to vector<1x128xf32>
    %547 = arith.maximumf %546, %545 : vector<1x128xf32>
    %548 = vector.broadcast %cst_192 : f32 to vector<1x128xf32>
    %549 = arith.minimumf %548, %547 : vector<1x128xf32>
    %550 = arith.mulf %549, %549 : vector<1x128xf32>
    %cst_193 = arith.constant 1.000000e+00 : f32
    %551 = vector.broadcast %cst_193 : f32 to vector<1x128xf32>
    %552 = arith.subf %551, %550 : vector<1x128xf32>
    %cst_194 = arith.constant 0.000000e+00 : f32
    %553 = vector.broadcast %cst_194 : f32 to vector<1x128xf32>
    %554 = arith.maximumf %552, %553 : vector<1x128xf32>
    %555 = math.sqrt %554 : vector<1x128xf32>
    %556 = math.absf %555 : vector<1x128xf32>
    %557 = math.absf %549 : vector<1x128xf32>
    %558 = arith.maximumf %556, %557 : vector<1x128xf32>
    %559 = arith.minimumf %556, %557 : vector<1x128xf32>
    %560 = tpu.reciprocal %558 {approx = true} : vector<1x128xf32> -> vector<1x128xf32>
    %561 = arith.mulf %558, %560 : vector<1x128xf32>
    %cst_195 = arith.constant 2.000000e+00 : f32
    %562 = vector.broadcast %cst_195 : f32 to vector<1x128xf32>
    %563 = arith.subf %562, %561 : vector<1x128xf32>
    %564 = arith.mulf %560, %563 : vector<1x128xf32>
    %565 = arith.mulf %559, %564 : vector<1x128xf32>
    %566 = arith.mulf %565, %565 : vector<1x128xf32>
    %cst_196 = arith.constant -0.00151638396 : f32
    %567 = vector.broadcast %cst_196 : f32 to vector<1x128xf32>
    %568 = arith.mulf %567, %566 : vector<1x128xf32>
    %cst_197 = arith.constant 0.00960627105 : f32
    %569 = vector.broadcast %cst_197 : f32 to vector<1x128xf32>
    %570 = arith.addf %568, %569 : vector<1x128xf32>
    %571 = arith.mulf %570, %566 : vector<1x128xf32>
    %cst_198 = arith.constant -0.0285813473 : f32
    %572 = vector.broadcast %cst_198 : f32 to vector<1x128xf32>
    %573 = arith.addf %571, %572 : vector<1x128xf32>
    %574 = arith.mulf %573, %566 : vector<1x128xf32>
    %cst_199 = arith.constant 0.0551441759 : f32
    %575 = vector.broadcast %cst_199 : f32 to vector<1x128xf32>
    %576 = arith.addf %574, %575 : vector<1x128xf32>
    %577 = arith.mulf %576, %566 : vector<1x128xf32>
    %cst_200 = arith.constant -0.0822269394 : f32
    %578 = vector.broadcast %cst_200 : f32 to vector<1x128xf32>
    %579 = arith.addf %577, %578 : vector<1x128xf32>
    %580 = arith.mulf %579, %566 : vector<1x128xf32>
    %cst_201 = arith.constant 0.108822249 : f32
    %581 = vector.broadcast %cst_201 : f32 to vector<1x128xf32>
    %582 = arith.addf %580, %581 : vector<1x128xf32>
    %583 = arith.mulf %582, %566 : vector<1x128xf32>
    %cst_202 = arith.constant -0.142484158 : f32
    %584 = vector.broadcast %cst_202 : f32 to vector<1x128xf32>
    %585 = arith.addf %583, %584 : vector<1x128xf32>
    %586 = arith.mulf %585, %566 : vector<1x128xf32>
    %cst_203 = arith.constant 0.199966252 : f32
    %587 = vector.broadcast %cst_203 : f32 to vector<1x128xf32>
    %588 = arith.addf %586, %587 : vector<1x128xf32>
    %589 = arith.mulf %588, %566 : vector<1x128xf32>
    %cst_204 = arith.constant -0.333331943 : f32
    %590 = vector.broadcast %cst_204 : f32 to vector<1x128xf32>
    %591 = arith.addf %589, %590 : vector<1x128xf32>
    %592 = arith.mulf %591, %566 : vector<1x128xf32>
    %cst_205 = arith.constant 1.000000e+00 : f32
    %593 = vector.broadcast %cst_205 : f32 to vector<1x128xf32>
    %594 = arith.addf %592, %593 : vector<1x128xf32>
    %595 = arith.mulf %594, %565 : vector<1x128xf32>
    %596 = arith.cmpf ogt, %556, %557 : vector<1x128xf32>
    %cst_206 = arith.constant 1.57079637 : f32
    %597 = vector.broadcast %cst_206 : f32 to vector<1x128xf32>
    %598 = arith.subf %597, %595 : vector<1x128xf32>
    %599 = arith.select %596, %598, %595 : vector<1x128xi1>, vector<1x128xf32>
    %cst_207 = arith.constant 0.000000e+00 : f32
    %600 = vector.broadcast %cst_207 : f32 to vector<1x128xf32>
    %601 = arith.cmpf oge, %549, %600 : vector<1x128xf32>
    %cst_208 = arith.constant 3.14159274 : f32
    %602 = vector.broadcast %cst_208 : f32 to vector<1x128xf32>
    %603 = arith.subf %602, %599 : vector<1x128xf32>
    %604 = arith.select %601, %599, %603 : vector<1x128xi1>, vector<1x128xf32>
    %cst_209 = arith.constant 0.000000e+00 : f32
    %605 = vector.broadcast %cst_209 : f32 to vector<1x128xf32>
    %606 = arith.cmpf oge, %555, %605 : vector<1x128xf32>
    %cst_210 = arith.constant 0.000000e+00 : f32
    %607 = vector.broadcast %cst_210 : f32 to vector<1x128xf32>
    %608 = arith.subf %607, %604 : vector<1x128xf32>
    %609 = arith.select %606, %604, %608 : vector<1x128xi1>, vector<1x128xf32>
    %610 = arith.subf %504, %498 : vector<1x128xf32>
    %611 = arith.subf %506, %500 : vector<1x128xf32>
    %612 = arith.subf %508, %502 : vector<1x128xf32>
    %613 = arith.subf %516, %510 : vector<1x128xf32>
    %614 = arith.subf %518, %512 : vector<1x128xf32>
    %615 = arith.subf %520, %514 : vector<1x128xf32>
    %616 = arith.mulf %611, %526 : vector<1x128xf32>
    %617 = arith.mulf %612, %525 : vector<1x128xf32>
    %618 = arith.subf %616, %617 : vector<1x128xf32>
    %619 = arith.mulf %612, %524 : vector<1x128xf32>
    %620 = arith.mulf %610, %526 : vector<1x128xf32>
    %621 = arith.subf %619, %620 : vector<1x128xf32>
    %622 = arith.mulf %610, %525 : vector<1x128xf32>
    %623 = arith.mulf %611, %524 : vector<1x128xf32>
    %624 = arith.subf %622, %623 : vector<1x128xf32>
    %625 = arith.mulf %525, %615 : vector<1x128xf32>
    %626 = arith.mulf %526, %614 : vector<1x128xf32>
    %627 = arith.subf %625, %626 : vector<1x128xf32>
    %628 = arith.mulf %526, %613 : vector<1x128xf32>
    %629 = arith.mulf %524, %615 : vector<1x128xf32>
    %630 = arith.subf %628, %629 : vector<1x128xf32>
    %631 = arith.mulf %524, %614 : vector<1x128xf32>
    %632 = arith.mulf %525, %613 : vector<1x128xf32>
    %633 = arith.subf %631, %632 : vector<1x128xf32>
    %634 = arith.mulf %621, %526 : vector<1x128xf32>
    %635 = arith.mulf %624, %525 : vector<1x128xf32>
    %636 = arith.subf %634, %635 : vector<1x128xf32>
    %637 = arith.mulf %624, %524 : vector<1x128xf32>
    %638 = arith.mulf %618, %526 : vector<1x128xf32>
    %639 = arith.subf %637, %638 : vector<1x128xf32>
    %640 = arith.mulf %618, %525 : vector<1x128xf32>
    %641 = arith.mulf %621, %524 : vector<1x128xf32>
    %642 = arith.subf %640, %641 : vector<1x128xf32>
    %643 = math.rsqrt %536 : vector<1x128xf32>
    %644 = arith.mulf %636, %627 : vector<1x128xf32>
    %645 = arith.mulf %639, %630 : vector<1x128xf32>
    %646 = arith.addf %644, %645 : vector<1x128xf32>
    %647 = arith.mulf %642, %633 : vector<1x128xf32>
    %648 = arith.addf %646, %647 : vector<1x128xf32>
    %649 = arith.mulf %648, %643 : vector<1x128xf32>
    %650 = arith.mulf %618, %627 : vector<1x128xf32>
    %651 = arith.mulf %621, %630 : vector<1x128xf32>
    %652 = arith.addf %650, %651 : vector<1x128xf32>
    %653 = arith.mulf %624, %633 : vector<1x128xf32>
    %654 = arith.addf %652, %653 : vector<1x128xf32>
    %655 = math.absf %649 : vector<1x128xf32>
    %656 = math.absf %654 : vector<1x128xf32>
    %657 = arith.maximumf %655, %656 : vector<1x128xf32>
    %658 = arith.minimumf %655, %656 : vector<1x128xf32>
    %659 = tpu.reciprocal %657 {approx = true} : vector<1x128xf32> -> vector<1x128xf32>
    %660 = arith.mulf %657, %659 : vector<1x128xf32>
    %cst_211 = arith.constant 2.000000e+00 : f32
    %661 = vector.broadcast %cst_211 : f32 to vector<1x128xf32>
    %662 = arith.subf %661, %660 : vector<1x128xf32>
    %663 = arith.mulf %659, %662 : vector<1x128xf32>
    %664 = arith.mulf %658, %663 : vector<1x128xf32>
    %665 = arith.mulf %664, %664 : vector<1x128xf32>
    %cst_212 = arith.constant -0.00151638396 : f32
    %666 = vector.broadcast %cst_212 : f32 to vector<1x128xf32>
    %667 = arith.mulf %666, %665 : vector<1x128xf32>
    %cst_213 = arith.constant 0.00960627105 : f32
    %668 = vector.broadcast %cst_213 : f32 to vector<1x128xf32>
    %669 = arith.addf %667, %668 : vector<1x128xf32>
    %670 = arith.mulf %669, %665 : vector<1x128xf32>
    %cst_214 = arith.constant -0.0285813473 : f32
    %671 = vector.broadcast %cst_214 : f32 to vector<1x128xf32>
    %672 = arith.addf %670, %671 : vector<1x128xf32>
    %673 = arith.mulf %672, %665 : vector<1x128xf32>
    %cst_215 = arith.constant 0.0551441759 : f32
    %674 = vector.broadcast %cst_215 : f32 to vector<1x128xf32>
    %675 = arith.addf %673, %674 : vector<1x128xf32>
    %676 = arith.mulf %675, %665 : vector<1x128xf32>
    %cst_216 = arith.constant -0.0822269394 : f32
    %677 = vector.broadcast %cst_216 : f32 to vector<1x128xf32>
    %678 = arith.addf %676, %677 : vector<1x128xf32>
    %679 = arith.mulf %678, %665 : vector<1x128xf32>
    %cst_217 = arith.constant 0.108822249 : f32
    %680 = vector.broadcast %cst_217 : f32 to vector<1x128xf32>
    %681 = arith.addf %679, %680 : vector<1x128xf32>
    %682 = arith.mulf %681, %665 : vector<1x128xf32>
    %cst_218 = arith.constant -0.142484158 : f32
    %683 = vector.broadcast %cst_218 : f32 to vector<1x128xf32>
    %684 = arith.addf %682, %683 : vector<1x128xf32>
    %685 = arith.mulf %684, %665 : vector<1x128xf32>
    %cst_219 = arith.constant 0.199966252 : f32
    %686 = vector.broadcast %cst_219 : f32 to vector<1x128xf32>
    %687 = arith.addf %685, %686 : vector<1x128xf32>
    %688 = arith.mulf %687, %665 : vector<1x128xf32>
    %cst_220 = arith.constant -0.333331943 : f32
    %689 = vector.broadcast %cst_220 : f32 to vector<1x128xf32>
    %690 = arith.addf %688, %689 : vector<1x128xf32>
    %691 = arith.mulf %690, %665 : vector<1x128xf32>
    %cst_221 = arith.constant 1.000000e+00 : f32
    %692 = vector.broadcast %cst_221 : f32 to vector<1x128xf32>
    %693 = arith.addf %691, %692 : vector<1x128xf32>
    %694 = arith.mulf %693, %664 : vector<1x128xf32>
    %695 = arith.cmpf ogt, %655, %656 : vector<1x128xf32>
    %cst_222 = arith.constant 1.57079637 : f32
    %696 = vector.broadcast %cst_222 : f32 to vector<1x128xf32>
    %697 = arith.subf %696, %694 : vector<1x128xf32>
    %698 = arith.select %695, %697, %694 : vector<1x128xi1>, vector<1x128xf32>
    %cst_223 = arith.constant 0.000000e+00 : f32
    %699 = vector.broadcast %cst_223 : f32 to vector<1x128xf32>
    %700 = arith.cmpf oge, %654, %699 : vector<1x128xf32>
    %cst_224 = arith.constant 3.14159274 : f32
    %701 = vector.broadcast %cst_224 : f32 to vector<1x128xf32>
    %702 = arith.subf %701, %698 : vector<1x128xf32>
    %703 = arith.select %700, %698, %702 : vector<1x128xi1>, vector<1x128xf32>
    %cst_225 = arith.constant 0.000000e+00 : f32
    %704 = vector.broadcast %cst_225 : f32 to vector<1x128xf32>
    %705 = arith.cmpf oge, %649, %704 : vector<1x128xf32>
    %cst_226 = arith.constant 0.000000e+00 : f32
    %706 = vector.broadcast %cst_226 : f32 to vector<1x128xf32>
    %707 = arith.subf %706, %703 : vector<1x128xf32>
    %708 = arith.select %705, %703, %707 : vector<1x128xi1>, vector<1x128xf32>
    %709 = arith.mulf %618, %618 : vector<1x128xf32>
    %710 = arith.mulf %621, %621 : vector<1x128xf32>
    %711 = arith.addf %709, %710 : vector<1x128xf32>
    %712 = arith.mulf %624, %624 : vector<1x128xf32>
    %713 = arith.addf %711, %712 : vector<1x128xf32>
    %714 = arith.mulf %531, %713 : vector<1x128xf32>
    %715 = arith.mulf %643, %643 : vector<1x128xf32>
    %716 = arith.mulf %714, %715 : vector<1x128xf32>
    %717 = math.log %716 : vector<1x128xf32>
    %718 = arith.addf %469, %717 : vector<1x128xf32>
    %c6_227 = arith.constant 6 : index
    %719 = memref.load %arg4[%c6_227] : memref<18xf32, #tpu.memory_space<smem>>
    %720 = vector.broadcast %719 : f32 to vector<1x128xf32>
    %721 = arith.subf %537, %720 : vector<1x128xf32>
    %c6_228 = arith.constant 6 : index
    %722 = memref.load %arg5[%c6_228] : memref<18xf32, #tpu.memory_space<smem>>
    %723 = vector.broadcast %722 : f32 to vector<1x128xf32>
    %724 = arith.mulf %721, %723 : vector<1x128xf32>
    %c12_229 = arith.constant 12 : index
    %c0_230 = arith.constant 0 : index
    %c0_231 = arith.constant 0 : index
    %725 = vector.load %arg7[%c12_229, %c0_230, %c0_231] : memref<25x1x128xf32, #tpu.memory_space<vmem>>, vector<1x1x128xf32>
    %726 = vector.shape_cast %725 : vector<1x1x128xf32> to vector<1x128xf32>
    %727 = vector.shape_cast %724 : vector<1x128xf32> to vector<1x1x128xf32>
    tpu.vector_store %arg7[%c12_229, %c0_230, %c0_231], %727 {strides = array<i32>} : memref<25x1x128xf32, #tpu.memory_space<vmem>>, vector<1x1x128xf32>,
    %c7_232 = arith.constant 7 : index
    %728 = memref.load %arg4[%c7_232] : memref<18xf32, #tpu.memory_space<smem>>
    %729 = vector.broadcast %728 : f32 to vector<1x128xf32>
    %730 = arith.subf %609, %729 : vector<1x128xf32>
    %c7_233 = arith.constant 7 : index
    %731 = memref.load %arg5[%c7_233] : memref<18xf32, #tpu.memory_space<smem>>
    %732 = vector.broadcast %731 : f32 to vector<1x128xf32>
    %733 = arith.mulf %730, %732 : vector<1x128xf32>
    %c13_234 = arith.constant 13 : index
    %c0_235 = arith.constant 0 : index
    %c0_236 = arith.constant 0 : index
    %734 = vector.load %arg7[%c13_234, %c0_235, %c0_236] : memref<25x1x128xf32, #tpu.memory_space<vmem>>, vector<1x1x128xf32>
    %735 = vector.shape_cast %734 : vector<1x1x128xf32> to vector<1x128xf32>
    %736 = vector.shape_cast %733 : vector<1x128xf32> to vector<1x1x128xf32>
    tpu.vector_store %arg7[%c13_234, %c0_235, %c0_236], %736 {strides = array<i32>} : memref<25x1x128xf32, #tpu.memory_space<vmem>>, vector<1x1x128xf32>,
    %c8_237 = arith.constant 8 : index
    %737 = memref.load %arg4[%c8_237] : memref<18xf32, #tpu.memory_space<smem>>
    %738 = vector.broadcast %737 : f32 to vector<1x128xf32>
    %739 = arith.subf %708, %738 : vector<1x128xf32>
    %c8_238 = arith.constant 8 : index
    %740 = memref.load %arg5[%c8_238] : memref<18xf32, #tpu.memory_space<smem>>
    %741 = vector.broadcast %740 : f32 to vector<1x128xf32>
    %742 = arith.mulf %739, %741 : vector<1x128xf32>
    %c14_239 = arith.constant 14 : index
    %c0_240 = arith.constant 0 : index
    %c0_241 = arith.constant 0 : index
    %743 = vector.load %arg7[%c14_239, %c0_240, %c0_241] : memref<25x1x128xf32, #tpu.memory_space<vmem>>, vector<1x1x128xf32>
    %744 = vector.shape_cast %743 : vector<1x1x128xf32> to vector<1x128xf32>
    %745 = vector.shape_cast %742 : vector<1x128xf32> to vector<1x1x128xf32>
    tpu.vector_store %arg7[%c14_239, %c0_240, %c0_241], %745 {strides = array<i32>} : memref<25x1x128xf32, #tpu.memory_space<vmem>>, vector<1x1x128xf32>,
    %c18 = arith.constant 18 : index
    %c0_242 = arith.constant 0 : index
    %c0_243 = arith.constant 0 : index
    %746 = vector.load %arg1[%c18, %c0_242, %c0_243] : memref<30x1x128xf32, #tpu.memory_space<vmem>>, vector<1x1x128xf32>
    %747 = vector.shape_cast %746 : vector<1x1x128xf32> to vector<1x128xf32>
    %c19 = arith.constant 19 : index
    %c0_244 = arith.constant 0 : index
    %c0_245 = arith.constant 0 : index
    %748 = vector.load %arg1[%c19, %c0_244, %c0_245] : memref<30x1x128xf32, #tpu.memory_space<vmem>>, vector<1x1x128xf32>
    %749 = vector.shape_cast %748 : vector<1x1x128xf32> to vector<1x128xf32>
    %c20 = arith.constant 20 : index
    %c0_246 = arith.constant 0 : index
    %c0_247 = arith.constant 0 : index
    %750 = vector.load %arg1[%c20, %c0_246, %c0_247] : memref<30x1x128xf32, #tpu.memory_space<vmem>>, vector<1x1x128xf32>
    %751 = vector.shape_cast %750 : vector<1x1x128xf32> to vector<1x128xf32>
    %c15_248 = arith.constant 15 : index
    %c0_249 = arith.constant 0 : index
    %c0_250 = arith.constant 0 : index
    %752 = vector.load %arg1[%c15_248, %c0_249, %c0_250] : memref<30x1x128xf32, #tpu.memory_space<vmem>>, vector<1x1x128xf32>
    %753 = vector.shape_cast %752 : vector<1x1x128xf32> to vector<1x128xf32>
    %c16_251 = arith.constant 16 : index
    %c0_252 = arith.constant 0 : index
    %c0_253 = arith.constant 0 : index
    %754 = vector.load %arg1[%c16_251, %c0_252, %c0_253] : memref<30x1x128xf32, #tpu.memory_space<vmem>>, vector<1x1x128xf32>
    %755 = vector.shape_cast %754 : vector<1x1x128xf32> to vector<1x128xf32>
    %c17_254 = arith.constant 17 : index
    %c0_255 = arith.constant 0 : index
    %c0_256 = arith.constant 0 : index
    %756 = vector.load %arg1[%c17_254, %c0_255, %c0_256] : memref<30x1x128xf32, #tpu.memory_space<vmem>>, vector<1x1x128xf32>
    %757 = vector.shape_cast %756 : vector<1x1x128xf32> to vector<1x128xf32>
    %c21 = arith.constant 21 : index
    %c0_257 = arith.constant 0 : index
    %c0_258 = arith.constant 0 : index
    %758 = vector.load %arg1[%c21, %c0_257, %c0_258] : memref<30x1x128xf32, #tpu.memory_space<vmem>>, vector<1x1x128xf32>
    %759 = vector.shape_cast %758 : vector<1x1x128xf32> to vector<1x128xf32>
    %c22 = arith.constant 22 : index
    %c0_259 = arith.constant 0 : index
    %c0_260 = arith.constant 0 : index
    %760 = vector.load %arg1[%c22, %c0_259, %c0_260] : memref<30x1x128xf32, #tpu.memory_space<vmem>>, vector<1x1x128xf32>
    %761 = vector.shape_cast %760 : vector<1x1x128xf32> to vector<1x128xf32>
    %c23 = arith.constant 23 : index
    %c0_261 = arith.constant 0 : index
    %c0_262 = arith.constant 0 : index
    %762 = vector.load %arg1[%c23, %c0_261, %c0_262] : memref<30x1x128xf32, #tpu.memory_space<vmem>>, vector<1x1x128xf32>
    %763 = vector.shape_cast %762 : vector<1x1x128xf32> to vector<1x128xf32>
    %c6_263 = arith.constant 6 : index
    %c0_264 = arith.constant 0 : index
    %c0_265 = arith.constant 0 : index
    %764 = vector.load %arg1[%c6_263, %c0_264, %c0_265] : memref<30x1x128xf32, #tpu.memory_space<vmem>>, vector<1x1x128xf32>
    %765 = vector.shape_cast %764 : vector<1x1x128xf32> to vector<1x128xf32>
    %c7_266 = arith.constant 7 : index
    %c0_267 = arith.constant 0 : index
    %c0_268 = arith.constant 0 : index
    %766 = vector.load %arg1[%c7_266, %c0_267, %c0_268] : memref<30x1x128xf32, #tpu.memory_space<vmem>>, vector<1x1x128xf32>
    %767 = vector.shape_cast %766 : vector<1x1x128xf32> to vector<1x128xf32>
    %c8_269 = arith.constant 8 : index
    %c0_270 = arith.constant 0 : index
    %c0_271 = arith.constant 0 : index
    %768 = vector.load %arg1[%c8_269, %c0_270, %c0_271] : memref<30x1x128xf32, #tpu.memory_space<vmem>>, vector<1x1x128xf32>
    %769 = vector.shape_cast %768 : vector<1x1x128xf32> to vector<1x128xf32>
    %770 = arith.subf %747, %753 : vector<1x128xf32>
    %771 = arith.subf %749, %755 : vector<1x128xf32>
    %772 = arith.subf %751, %757 : vector<1x128xf32>
    %773 = arith.subf %759, %753 : vector<1x128xf32>
    %774 = arith.subf %761, %755 : vector<1x128xf32>
    %775 = arith.subf %763, %757 : vector<1x128xf32>
    %776 = arith.mulf %770, %770 : vector<1x128xf32>
    %777 = arith.mulf %771, %771 : vector<1x128xf32>
    %778 = arith.addf %776, %777 : vector<1x128xf32>
    %779 = arith.mulf %772, %772 : vector<1x128xf32>
    %780 = arith.addf %778, %779 : vector<1x128xf32>
    %781 = arith.mulf %773, %773 : vector<1x128xf32>
    %782 = arith.mulf %774, %774 : vector<1x128xf32>
    %783 = arith.addf %781, %782 : vector<1x128xf32>
    %784 = arith.mulf %775, %775 : vector<1x128xf32>
    %785 = arith.addf %783, %784 : vector<1x128xf32>
    %786 = math.sqrt %780 : vector<1x128xf32>
    %787 = arith.mulf %770, %773 : vector<1x128xf32>
    %788 = arith.mulf %771, %774 : vector<1x128xf32>
    %789 = arith.addf %787, %788 : vector<1x128xf32>
    %790 = arith.mulf %772, %775 : vector<1x128xf32>
    %791 = arith.addf %789, %790 : vector<1x128xf32>
    %792 = arith.mulf %780, %785 : vector<1x128xf32>
    %793 = math.rsqrt %792 : vector<1x128xf32>
    %794 = arith.mulf %791, %793 : vector<1x128xf32>
    %cst_272 = arith.constant -1.000000e+00 : f32
    %cst_273 = arith.constant 1.000000e+00 : f32
    %795 = vector.broadcast %cst_272 : f32 to vector<1x128xf32>
    %796 = arith.maximumf %795, %794 : vector<1x128xf32>
    %797 = vector.broadcast %cst_273 : f32 to vector<1x128xf32>
    %798 = arith.minimumf %797, %796 : vector<1x128xf32>
    %799 = arith.mulf %798, %798 : vector<1x128xf32>
    %cst_274 = arith.constant 1.000000e+00 : f32
    %800 = vector.broadcast %cst_274 : f32 to vector<1x128xf32>
    %801 = arith.subf %800, %799 : vector<1x128xf32>
    %cst_275 = arith.constant 0.000000e+00 : f32
    %802 = vector.broadcast %cst_275 : f32 to vector<1x128xf32>
    %803 = arith.maximumf %801, %802 : vector<1x128xf32>
    %804 = math.sqrt %803 : vector<1x128xf32>
    %805 = math.absf %804 : vector<1x128xf32>
    %806 = math.absf %798 : vector<1x128xf32>
    %807 = arith.maximumf %805, %806 : vector<1x128xf32>
    %808 = arith.minimumf %805, %806 : vector<1x128xf32>
    %809 = tpu.reciprocal %807 {approx = true} : vector<1x128xf32> -> vector<1x128xf32>
    %810 = arith.mulf %807, %809 : vector<1x128xf32>
    %cst_276 = arith.constant 2.000000e+00 : f32
    %811 = vector.broadcast %cst_276 : f32 to vector<1x128xf32>
    %812 = arith.subf %811, %810 : vector<1x128xf32>
    %813 = arith.mulf %809, %812 : vector<1x128xf32>
    %814 = arith.mulf %808, %813 : vector<1x128xf32>
    %815 = arith.mulf %814, %814 : vector<1x128xf32>
    %cst_277 = arith.constant -0.00151638396 : f32
    %816 = vector.broadcast %cst_277 : f32 to vector<1x128xf32>
    %817 = arith.mulf %816, %815 : vector<1x128xf32>
    %cst_278 = arith.constant 0.00960627105 : f32
    %818 = vector.broadcast %cst_278 : f32 to vector<1x128xf32>
    %819 = arith.addf %817, %818 : vector<1x128xf32>
    %820 = arith.mulf %819, %815 : vector<1x128xf32>
    %cst_279 = arith.constant -0.0285813473 : f32
    %821 = vector.broadcast %cst_279 : f32 to vector<1x128xf32>
    %822 = arith.addf %820, %821 : vector<1x128xf32>
    %823 = arith.mulf %822, %815 : vector<1x128xf32>
    %cst_280 = arith.constant 0.0551441759 : f32
    %824 = vector.broadcast %cst_280 : f32 to vector<1x128xf32>
    %825 = arith.addf %823, %824 : vector<1x128xf32>
    %826 = arith.mulf %825, %815 : vector<1x128xf32>
    %cst_281 = arith.constant -0.0822269394 : f32
    %827 = vector.broadcast %cst_281 : f32 to vector<1x128xf32>
    %828 = arith.addf %826, %827 : vector<1x128xf32>
    %829 = arith.mulf %828, %815 : vector<1x128xf32>
    %cst_282 = arith.constant 0.108822249 : f32
    %830 = vector.broadcast %cst_282 : f32 to vector<1x128xf32>
    %831 = arith.addf %829, %830 : vector<1x128xf32>
    %832 = arith.mulf %831, %815 : vector<1x128xf32>
    %cst_283 = arith.constant -0.142484158 : f32
    %833 = vector.broadcast %cst_283 : f32 to vector<1x128xf32>
    %834 = arith.addf %832, %833 : vector<1x128xf32>
    %835 = arith.mulf %834, %815 : vector<1x128xf32>
    %cst_284 = arith.constant 0.199966252 : f32
    %836 = vector.broadcast %cst_284 : f32 to vector<1x128xf32>
    %837 = arith.addf %835, %836 : vector<1x128xf32>
    %838 = arith.mulf %837, %815 : vector<1x128xf32>
    %cst_285 = arith.constant -0.333331943 : f32
    %839 = vector.broadcast %cst_285 : f32 to vector<1x128xf32>
    %840 = arith.addf %838, %839 : vector<1x128xf32>
    %841 = arith.mulf %840, %815 : vector<1x128xf32>
    %cst_286 = arith.constant 1.000000e+00 : f32
    %842 = vector.broadcast %cst_286 : f32 to vector<1x128xf32>
    %843 = arith.addf %841, %842 : vector<1x128xf32>
    %844 = arith.mulf %843, %814 : vector<1x128xf32>
    %845 = arith.cmpf ogt, %805, %806 : vector<1x128xf32>
    %cst_287 = arith.constant 1.57079637 : f32
    %846 = vector.broadcast %cst_287 : f32 to vector<1x128xf32>
    %847 = arith.subf %846, %844 : vector<1x128xf32>
    %848 = arith.select %845, %847, %844 : vector<1x128xi1>, vector<1x128xf32>
    %cst_288 = arith.constant 0.000000e+00 : f32
    %849 = vector.broadcast %cst_288 : f32 to vector<1x128xf32>
    %850 = arith.cmpf oge, %798, %849 : vector<1x128xf32>
    %cst_289 = arith.constant 3.14159274 : f32
    %851 = vector.broadcast %cst_289 : f32 to vector<1x128xf32>
    %852 = arith.subf %851, %848 : vector<1x128xf32>
    %853 = arith.select %850, %848, %852 : vector<1x128xi1>, vector<1x128xf32>
    %cst_290 = arith.constant 0.000000e+00 : f32
    %854 = vector.broadcast %cst_290 : f32 to vector<1x128xf32>
    %855 = arith.cmpf oge, %804, %854 : vector<1x128xf32>
    %cst_291 = arith.constant 0.000000e+00 : f32
    %856 = vector.broadcast %cst_291 : f32 to vector<1x128xf32>
    %857 = arith.subf %856, %853 : vector<1x128xf32>
    %858 = arith.select %855, %853, %857 : vector<1x128xi1>, vector<1x128xf32>
    %859 = arith.subf %753, %747 : vector<1x128xf32>
    %860 = arith.subf %755, %749 : vector<1x128xf32>
    %861 = arith.subf %757, %751 : vector<1x128xf32>
    %862 = arith.subf %765, %759 : vector<1x128xf32>
    %863 = arith.subf %767, %761 : vector<1x128xf32>
    %864 = arith.subf %769, %763 : vector<1x128xf32>
    %865 = arith.mulf %860, %775 : vector<1x128xf32>
    %866 = arith.mulf %861, %774 : vector<1x128xf32>
    %867 = arith.subf %865, %866 : vector<1x128xf32>
    %868 = arith.mulf %861, %773 : vector<1x128xf32>
    %869 = arith.mulf %859, %775 : vector<1x128xf32>
    %870 = arith.subf %868, %869 : vector<1x128xf32>
    %871 = arith.mulf %859, %774 : vector<1x128xf32>
    %872 = arith.mulf %860, %773 : vector<1x128xf32>
    %873 = arith.subf %871, %872 : vector<1x128xf32>
    %874 = arith.mulf %774, %864 : vector<1x128xf32>
    %875 = arith.mulf %775, %863 : vector<1x128xf32>
    %876 = arith.subf %874, %875 : vector<1x128xf32>
    %877 = arith.mulf %775, %862 : vector<1x128xf32>
    %878 = arith.mulf %773, %864 : vector<1x128xf32>
    %879 = arith.subf %877, %878 : vector<1x128xf32>
    %880 = arith.mulf %773, %863 : vector<1x128xf32>
    %881 = arith.mulf %774, %862 : vector<1x128xf32>
    %882 = arith.subf %880, %881 : vector<1x128xf32>
    %883 = arith.mulf %870, %775 : vector<1x128xf32>
    %884 = arith.mulf %873, %774 : vector<1x128xf32>
    %885 = arith.subf %883, %884 : vector<1x128xf32>
    %886 = arith.mulf %873, %773 : vector<1x128xf32>
    %887 = arith.mulf %867, %775 : vector<1x128xf32>
    %888 = arith.subf %886, %887 : vector<1x128xf32>
    %889 = arith.mulf %867, %774 : vector<1x128xf32>
    %890 = arith.mulf %870, %773 : vector<1x128xf32>
    %891 = arith.subf %889, %890 : vector<1x128xf32>
    %892 = math.rsqrt %785 : vector<1x128xf32>
    %893 = arith.mulf %885, %876 : vector<1x128xf32>
    %894 = arith.mulf %888, %879 : vector<1x128xf32>
    %895 = arith.addf %893, %894 : vector<1x128xf32>
    %896 = arith.mulf %891, %882 : vector<1x128xf32>
    %897 = arith.addf %895, %896 : vector<1x128xf32>
    %898 = arith.mulf %897, %892 : vector<1x128xf32>
    %899 = arith.mulf %867, %876 : vector<1x128xf32>
    %900 = arith.mulf %870, %879 : vector<1x128xf32>
    %901 = arith.addf %899, %900 : vector<1x128xf32>
    %902 = arith.mulf %873, %882 : vector<1x128xf32>
    %903 = arith.addf %901, %902 : vector<1x128xf32>
    %904 = math.absf %898 : vector<1x128xf32>
    %905 = math.absf %903 : vector<1x128xf32>
    %906 = arith.maximumf %904, %905 : vector<1x128xf32>
    %907 = arith.minimumf %904, %905 : vector<1x128xf32>
    %908 = tpu.reciprocal %906 {approx = true} : vector<1x128xf32> -> vector<1x128xf32>
    %909 = arith.mulf %906, %908 : vector<1x128xf32>
    %cst_292 = arith.constant 2.000000e+00 : f32
    %910 = vector.broadcast %cst_292 : f32 to vector<1x128xf32>
    %911 = arith.subf %910, %909 : vector<1x128xf32>
    %912 = arith.mulf %908, %911 : vector<1x128xf32>
    %913 = arith.mulf %907, %912 : vector<1x128xf32>
    %914 = arith.mulf %913, %913 : vector<1x128xf32>
    %cst_293 = arith.constant -0.00151638396 : f32
    %915 = vector.broadcast %cst_293 : f32 to vector<1x128xf32>
    %916 = arith.mulf %915, %914 : vector<1x128xf32>
    %cst_294 = arith.constant 0.00960627105 : f32
    %917 = vector.broadcast %cst_294 : f32 to vector<1x128xf32>
    %918 = arith.addf %916, %917 : vector<1x128xf32>
    %919 = arith.mulf %918, %914 : vector<1x128xf32>
    %cst_295 = arith.constant -0.0285813473 : f32
    %920 = vector.broadcast %cst_295 : f32 to vector<1x128xf32>
    %921 = arith.addf %919, %920 : vector<1x128xf32>
    %922 = arith.mulf %921, %914 : vector<1x128xf32>
    %cst_296 = arith.constant 0.0551441759 : f32
    %923 = vector.broadcast %cst_296 : f32 to vector<1x128xf32>
    %924 = arith.addf %922, %923 : vector<1x128xf32>
    %925 = arith.mulf %924, %914 : vector<1x128xf32>
    %cst_297 = arith.constant -0.0822269394 : f32
    %926 = vector.broadcast %cst_297 : f32 to vector<1x128xf32>
    %927 = arith.addf %925, %926 : vector<1x128xf32>
    %928 = arith.mulf %927, %914 : vector<1x128xf32>
    %cst_298 = arith.constant 0.108822249 : f32
    %929 = vector.broadcast %cst_298 : f32 to vector<1x128xf32>
    %930 = arith.addf %928, %929 : vector<1x128xf32>
    %931 = arith.mulf %930, %914 : vector<1x128xf32>
    %cst_299 = arith.constant -0.142484158 : f32
    %932 = vector.broadcast %cst_299 : f32 to vector<1x128xf32>
    %933 = arith.addf %931, %932 : vector<1x128xf32>
    %934 = arith.mulf %933, %914 : vector<1x128xf32>
    %cst_300 = arith.constant 0.199966252 : f32
    %935 = vector.broadcast %cst_300 : f32 to vector<1x128xf32>
    %936 = arith.addf %934, %935 : vector<1x128xf32>
    %937 = arith.mulf %936, %914 : vector<1x128xf32>
    %cst_301 = arith.constant -0.333331943 : f32
    %938 = vector.broadcast %cst_301 : f32 to vector<1x128xf32>
    %939 = arith.addf %937, %938 : vector<1x128xf32>
    %940 = arith.mulf %939, %914 : vector<1x128xf32>
    %cst_302 = arith.constant 1.000000e+00 : f32
    %941 = vector.broadcast %cst_302 : f32 to vector<1x128xf32>
    %942 = arith.addf %940, %941 : vector<1x128xf32>
    %943 = arith.mulf %942, %913 : vector<1x128xf32>
    %944 = arith.cmpf ogt, %904, %905 : vector<1x128xf32>
    %cst_303 = arith.constant 1.57079637 : f32
    %945 = vector.broadcast %cst_303 : f32 to vector<1x128xf32>
    %946 = arith.subf %945, %943 : vector<1x128xf32>
    %947 = arith.select %944, %946, %943 : vector<1x128xi1>, vector<1x128xf32>
    %cst_304 = arith.constant 0.000000e+00 : f32
    %948 = vector.broadcast %cst_304 : f32 to vector<1x128xf32>
    %949 = arith.cmpf oge, %903, %948 : vector<1x128xf32>
    %cst_305 = arith.constant 3.14159274 : f32
    %950 = vector.broadcast %cst_305 : f32 to vector<1x128xf32>
    %951 = arith.subf %950, %947 : vector<1x128xf32>
    %952 = arith.select %949, %947, %951 : vector<1x128xi1>, vector<1x128xf32>
    %cst_306 = arith.constant 0.000000e+00 : f32
    %953 = vector.broadcast %cst_306 : f32 to vector<1x128xf32>
    %954 = arith.cmpf oge, %898, %953 : vector<1x128xf32>
    %cst_307 = arith.constant 0.000000e+00 : f32
    %955 = vector.broadcast %cst_307 : f32 to vector<1x128xf32>
    %956 = arith.subf %955, %952 : vector<1x128xf32>
    %957 = arith.select %954, %952, %956 : vector<1x128xi1>, vector<1x128xf32>
    %958 = arith.mulf %867, %867 : vector<1x128xf32>
    %959 = arith.mulf %870, %870 : vector<1x128xf32>
    %960 = arith.addf %958, %959 : vector<1x128xf32>
    %961 = arith.mulf %873, %873 : vector<1x128xf32>
    %962 = arith.addf %960, %961 : vector<1x128xf32>
    %963 = arith.mulf %780, %962 : vector<1x128xf32>
    %964 = arith.mulf %892, %892 : vector<1x128xf32>
    %965 = arith.mulf %963, %964 : vector<1x128xf32>
    %966 = math.log %965 : vector<1x128xf32>
    %967 = arith.addf %718, %966 : vector<1x128xf32>
    %c9_308 = arith.constant 9 : index
    %968 = memref.load %arg4[%c9_308] : memref<18xf32, #tpu.memory_space<smem>>
    %969 = vector.broadcast %968 : f32 to vector<1x128xf32>
    %970 = arith.subf %786, %969 : vector<1x128xf32>
    %c9_309 = arith.constant 9 : index
    %971 = memref.load %arg5[%c9_309] : memref<18xf32, #tpu.memory_space<smem>>
    %972 = vector.broadcast %971 : f32 to vector<1x128xf32>
    %973 = arith.mulf %970, %972 : vector<1x128xf32>
    %c15_310 = arith.constant 15 : index
    %c0_311 = arith.constant 0 : index
    %c0_312 = arith.constant 0 : index
    %974 = vector.load %arg7[%c15_310, %c0_311, %c0_312] : memref<25x1x128xf32, #tpu.memory_space<vmem>>, vector<1x1x128xf32>
    %975 = vector.shape_cast %974 : vector<1x1x128xf32> to vector<1x128xf32>
    %976 = vector.shape_cast %973 : vector<1x128xf32> to vector<1x1x128xf32>
    tpu.vector_store %arg7[%c15_310, %c0_311, %c0_312], %976 {strides = array<i32>} : memref<25x1x128xf32, #tpu.memory_space<vmem>>, vector<1x1x128xf32>,
    %c10_313 = arith.constant 10 : index
    %977 = memref.load %arg4[%c10_313] : memref<18xf32, #tpu.memory_space<smem>>
    %978 = vector.broadcast %977 : f32 to vector<1x128xf32>
    %979 = arith.subf %858, %978 : vector<1x128xf32>
    %c10_314 = arith.constant 10 : index
    %980 = memref.load %arg5[%c10_314] : memref<18xf32, #tpu.memory_space<smem>>
    %981 = vector.broadcast %980 : f32 to vector<1x128xf32>
    %982 = arith.mulf %979, %981 : vector<1x128xf32>
    %c16_315 = arith.constant 16 : index
    %c0_316 = arith.constant 0 : index
    %c0_317 = arith.constant 0 : index
    %983 = vector.load %arg7[%c16_315, %c0_316, %c0_317] : memref<25x1x128xf32, #tpu.memory_space<vmem>>, vector<1x1x128xf32>
    %984 = vector.shape_cast %983 : vector<1x1x128xf32> to vector<1x128xf32>
    %985 = vector.shape_cast %982 : vector<1x128xf32> to vector<1x1x128xf32>
    tpu.vector_store %arg7[%c16_315, %c0_316, %c0_317], %985 {strides = array<i32>} : memref<25x1x128xf32, #tpu.memory_space<vmem>>, vector<1x1x128xf32>,
    %c11_318 = arith.constant 11 : index
    %986 = memref.load %arg4[%c11_318] : memref<18xf32, #tpu.memory_space<smem>>
    %987 = vector.broadcast %986 : f32 to vector<1x128xf32>
    %988 = arith.subf %957, %987 : vector<1x128xf32>
    %c11_319 = arith.constant 11 : index
    %989 = memref.load %arg5[%c11_319] : memref<18xf32, #tpu.memory_space<smem>>
    %990 = vector.broadcast %989 : f32 to vector<1x128xf32>
    %991 = arith.mulf %988, %990 : vector<1x128xf32>
    %c17_320 = arith.constant 17 : index
    %c0_321 = arith.constant 0 : index
    %c0_322 = arith.constant 0 : index
    %992 = vector.load %arg7[%c17_320, %c0_321, %c0_322] : memref<25x1x128xf32, #tpu.memory_space<vmem>>, vector<1x1x128xf32>
    %993 = vector.shape_cast %992 : vector<1x1x128xf32> to vector<1x128xf32>
    %994 = vector.shape_cast %991 : vector<1x128xf32> to vector<1x1x128xf32>
    tpu.vector_store %arg7[%c17_320, %c0_321, %c0_322], %994 {strides = array<i32>} : memref<25x1x128xf32, #tpu.memory_space<vmem>>, vector<1x1x128xf32>,
    %c24 = arith.constant 24 : index
    %c0_323 = arith.constant 0 : index
    %c0_324 = arith.constant 0 : index
    %995 = vector.load %arg1[%c24, %c0_323, %c0_324] : memref<30x1x128xf32, #tpu.memory_space<vmem>>, vector<1x1x128xf32>
    %996 = vector.shape_cast %995 : vector<1x1x128xf32> to vector<1x128xf32>
    %c25 = arith.constant 25 : index
    %c0_325 = arith.constant 0 : index
    %c0_326 = arith.constant 0 : index
    %997 = vector.load %arg1[%c25, %c0_325, %c0_326] : memref<30x1x128xf32, #tpu.memory_space<vmem>>, vector<1x1x128xf32>
    %998 = vector.shape_cast %997 : vector<1x1x128xf32> to vector<1x128xf32>
    %c26 = arith.constant 26 : index
    %c0_327 = arith.constant 0 : index
    %c0_328 = arith.constant 0 : index
    %999 = vector.load %arg1[%c26, %c0_327, %c0_328] : memref<30x1x128xf32, #tpu.memory_space<vmem>>, vector<1x1x128xf32>
    %1000 = vector.shape_cast %999 : vector<1x1x128xf32> to vector<1x128xf32>
    %c21_329 = arith.constant 21 : index
    %c0_330 = arith.constant 0 : index
    %c0_331 = arith.constant 0 : index
    %1001 = vector.load %arg1[%c21_329, %c0_330, %c0_331] : memref<30x1x128xf32, #tpu.memory_space<vmem>>, vector<1x1x128xf32>
    %1002 = vector.shape_cast %1001 : vector<1x1x128xf32> to vector<1x128xf32>
    %c22_332 = arith.constant 22 : index
    %c0_333 = arith.constant 0 : index
    %c0_334 = arith.constant 0 : index
    %1003 = vector.load %arg1[%c22_332, %c0_333, %c0_334] : memref<30x1x128xf32, #tpu.memory_space<vmem>>, vector<1x1x128xf32>
    %1004 = vector.shape_cast %1003 : vector<1x1x128xf32> to vector<1x128xf32>
    %c23_335 = arith.constant 23 : index
    %c0_336 = arith.constant 0 : index
    %c0_337 = arith.constant 0 : index
    %1005 = vector.load %arg1[%c23_335, %c0_336, %c0_337] : memref<30x1x128xf32, #tpu.memory_space<vmem>>, vector<1x1x128xf32>
    %1006 = vector.shape_cast %1005 : vector<1x1x128xf32> to vector<1x128xf32>
    %c18_338 = arith.constant 18 : index
    %c0_339 = arith.constant 0 : index
    %c0_340 = arith.constant 0 : index
    %1007 = vector.load %arg1[%c18_338, %c0_339, %c0_340] : memref<30x1x128xf32, #tpu.memory_space<vmem>>, vector<1x1x128xf32>
    %1008 = vector.shape_cast %1007 : vector<1x1x128xf32> to vector<1x128xf32>
    %c19_341 = arith.constant 19 : index
    %c0_342 = arith.constant 0 : index
    %c0_343 = arith.constant 0 : index
    %1009 = vector.load %arg1[%c19_341, %c0_342, %c0_343] : memref<30x1x128xf32, #tpu.memory_space<vmem>>, vector<1x1x128xf32>
    %1010 = vector.shape_cast %1009 : vector<1x1x128xf32> to vector<1x128xf32>
    %c20_344 = arith.constant 20 : index
    %c0_345 = arith.constant 0 : index
    %c0_346 = arith.constant 0 : index
    %1011 = vector.load %arg1[%c20_344, %c0_345, %c0_346] : memref<30x1x128xf32, #tpu.memory_space<vmem>>, vector<1x1x128xf32>
    %1012 = vector.shape_cast %1011 : vector<1x1x128xf32> to vector<1x128xf32>
    %c15_347 = arith.constant 15 : index
    %c0_348 = arith.constant 0 : index
    %c0_349 = arith.constant 0 : index
    %1013 = vector.load %arg1[%c15_347, %c0_348, %c0_349] : memref<30x1x128xf32, #tpu.memory_space<vmem>>, vector<1x1x128xf32>
    %1014 = vector.shape_cast %1013 : vector<1x1x128xf32> to vector<1x128xf32>
    %c16_350 = arith.constant 16 : index
    %c0_351 = arith.constant 0 : index
    %c0_352 = arith.constant 0 : index
    %1015 = vector.load %arg1[%c16_350, %c0_351, %c0_352] : memref<30x1x128xf32, #tpu.memory_space<vmem>>, vector<1x1x128xf32>
    %1016 = vector.shape_cast %1015 : vector<1x1x128xf32> to vector<1x128xf32>
    %c17_353 = arith.constant 17 : index
    %c0_354 = arith.constant 0 : index
    %c0_355 = arith.constant 0 : index
    %1017 = vector.load %arg1[%c17_353, %c0_354, %c0_355] : memref<30x1x128xf32, #tpu.memory_space<vmem>>, vector<1x1x128xf32>
    %1018 = vector.shape_cast %1017 : vector<1x1x128xf32> to vector<1x128xf32>
    %1019 = arith.subf %996, %1002 : vector<1x128xf32>
    %1020 = arith.subf %998, %1004 : vector<1x128xf32>
    %1021 = arith.subf %1000, %1006 : vector<1x128xf32>
    %1022 = arith.subf %1008, %1002 : vector<1x128xf32>
    %1023 = arith.subf %1010, %1004 : vector<1x128xf32>
    %1024 = arith.subf %1012, %1006 : vector<1x128xf32>
    %1025 = arith.mulf %1019, %1019 : vector<1x128xf32>
    %1026 = arith.mulf %1020, %1020 : vector<1x128xf32>
    %1027 = arith.addf %1025, %1026 : vector<1x128xf32>
    %1028 = arith.mulf %1021, %1021 : vector<1x128xf32>
    %1029 = arith.addf %1027, %1028 : vector<1x128xf32>
    %1030 = arith.mulf %1022, %1022 : vector<1x128xf32>
    %1031 = arith.mulf %1023, %1023 : vector<1x128xf32>
    %1032 = arith.addf %1030, %1031 : vector<1x128xf32>
    %1033 = arith.mulf %1024, %1024 : vector<1x128xf32>
    %1034 = arith.addf %1032, %1033 : vector<1x128xf32>
    %1035 = math.sqrt %1029 : vector<1x128xf32>
    %1036 = arith.mulf %1019, %1022 : vector<1x128xf32>
    %1037 = arith.mulf %1020, %1023 : vector<1x128xf32>
    %1038 = arith.addf %1036, %1037 : vector<1x128xf32>
    %1039 = arith.mulf %1021, %1024 : vector<1x128xf32>
    %1040 = arith.addf %1038, %1039 : vector<1x128xf32>
    %1041 = arith.mulf %1029, %1034 : vector<1x128xf32>
    %1042 = math.rsqrt %1041 : vector<1x128xf32>
    %1043 = arith.mulf %1040, %1042 : vector<1x128xf32>
    %cst_356 = arith.constant -1.000000e+00 : f32
    %cst_357 = arith.constant 1.000000e+00 : f32
    %1044 = vector.broadcast %cst_356 : f32 to vector<1x128xf32>
    %1045 = arith.maximumf %1044, %1043 : vector<1x128xf32>
    %1046 = vector.broadcast %cst_357 : f32 to vector<1x128xf32>
    %1047 = arith.minimumf %1046, %1045 : vector<1x128xf32>
    %1048 = arith.mulf %1047, %1047 : vector<1x128xf32>
    %cst_358 = arith.constant 1.000000e+00 : f32
    %1049 = vector.broadcast %cst_358 : f32 to vector<1x128xf32>
    %1050 = arith.subf %1049, %1048 : vector<1x128xf32>
    %cst_359 = arith.constant 0.000000e+00 : f32
    %1051 = vector.broadcast %cst_359 : f32 to vector<1x128xf32>
    %1052 = arith.maximumf %1050, %1051 : vector<1x128xf32>
    %1053 = math.sqrt %1052 : vector<1x128xf32>
    %1054 = math.absf %1053 : vector<1x128xf32>
    %1055 = math.absf %1047 : vector<1x128xf32>
    %1056 = arith.maximumf %1054, %1055 : vector<1x128xf32>
    %1057 = arith.minimumf %1054, %1055 : vector<1x128xf32>
    %1058 = tpu.reciprocal %1056 {approx = true} : vector<1x128xf32> -> vector<1x128xf32>
    %1059 = arith.mulf %1056, %1058 : vector<1x128xf32>
    %cst_360 = arith.constant 2.000000e+00 : f32
    %1060 = vector.broadcast %cst_360 : f32 to vector<1x128xf32>
    %1061 = arith.subf %1060, %1059 : vector<1x128xf32>
    %1062 = arith.mulf %1058, %1061 : vector<1x128xf32>
    %1063 = arith.mulf %1057, %1062 : vector<1x128xf32>
    %1064 = arith.mulf %1063, %1063 : vector<1x128xf32>
    %cst_361 = arith.constant -0.00151638396 : f32
    %1065 = vector.broadcast %cst_361 : f32 to vector<1x128xf32>
    %1066 = arith.mulf %1065, %1064 : vector<1x128xf32>
    %cst_362 = arith.constant 0.00960627105 : f32
    %1067 = vector.broadcast %cst_362 : f32 to vector<1x128xf32>
    %1068 = arith.addf %1066, %1067 : vector<1x128xf32>
    %1069 = arith.mulf %1068, %1064 : vector<1x128xf32>
    %cst_363 = arith.constant -0.0285813473 : f32
    %1070 = vector.broadcast %cst_363 : f32 to vector<1x128xf32>
    %1071 = arith.addf %1069, %1070 : vector<1x128xf32>
    %1072 = arith.mulf %1071, %1064 : vector<1x128xf32>
    %cst_364 = arith.constant 0.0551441759 : f32
    %1073 = vector.broadcast %cst_364 : f32 to vector<1x128xf32>
    %1074 = arith.addf %1072, %1073 : vector<1x128xf32>
    %1075 = arith.mulf %1074, %1064 : vector<1x128xf32>
    %cst_365 = arith.constant -0.0822269394 : f32
    %1076 = vector.broadcast %cst_365 : f32 to vector<1x128xf32>
    %1077 = arith.addf %1075, %1076 : vector<1x128xf32>
    %1078 = arith.mulf %1077, %1064 : vector<1x128xf32>
    %cst_366 = arith.constant 0.108822249 : f32
    %1079 = vector.broadcast %cst_366 : f32 to vector<1x128xf32>
    %1080 = arith.addf %1078, %1079 : vector<1x128xf32>
    %1081 = arith.mulf %1080, %1064 : vector<1x128xf32>
    %cst_367 = arith.constant -0.142484158 : f32
    %1082 = vector.broadcast %cst_367 : f32 to vector<1x128xf32>
    %1083 = arith.addf %1081, %1082 : vector<1x128xf32>
    %1084 = arith.mulf %1083, %1064 : vector<1x128xf32>
    %cst_368 = arith.constant 0.199966252 : f32
    %1085 = vector.broadcast %cst_368 : f32 to vector<1x128xf32>
    %1086 = arith.addf %1084, %1085 : vector<1x128xf32>
    %1087 = arith.mulf %1086, %1064 : vector<1x128xf32>
    %cst_369 = arith.constant -0.333331943 : f32
    %1088 = vector.broadcast %cst_369 : f32 to vector<1x128xf32>
    %1089 = arith.addf %1087, %1088 : vector<1x128xf32>
    %1090 = arith.mulf %1089, %1064 : vector<1x128xf32>
    %cst_370 = arith.constant 1.000000e+00 : f32
    %1091 = vector.broadcast %cst_370 : f32 to vector<1x128xf32>
    %1092 = arith.addf %1090, %1091 : vector<1x128xf32>
    %1093 = arith.mulf %1092, %1063 : vector<1x128xf32>
    %1094 = arith.cmpf ogt, %1054, %1055 : vector<1x128xf32>
    %cst_371 = arith.constant 1.57079637 : f32
    %1095 = vector.broadcast %cst_371 : f32 to vector<1x128xf32>
    %1096 = arith.subf %1095, %1093 : vector<1x128xf32>
    %1097 = arith.select %1094, %1096, %1093 : vector<1x128xi1>, vector<1x128xf32>
    %cst_372 = arith.constant 0.000000e+00 : f32
    %1098 = vector.broadcast %cst_372 : f32 to vector<1x128xf32>
    %1099 = arith.cmpf oge, %1047, %1098 : vector<1x128xf32>
    %cst_373 = arith.constant 3.14159274 : f32
    %1100 = vector.broadcast %cst_373 : f32 to vector<1x128xf32>
    %1101 = arith.subf %1100, %1097 : vector<1x128xf32>
    %1102 = arith.select %1099, %1097, %1101 : vector<1x128xi1>, vector<1x128xf32>
    %cst_374 = arith.constant 0.000000e+00 : f32
    %1103 = vector.broadcast %cst_374 : f32 to vector<1x128xf32>
    %1104 = arith.cmpf oge, %1053, %1103 : vector<1x128xf32>
    %cst_375 = arith.constant 0.000000e+00 : f32
    %1105 = vector.broadcast %cst_375 : f32 to vector<1x128xf32>
    %1106 = arith.subf %1105, %1102 : vector<1x128xf32>
    %1107 = arith.select %1104, %1102, %1106 : vector<1x128xi1>, vector<1x128xf32>
    %1108 = arith.subf %1002, %996 : vector<1x128xf32>
    %1109 = arith.subf %1004, %998 : vector<1x128xf32>
    %1110 = arith.subf %1006, %1000 : vector<1x128xf32>
    %1111 = arith.subf %1014, %1008 : vector<1x128xf32>
    %1112 = arith.subf %1016, %1010 : vector<1x128xf32>
    %1113 = arith.subf %1018, %1012 : vector<1x128xf32>
    %1114 = arith.mulf %1109, %1024 : vector<1x128xf32>
    %1115 = arith.mulf %1110, %1023 : vector<1x128xf32>
    %1116 = arith.subf %1114, %1115 : vector<1x128xf32>
    %1117 = arith.mulf %1110, %1022 : vector<1x128xf32>
    %1118 = arith.mulf %1108, %1024 : vector<1x128xf32>
    %1119 = arith.subf %1117, %1118 : vector<1x128xf32>
    %1120 = arith.mulf %1108, %1023 : vector<1x128xf32>
    %1121 = arith.mulf %1109, %1022 : vector<1x128xf32>
    %1122 = arith.subf %1120, %1121 : vector<1x128xf32>
    %1123 = arith.mulf %1023, %1113 : vector<1x128xf32>
    %1124 = arith.mulf %1024, %1112 : vector<1x128xf32>
    %1125 = arith.subf %1123, %1124 : vector<1x128xf32>
    %1126 = arith.mulf %1024, %1111 : vector<1x128xf32>
    %1127 = arith.mulf %1022, %1113 : vector<1x128xf32>
    %1128 = arith.subf %1126, %1127 : vector<1x128xf32>
    %1129 = arith.mulf %1022, %1112 : vector<1x128xf32>
    %1130 = arith.mulf %1023, %1111 : vector<1x128xf32>
    %1131 = arith.subf %1129, %1130 : vector<1x128xf32>
    %1132 = arith.mulf %1119, %1024 : vector<1x128xf32>
    %1133 = arith.mulf %1122, %1023 : vector<1x128xf32>
    %1134 = arith.subf %1132, %1133 : vector<1x128xf32>
    %1135 = arith.mulf %1122, %1022 : vector<1x128xf32>
    %1136 = arith.mulf %1116, %1024 : vector<1x128xf32>
    %1137 = arith.subf %1135, %1136 : vector<1x128xf32>
    %1138 = arith.mulf %1116, %1023 : vector<1x128xf32>
    %1139 = arith.mulf %1119, %1022 : vector<1x128xf32>
    %1140 = arith.subf %1138, %1139 : vector<1x128xf32>
    %1141 = math.rsqrt %1034 : vector<1x128xf32>
    %1142 = arith.mulf %1134, %1125 : vector<1x128xf32>
    %1143 = arith.mulf %1137, %1128 : vector<1x128xf32>
    %1144 = arith.addf %1142, %1143 : vector<1x128xf32>
    %1145 = arith.mulf %1140, %1131 : vector<1x128xf32>
    %1146 = arith.addf %1144, %1145 : vector<1x128xf32>
    %1147 = arith.mulf %1146, %1141 : vector<1x128xf32>
    %1148 = arith.mulf %1116, %1125 : vector<1x128xf32>
    %1149 = arith.mulf %1119, %1128 : vector<1x128xf32>
    %1150 = arith.addf %1148, %1149 : vector<1x128xf32>
    %1151 = arith.mulf %1122, %1131 : vector<1x128xf32>
    %1152 = arith.addf %1150, %1151 : vector<1x128xf32>
    %1153 = math.absf %1147 : vector<1x128xf32>
    %1154 = math.absf %1152 : vector<1x128xf32>
    %1155 = arith.maximumf %1153, %1154 : vector<1x128xf32>
    %1156 = arith.minimumf %1153, %1154 : vector<1x128xf32>
    %1157 = tpu.reciprocal %1155 {approx = true} : vector<1x128xf32> -> vector<1x128xf32>
    %1158 = arith.mulf %1155, %1157 : vector<1x128xf32>
    %cst_376 = arith.constant 2.000000e+00 : f32
    %1159 = vector.broadcast %cst_376 : f32 to vector<1x128xf32>
    %1160 = arith.subf %1159, %1158 : vector<1x128xf32>
    %1161 = arith.mulf %1157, %1160 : vector<1x128xf32>
    %1162 = arith.mulf %1156, %1161 : vector<1x128xf32>
    %1163 = arith.mulf %1162, %1162 : vector<1x128xf32>
    %cst_377 = arith.constant -0.00151638396 : f32
    %1164 = vector.broadcast %cst_377 : f32 to vector<1x128xf32>
    %1165 = arith.mulf %1164, %1163 : vector<1x128xf32>
    %cst_378 = arith.constant 0.00960627105 : f32
    %1166 = vector.broadcast %cst_378 : f32 to vector<1x128xf32>
    %1167 = arith.addf %1165, %1166 : vector<1x128xf32>
    %1168 = arith.mulf %1167, %1163 : vector<1x128xf32>
    %cst_379 = arith.constant -0.0285813473 : f32
    %1169 = vector.broadcast %cst_379 : f32 to vector<1x128xf32>
    %1170 = arith.addf %1168, %1169 : vector<1x128xf32>
    %1171 = arith.mulf %1170, %1163 : vector<1x128xf32>
    %cst_380 = arith.constant 0.0551441759 : f32
    %1172 = vector.broadcast %cst_380 : f32 to vector<1x128xf32>
    %1173 = arith.addf %1171, %1172 : vector<1x128xf32>
    %1174 = arith.mulf %1173, %1163 : vector<1x128xf32>
    %cst_381 = arith.constant -0.0822269394 : f32
    %1175 = vector.broadcast %cst_381 : f32 to vector<1x128xf32>
    %1176 = arith.addf %1174, %1175 : vector<1x128xf32>
    %1177 = arith.mulf %1176, %1163 : vector<1x128xf32>
    %cst_382 = arith.constant 0.108822249 : f32
    %1178 = vector.broadcast %cst_382 : f32 to vector<1x128xf32>
    %1179 = arith.addf %1177, %1178 : vector<1x128xf32>
    %1180 = arith.mulf %1179, %1163 : vector<1x128xf32>
    %cst_383 = arith.constant -0.142484158 : f32
    %1181 = vector.broadcast %cst_383 : f32 to vector<1x128xf32>
    %1182 = arith.addf %1180, %1181 : vector<1x128xf32>
    %1183 = arith.mulf %1182, %1163 : vector<1x128xf32>
    %cst_384 = arith.constant 0.199966252 : f32
    %1184 = vector.broadcast %cst_384 : f32 to vector<1x128xf32>
    %1185 = arith.addf %1183, %1184 : vector<1x128xf32>
    %1186 = arith.mulf %1185, %1163 : vector<1x128xf32>
    %cst_385 = arith.constant -0.333331943 : f32
    %1187 = vector.broadcast %cst_385 : f32 to vector<1x128xf32>
    %1188 = arith.addf %1186, %1187 : vector<1x128xf32>
    %1189 = arith.mulf %1188, %1163 : vector<1x128xf32>
    %cst_386 = arith.constant 1.000000e+00 : f32
    %1190 = vector.broadcast %cst_386 : f32 to vector<1x128xf32>
    %1191 = arith.addf %1189, %1190 : vector<1x128xf32>
    %1192 = arith.mulf %1191, %1162 : vector<1x128xf32>
    %1193 = arith.cmpf ogt, %1153, %1154 : vector<1x128xf32>
    %cst_387 = arith.constant 1.57079637 : f32
    %1194 = vector.broadcast %cst_387 : f32 to vector<1x128xf32>
    %1195 = arith.subf %1194, %1192 : vector<1x128xf32>
    %1196 = arith.select %1193, %1195, %1192 : vector<1x128xi1>, vector<1x128xf32>
    %cst_388 = arith.constant 0.000000e+00 : f32
    %1197 = vector.broadcast %cst_388 : f32 to vector<1x128xf32>
    %1198 = arith.cmpf oge, %1152, %1197 : vector<1x128xf32>
    %cst_389 = arith.constant 3.14159274 : f32
    %1199 = vector.broadcast %cst_389 : f32 to vector<1x128xf32>
    %1200 = arith.subf %1199, %1196 : vector<1x128xf32>
    %1201 = arith.select %1198, %1196, %1200 : vector<1x128xi1>, vector<1x128xf32>
    %cst_390 = arith.constant 0.000000e+00 : f32
    %1202 = vector.broadcast %cst_390 : f32 to vector<1x128xf32>
    %1203 = arith.cmpf oge, %1147, %1202 : vector<1x128xf32>
    %cst_391 = arith.constant 0.000000e+00 : f32
    %1204 = vector.broadcast %cst_391 : f32 to vector<1x128xf32>
    %1205 = arith.subf %1204, %1201 : vector<1x128xf32>
    %1206 = arith.select %1203, %1201, %1205 : vector<1x128xi1>, vector<1x128xf32>
    %1207 = arith.mulf %1116, %1116 : vector<1x128xf32>
    %1208 = arith.mulf %1119, %1119 : vector<1x128xf32>
    %1209 = arith.addf %1207, %1208 : vector<1x128xf32>
    %1210 = arith.mulf %1122, %1122 : vector<1x128xf32>
    %1211 = arith.addf %1209, %1210 : vector<1x128xf32>
    %1212 = arith.mulf %1029, %1211 : vector<1x128xf32>
    %1213 = arith.mulf %1141, %1141 : vector<1x128xf32>
    %1214 = arith.mulf %1212, %1213 : vector<1x128xf32>
    %1215 = math.log %1214 : vector<1x128xf32>
    %1216 = arith.addf %967, %1215 : vector<1x128xf32>
    %c12_392 = arith.constant 12 : index
    %1217 = memref.load %arg4[%c12_392] : memref<18xf32, #tpu.memory_space<smem>>
    %1218 = vector.broadcast %1217 : f32 to vector<1x128xf32>
    %1219 = arith.subf %1035, %1218 : vector<1x128xf32>
    %c12_393 = arith.constant 12 : index
    %1220 = memref.load %arg5[%c12_393] : memref<18xf32, #tpu.memory_space<smem>>
    %1221 = vector.broadcast %1220 : f32 to vector<1x128xf32>
    %1222 = arith.mulf %1219, %1221 : vector<1x128xf32>
    %c18_394 = arith.constant 18 : index
    %c0_395 = arith.constant 0 : index
    %c0_396 = arith.constant 0 : index
    %1223 = vector.load %arg7[%c18_394, %c0_395, %c0_396] : memref<25x1x128xf32, #tpu.memory_space<vmem>>, vector<1x1x128xf32>
    %1224 = vector.shape_cast %1223 : vector<1x1x128xf32> to vector<1x128xf32>
    %1225 = vector.shape_cast %1222 : vector<1x128xf32> to vector<1x1x128xf32>
    tpu.vector_store %arg7[%c18_394, %c0_395, %c0_396], %1225 {strides = array<i32>} : memref<25x1x128xf32, #tpu.memory_space<vmem>>, vector<1x1x128xf32>,
    %c13_397 = arith.constant 13 : index
    %1226 = memref.load %arg4[%c13_397] : memref<18xf32, #tpu.memory_space<smem>>
    %1227 = vector.broadcast %1226 : f32 to vector<1x128xf32>
    %1228 = arith.subf %1107, %1227 : vector<1x128xf32>
    %c13_398 = arith.constant 13 : index
    %1229 = memref.load %arg5[%c13_398] : memref<18xf32, #tpu.memory_space<smem>>
    %1230 = vector.broadcast %1229 : f32 to vector<1x128xf32>
    %1231 = arith.mulf %1228, %1230 : vector<1x128xf32>
    %c19_399 = arith.constant 19 : index
    %c0_400 = arith.constant 0 : index
    %c0_401 = arith.constant 0 : index
    %1232 = vector.load %arg7[%c19_399, %c0_400, %c0_401] : memref<25x1x128xf32, #tpu.memory_space<vmem>>, vector<1x1x128xf32>
    %1233 = vector.shape_cast %1232 : vector<1x1x128xf32> to vector<1x128xf32>
    %1234 = vector.shape_cast %1231 : vector<1x128xf32> to vector<1x1x128xf32>
    tpu.vector_store %arg7[%c19_399, %c0_400, %c0_401], %1234 {strides = array<i32>} : memref<25x1x128xf32, #tpu.memory_space<vmem>>, vector<1x1x128xf32>,
    %c14_402 = arith.constant 14 : index
    %1235 = memref.load %arg4[%c14_402] : memref<18xf32, #tpu.memory_space<smem>>
    %1236 = vector.broadcast %1235 : f32 to vector<1x128xf32>
    %1237 = arith.subf %1206, %1236 : vector<1x128xf32>
    %c14_403 = arith.constant 14 : index
    %1238 = memref.load %arg5[%c14_403] : memref<18xf32, #tpu.memory_space<smem>>
    %1239 = vector.broadcast %1238 : f32 to vector<1x128xf32>
    %1240 = arith.mulf %1237, %1239 : vector<1x128xf32>
    %c20_404 = arith.constant 20 : index
    %c0_405 = arith.constant 0 : index
    %c0_406 = arith.constant 0 : index
    %1241 = vector.load %arg7[%c20_404, %c0_405, %c0_406] : memref<25x1x128xf32, #tpu.memory_space<vmem>>, vector<1x1x128xf32>
    %1242 = vector.shape_cast %1241 : vector<1x1x128xf32> to vector<1x128xf32>
    %1243 = vector.shape_cast %1240 : vector<1x128xf32> to vector<1x1x128xf32>
    tpu.vector_store %arg7[%c20_404, %c0_405, %c0_406], %1243 {strides = array<i32>} : memref<25x1x128xf32, #tpu.memory_space<vmem>>, vector<1x1x128xf32>,
    %c27 = arith.constant 27 : index
    %c0_407 = arith.constant 0 : index
    %c0_408 = arith.constant 0 : index
    %1244 = vector.load %arg1[%c27, %c0_407, %c0_408] : memref<30x1x128xf32, #tpu.memory_space<vmem>>, vector<1x1x128xf32>
    %1245 = vector.shape_cast %1244 : vector<1x1x128xf32> to vector<1x128xf32>
    %c28 = arith.constant 28 : index
    %c0_409 = arith.constant 0 : index
    %c0_410 = arith.constant 0 : index
    %1246 = vector.load %arg1[%c28, %c0_409, %c0_410] : memref<30x1x128xf32, #tpu.memory_space<vmem>>, vector<1x1x128xf32>
    %1247 = vector.shape_cast %1246 : vector<1x1x128xf32> to vector<1x128xf32>
    %c29 = arith.constant 29 : index
    %c0_411 = arith.constant 0 : index
    %c0_412 = arith.constant 0 : index
    %1248 = vector.load %arg1[%c29, %c0_411, %c0_412] : memref<30x1x128xf32, #tpu.memory_space<vmem>>, vector<1x1x128xf32>
    %1249 = vector.shape_cast %1248 : vector<1x1x128xf32> to vector<1x128xf32>
    %c24_413 = arith.constant 24 : index
    %c0_414 = arith.constant 0 : index
    %c0_415 = arith.constant 0 : index
    %1250 = vector.load %arg1[%c24_413, %c0_414, %c0_415] : memref<30x1x128xf32, #tpu.memory_space<vmem>>, vector<1x1x128xf32>
    %1251 = vector.shape_cast %1250 : vector<1x1x128xf32> to vector<1x128xf32>
    %c25_416 = arith.constant 25 : index
    %c0_417 = arith.constant 0 : index
    %c0_418 = arith.constant 0 : index
    %1252 = vector.load %arg1[%c25_416, %c0_417, %c0_418] : memref<30x1x128xf32, #tpu.memory_space<vmem>>, vector<1x1x128xf32>
    %1253 = vector.shape_cast %1252 : vector<1x1x128xf32> to vector<1x128xf32>
    %c26_419 = arith.constant 26 : index
    %c0_420 = arith.constant 0 : index
    %c0_421 = arith.constant 0 : index
    %1254 = vector.load %arg1[%c26_419, %c0_420, %c0_421] : memref<30x1x128xf32, #tpu.memory_space<vmem>>, vector<1x1x128xf32>
    %1255 = vector.shape_cast %1254 : vector<1x1x128xf32> to vector<1x128xf32>
    %c18_422 = arith.constant 18 : index
    %c0_423 = arith.constant 0 : index
    %c0_424 = arith.constant 0 : index
    %1256 = vector.load %arg1[%c18_422, %c0_423, %c0_424] : memref<30x1x128xf32, #tpu.memory_space<vmem>>, vector<1x1x128xf32>
    %1257 = vector.shape_cast %1256 : vector<1x1x128xf32> to vector<1x128xf32>
    %c19_425 = arith.constant 19 : index
    %c0_426 = arith.constant 0 : index
    %c0_427 = arith.constant 0 : index
    %1258 = vector.load %arg1[%c19_425, %c0_426, %c0_427] : memref<30x1x128xf32, #tpu.memory_space<vmem>>, vector<1x1x128xf32>
    %1259 = vector.shape_cast %1258 : vector<1x1x128xf32> to vector<1x128xf32>
    %c20_428 = arith.constant 20 : index
    %c0_429 = arith.constant 0 : index
    %c0_430 = arith.constant 0 : index
    %1260 = vector.load %arg1[%c20_428, %c0_429, %c0_430] : memref<30x1x128xf32, #tpu.memory_space<vmem>>, vector<1x1x128xf32>
    %1261 = vector.shape_cast %1260 : vector<1x1x128xf32> to vector<1x128xf32>
    %c21_431 = arith.constant 21 : index
    %c0_432 = arith.constant 0 : index
    %c0_433 = arith.constant 0 : index
    %1262 = vector.load %arg1[%c21_431, %c0_432, %c0_433] : memref<30x1x128xf32, #tpu.memory_space<vmem>>, vector<1x1x128xf32>
    %1263 = vector.shape_cast %1262 : vector<1x1x128xf32> to vector<1x128xf32>
    %c22_434 = arith.constant 22 : index
    %c0_435 = arith.constant 0 : index
    %c0_436 = arith.constant 0 : index
    %1264 = vector.load %arg1[%c22_434, %c0_435, %c0_436] : memref<30x1x128xf32, #tpu.memory_space<vmem>>, vector<1x1x128xf32>
    %1265 = vector.shape_cast %1264 : vector<1x1x128xf32> to vector<1x128xf32>
    %c23_437 = arith.constant 23 : index
    %c0_438 = arith.constant 0 : index
    %c0_439 = arith.constant 0 : index
    %1266 = vector.load %arg1[%c23_437, %c0_438, %c0_439] : memref<30x1x128xf32, #tpu.memory_space<vmem>>, vector<1x1x128xf32>
    %1267 = vector.shape_cast %1266 : vector<1x1x128xf32> to vector<1x128xf32>
    %1268 = arith.subf %1245, %1251 : vector<1x128xf32>
    %1269 = arith.subf %1247, %1253 : vector<1x128xf32>
    %1270 = arith.subf %1249, %1255 : vector<1x128xf32>
    %1271 = arith.subf %1257, %1251 : vector<1x128xf32>
    %1272 = arith.subf %1259, %1253 : vector<1x128xf32>
    %1273 = arith.subf %1261, %1255 : vector<1x128xf32>
    %1274 = arith.mulf %1268, %1268 : vector<1x128xf32>
    %1275 = arith.mulf %1269, %1269 : vector<1x128xf32>
    %1276 = arith.addf %1274, %1275 : vector<1x128xf32>
    %1277 = arith.mulf %1270, %1270 : vector<1x128xf32>
    %1278 = arith.addf %1276, %1277 : vector<1x128xf32>
    %1279 = arith.mulf %1271, %1271 : vector<1x128xf32>
    %1280 = arith.mulf %1272, %1272 : vector<1x128xf32>
    %1281 = arith.addf %1279, %1280 : vector<1x128xf32>
    %1282 = arith.mulf %1273, %1273 : vector<1x128xf32>
    %1283 = arith.addf %1281, %1282 : vector<1x128xf32>
    %1284 = math.sqrt %1278 : vector<1x128xf32>
    %1285 = arith.mulf %1268, %1271 : vector<1x128xf32>
    %1286 = arith.mulf %1269, %1272 : vector<1x128xf32>
    %1287 = arith.addf %1285, %1286 : vector<1x128xf32>
    %1288 = arith.mulf %1270, %1273 : vector<1x128xf32>
    %1289 = arith.addf %1287, %1288 : vector<1x128xf32>
    %1290 = arith.mulf %1278, %1283 : vector<1x128xf32>
    %1291 = math.rsqrt %1290 : vector<1x128xf32>
    %1292 = arith.mulf %1289, %1291 : vector<1x128xf32>
    %cst_440 = arith.constant -1.000000e+00 : f32
    %cst_441 = arith.constant 1.000000e+00 : f32
    %1293 = vector.broadcast %cst_440 : f32 to vector<1x128xf32>
    %1294 = arith.maximumf %1293, %1292 : vector<1x128xf32>
    %1295 = vector.broadcast %cst_441 : f32 to vector<1x128xf32>
    %1296 = arith.minimumf %1295, %1294 : vector<1x128xf32>
    %1297 = arith.mulf %1296, %1296 : vector<1x128xf32>
    %cst_442 = arith.constant 1.000000e+00 : f32
    %1298 = vector.broadcast %cst_442 : f32 to vector<1x128xf32>
    %1299 = arith.subf %1298, %1297 : vector<1x128xf32>
    %cst_443 = arith.constant 0.000000e+00 : f32
    %1300 = vector.broadcast %cst_443 : f32 to vector<1x128xf32>
    %1301 = arith.maximumf %1299, %1300 : vector<1x128xf32>
    %1302 = math.sqrt %1301 : vector<1x128xf32>
    %1303 = math.absf %1302 : vector<1x128xf32>
    %1304 = math.absf %1296 : vector<1x128xf32>
    %1305 = arith.maximumf %1303, %1304 : vector<1x128xf32>
    %1306 = arith.minimumf %1303, %1304 : vector<1x128xf32>
    %1307 = tpu.reciprocal %1305 {approx = true} : vector<1x128xf32> -> vector<1x128xf32>
    %1308 = arith.mulf %1305, %1307 : vector<1x128xf32>
    %cst_444 = arith.constant 2.000000e+00 : f32
    %1309 = vector.broadcast %cst_444 : f32 to vector<1x128xf32>
    %1310 = arith.subf %1309, %1308 : vector<1x128xf32>
    %1311 = arith.mulf %1307, %1310 : vector<1x128xf32>
    %1312 = arith.mulf %1306, %1311 : vector<1x128xf32>
    %1313 = arith.mulf %1312, %1312 : vector<1x128xf32>
    %cst_445 = arith.constant -0.00151638396 : f32
    %1314 = vector.broadcast %cst_445 : f32 to vector<1x128xf32>
    %1315 = arith.mulf %1314, %1313 : vector<1x128xf32>
    %cst_446 = arith.constant 0.00960627105 : f32
    %1316 = vector.broadcast %cst_446 : f32 to vector<1x128xf32>
    %1317 = arith.addf %1315, %1316 : vector<1x128xf32>
    %1318 = arith.mulf %1317, %1313 : vector<1x128xf32>
    %cst_447 = arith.constant -0.0285813473 : f32
    %1319 = vector.broadcast %cst_447 : f32 to vector<1x128xf32>
    %1320 = arith.addf %1318, %1319 : vector<1x128xf32>
    %1321 = arith.mulf %1320, %1313 : vector<1x128xf32>
    %cst_448 = arith.constant 0.0551441759 : f32
    %1322 = vector.broadcast %cst_448 : f32 to vector<1x128xf32>
    %1323 = arith.addf %1321, %1322 : vector<1x128xf32>
    %1324 = arith.mulf %1323, %1313 : vector<1x128xf32>
    %cst_449 = arith.constant -0.0822269394 : f32
    %1325 = vector.broadcast %cst_449 : f32 to vector<1x128xf32>
    %1326 = arith.addf %1324, %1325 : vector<1x128xf32>
    %1327 = arith.mulf %1326, %1313 : vector<1x128xf32>
    %cst_450 = arith.constant 0.108822249 : f32
    %1328 = vector.broadcast %cst_450 : f32 to vector<1x128xf32>
    %1329 = arith.addf %1327, %1328 : vector<1x128xf32>
    %1330 = arith.mulf %1329, %1313 : vector<1x128xf32>
    %cst_451 = arith.constant -0.142484158 : f32
    %1331 = vector.broadcast %cst_451 : f32 to vector<1x128xf32>
    %1332 = arith.addf %1330, %1331 : vector<1x128xf32>
    %1333 = arith.mulf %1332, %1313 : vector<1x128xf32>
    %cst_452 = arith.constant 0.199966252 : f32
    %1334 = vector.broadcast %cst_452 : f32 to vector<1x128xf32>
    %1335 = arith.addf %1333, %1334 : vector<1x128xf32>
    %1336 = arith.mulf %1335, %1313 : vector<1x128xf32>
    %cst_453 = arith.constant -0.333331943 : f32
    %1337 = vector.broadcast %cst_453 : f32 to vector<1x128xf32>
    %1338 = arith.addf %1336, %1337 : vector<1x128xf32>
    %1339 = arith.mulf %1338, %1313 : vector<1x128xf32>
    %cst_454 = arith.constant 1.000000e+00 : f32
    %1340 = vector.broadcast %cst_454 : f32 to vector<1x128xf32>
    %1341 = arith.addf %1339, %1340 : vector<1x128xf32>
    %1342 = arith.mulf %1341, %1312 : vector<1x128xf32>
    %1343 = arith.cmpf ogt, %1303, %1304 : vector<1x128xf32>
    %cst_455 = arith.constant 1.57079637 : f32
    %1344 = vector.broadcast %cst_455 : f32 to vector<1x128xf32>
    %1345 = arith.subf %1344, %1342 : vector<1x128xf32>
    %1346 = arith.select %1343, %1345, %1342 : vector<1x128xi1>, vector<1x128xf32>
    %cst_456 = arith.constant 0.000000e+00 : f32
    %1347 = vector.broadcast %cst_456 : f32 to vector<1x128xf32>
    %1348 = arith.cmpf oge, %1296, %1347 : vector<1x128xf32>
    %cst_457 = arith.constant 3.14159274 : f32
    %1349 = vector.broadcast %cst_457 : f32 to vector<1x128xf32>
    %1350 = arith.subf %1349, %1346 : vector<1x128xf32>
    %1351 = arith.select %1348, %1346, %1350 : vector<1x128xi1>, vector<1x128xf32>
    %cst_458 = arith.constant 0.000000e+00 : f32
    %1352 = vector.broadcast %cst_458 : f32 to vector<1x128xf32>
    %1353 = arith.cmpf oge, %1302, %1352 : vector<1x128xf32>
    %cst_459 = arith.constant 0.000000e+00 : f32
    %1354 = vector.broadcast %cst_459 : f32 to vector<1x128xf32>
    %1355 = arith.subf %1354, %1351 : vector<1x128xf32>
    %1356 = arith.select %1353, %1351, %1355 : vector<1x128xi1>, vector<1x128xf32>
    %1357 = arith.subf %1251, %1245 : vector<1x128xf32>
    %1358 = arith.subf %1253, %1247 : vector<1x128xf32>
    %1359 = arith.subf %1255, %1249 : vector<1x128xf32>
    %1360 = arith.subf %1263, %1257 : vector<1x128xf32>
    %1361 = arith.subf %1265, %1259 : vector<1x128xf32>
    %1362 = arith.subf %1267, %1261 : vector<1x128xf32>
    %1363 = arith.mulf %1358, %1273 : vector<1x128xf32>
    %1364 = arith.mulf %1359, %1272 : vector<1x128xf32>
    %1365 = arith.subf %1363, %1364 : vector<1x128xf32>
    %1366 = arith.mulf %1359, %1271 : vector<1x128xf32>
    %1367 = arith.mulf %1357, %1273 : vector<1x128xf32>
    %1368 = arith.subf %1366, %1367 : vector<1x128xf32>
    %1369 = arith.mulf %1357, %1272 : vector<1x128xf32>
    %1370 = arith.mulf %1358, %1271 : vector<1x128xf32>
    %1371 = arith.subf %1369, %1370 : vector<1x128xf32>
    %1372 = arith.mulf %1272, %1362 : vector<1x128xf32>
    %1373 = arith.mulf %1273, %1361 : vector<1x128xf32>
    %1374 = arith.subf %1372, %1373 : vector<1x128xf32>
    %1375 = arith.mulf %1273, %1360 : vector<1x128xf32>
    %1376 = arith.mulf %1271, %1362 : vector<1x128xf32>
    %1377 = arith.subf %1375, %1376 : vector<1x128xf32>
    %1378 = arith.mulf %1271, %1361 : vector<1x128xf32>
    %1379 = arith.mulf %1272, %1360 : vector<1x128xf32>
    %1380 = arith.subf %1378, %1379 : vector<1x128xf32>
    %1381 = arith.mulf %1368, %1273 : vector<1x128xf32>
    %1382 = arith.mulf %1371, %1272 : vector<1x128xf32>
    %1383 = arith.subf %1381, %1382 : vector<1x128xf32>
    %1384 = arith.mulf %1371, %1271 : vector<1x128xf32>
    %1385 = arith.mulf %1365, %1273 : vector<1x128xf32>
    %1386 = arith.subf %1384, %1385 : vector<1x128xf32>
    %1387 = arith.mulf %1365, %1272 : vector<1x128xf32>
    %1388 = arith.mulf %1368, %1271 : vector<1x128xf32>
    %1389 = arith.subf %1387, %1388 : vector<1x128xf32>
    %1390 = math.rsqrt %1283 : vector<1x128xf32>
    %1391 = arith.mulf %1383, %1374 : vector<1x128xf32>
    %1392 = arith.mulf %1386, %1377 : vector<1x128xf32>
    %1393 = arith.addf %1391, %1392 : vector<1x128xf32>
    %1394 = arith.mulf %1389, %1380 : vector<1x128xf32>
    %1395 = arith.addf %1393, %1394 : vector<1x128xf32>
    %1396 = arith.mulf %1395, %1390 : vector<1x128xf32>
    %1397 = arith.mulf %1365, %1374 : vector<1x128xf32>
    %1398 = arith.mulf %1368, %1377 : vector<1x128xf32>
    %1399 = arith.addf %1397, %1398 : vector<1x128xf32>
    %1400 = arith.mulf %1371, %1380 : vector<1x128xf32>
    %1401 = arith.addf %1399, %1400 : vector<1x128xf32>
    %1402 = math.absf %1396 : vector<1x128xf32>
    %1403 = math.absf %1401 : vector<1x128xf32>
    %1404 = arith.maximumf %1402, %1403 : vector<1x128xf32>
    %1405 = arith.minimumf %1402, %1403 : vector<1x128xf32>
    %1406 = tpu.reciprocal %1404 {approx = true} : vector<1x128xf32> -> vector<1x128xf32>
    %1407 = arith.mulf %1404, %1406 : vector<1x128xf32>
    %cst_460 = arith.constant 2.000000e+00 : f32
    %1408 = vector.broadcast %cst_460 : f32 to vector<1x128xf32>
    %1409 = arith.subf %1408, %1407 : vector<1x128xf32>
    %1410 = arith.mulf %1406, %1409 : vector<1x128xf32>
    %1411 = arith.mulf %1405, %1410 : vector<1x128xf32>
    %1412 = arith.mulf %1411, %1411 : vector<1x128xf32>
    %cst_461 = arith.constant -0.00151638396 : f32
    %1413 = vector.broadcast %cst_461 : f32 to vector<1x128xf32>
    %1414 = arith.mulf %1413, %1412 : vector<1x128xf32>
    %cst_462 = arith.constant 0.00960627105 : f32
    %1415 = vector.broadcast %cst_462 : f32 to vector<1x128xf32>
    %1416 = arith.addf %1414, %1415 : vector<1x128xf32>
    %1417 = arith.mulf %1416, %1412 : vector<1x128xf32>
    %cst_463 = arith.constant -0.0285813473 : f32
    %1418 = vector.broadcast %cst_463 : f32 to vector<1x128xf32>
    %1419 = arith.addf %1417, %1418 : vector<1x128xf32>
    %1420 = arith.mulf %1419, %1412 : vector<1x128xf32>
    %cst_464 = arith.constant 0.0551441759 : f32
    %1421 = vector.broadcast %cst_464 : f32 to vector<1x128xf32>
    %1422 = arith.addf %1420, %1421 : vector<1x128xf32>
    %1423 = arith.mulf %1422, %1412 : vector<1x128xf32>
    %cst_465 = arith.constant -0.0822269394 : f32
    %1424 = vector.broadcast %cst_465 : f32 to vector<1x128xf32>
    %1425 = arith.addf %1423, %1424 : vector<1x128xf32>
    %1426 = arith.mulf %1425, %1412 : vector<1x128xf32>
    %cst_466 = arith.constant 0.108822249 : f32
    %1427 = vector.broadcast %cst_466 : f32 to vector<1x128xf32>
    %1428 = arith.addf %1426, %1427 : vector<1x128xf32>
    %1429 = arith.mulf %1428, %1412 : vector<1x128xf32>
    %cst_467 = arith.constant -0.142484158 : f32
    %1430 = vector.broadcast %cst_467 : f32 to vector<1x128xf32>
    %1431 = arith.addf %1429, %1430 : vector<1x128xf32>
    %1432 = arith.mulf %1431, %1412 : vector<1x128xf32>
    %cst_468 = arith.constant 0.199966252 : f32
    %1433 = vector.broadcast %cst_468 : f32 to vector<1x128xf32>
    %1434 = arith.addf %1432, %1433 : vector<1x128xf32>
    %1435 = arith.mulf %1434, %1412 : vector<1x128xf32>
    %cst_469 = arith.constant -0.333331943 : f32
    %1436 = vector.broadcast %cst_469 : f32 to vector<1x128xf32>
    %1437 = arith.addf %1435, %1436 : vector<1x128xf32>
    %1438 = arith.mulf %1437, %1412 : vector<1x128xf32>
    %cst_470 = arith.constant 1.000000e+00 : f32
    %1439 = vector.broadcast %cst_470 : f32 to vector<1x128xf32>
    %1440 = arith.addf %1438, %1439 : vector<1x128xf32>
    %1441 = arith.mulf %1440, %1411 : vector<1x128xf32>
    %1442 = arith.cmpf ogt, %1402, %1403 : vector<1x128xf32>
    %cst_471 = arith.constant 1.57079637 : f32
    %1443 = vector.broadcast %cst_471 : f32 to vector<1x128xf32>
    %1444 = arith.subf %1443, %1441 : vector<1x128xf32>
    %1445 = arith.select %1442, %1444, %1441 : vector<1x128xi1>, vector<1x128xf32>
    %cst_472 = arith.constant 0.000000e+00 : f32
    %1446 = vector.broadcast %cst_472 : f32 to vector<1x128xf32>
    %1447 = arith.cmpf oge, %1401, %1446 : vector<1x128xf32>
    %cst_473 = arith.constant 3.14159274 : f32
    %1448 = vector.broadcast %cst_473 : f32 to vector<1x128xf32>
    %1449 = arith.subf %1448, %1445 : vector<1x128xf32>
    %1450 = arith.select %1447, %1445, %1449 : vector<1x128xi1>, vector<1x128xf32>
    %cst_474 = arith.constant 0.000000e+00 : f32
    %1451 = vector.broadcast %cst_474 : f32 to vector<1x128xf32>
    %1452 = arith.cmpf oge, %1396, %1451 : vector<1x128xf32>
    %cst_475 = arith.constant 0.000000e+00 : f32
    %1453 = vector.broadcast %cst_475 : f32 to vector<1x128xf32>
    %1454 = arith.subf %1453, %1450 : vector<1x128xf32>
    %1455 = arith.select %1452, %1450, %1454 : vector<1x128xi1>, vector<1x128xf32>
    %1456 = arith.mulf %1365, %1365 : vector<1x128xf32>
    %1457 = arith.mulf %1368, %1368 : vector<1x128xf32>
    %1458 = arith.addf %1456, %1457 : vector<1x128xf32>
    %1459 = arith.mulf %1371, %1371 : vector<1x128xf32>
    %1460 = arith.addf %1458, %1459 : vector<1x128xf32>
    %1461 = arith.mulf %1278, %1460 : vector<1x128xf32>
    %1462 = arith.mulf %1390, %1390 : vector<1x128xf32>
    %1463 = arith.mulf %1461, %1462 : vector<1x128xf32>
    %1464 = math.log %1463 : vector<1x128xf32>
    %1465 = arith.addf %1216, %1464 : vector<1x128xf32>
    %c15_476 = arith.constant 15 : index
    %1466 = memref.load %arg4[%c15_476] : memref<18xf32, #tpu.memory_space<smem>>
    %1467 = vector.broadcast %1466 : f32 to vector<1x128xf32>
    %1468 = arith.subf %1284, %1467 : vector<1x128xf32>
    %c15_477 = arith.constant 15 : index
    %1469 = memref.load %arg5[%c15_477] : memref<18xf32, #tpu.memory_space<smem>>
    %1470 = vector.broadcast %1469 : f32 to vector<1x128xf32>
    %1471 = arith.mulf %1468, %1470 : vector<1x128xf32>
    %c21_478 = arith.constant 21 : index
    %c0_479 = arith.constant 0 : index
    %c0_480 = arith.constant 0 : index
    %1472 = vector.load %arg7[%c21_478, %c0_479, %c0_480] : memref<25x1x128xf32, #tpu.memory_space<vmem>>, vector<1x1x128xf32>
    %1473 = vector.shape_cast %1472 : vector<1x1x128xf32> to vector<1x128xf32>
    %1474 = vector.shape_cast %1471 : vector<1x128xf32> to vector<1x1x128xf32>
    tpu.vector_store %arg7[%c21_478, %c0_479, %c0_480], %1474 {strides = array<i32>} : memref<25x1x128xf32, #tpu.memory_space<vmem>>, vector<1x1x128xf32>,
    %c16_481 = arith.constant 16 : index
    %1475 = memref.load %arg4[%c16_481] : memref<18xf32, #tpu.memory_space<smem>>
    %1476 = vector.broadcast %1475 : f32 to vector<1x128xf32>
    %1477 = arith.subf %1356, %1476 : vector<1x128xf32>
    %c16_482 = arith.constant 16 : index
    %1478 = memref.load %arg5[%c16_482] : memref<18xf32, #tpu.memory_space<smem>>
    %1479 = vector.broadcast %1478 : f32 to vector<1x128xf32>
    %1480 = arith.mulf %1477, %1479 : vector<1x128xf32>
    %c22_483 = arith.constant 22 : index
    %c0_484 = arith.constant 0 : index
    %c0_485 = arith.constant 0 : index
    %1481 = vector.load %arg7[%c22_483, %c0_484, %c0_485] : memref<25x1x128xf32, #tpu.memory_space<vmem>>, vector<1x1x128xf32>
    %1482 = vector.shape_cast %1481 : vector<1x1x128xf32> to vector<1x128xf32>
    %1483 = vector.shape_cast %1480 : vector<1x128xf32> to vector<1x1x128xf32>
    tpu.vector_store %arg7[%c22_483, %c0_484, %c0_485], %1483 {strides = array<i32>} : memref<25x1x128xf32, #tpu.memory_space<vmem>>, vector<1x1x128xf32>,
    %c17_486 = arith.constant 17 : index
    %1484 = memref.load %arg4[%c17_486] : memref<18xf32, #tpu.memory_space<smem>>
    %1485 = vector.broadcast %1484 : f32 to vector<1x128xf32>
    %1486 = arith.subf %1455, %1485 : vector<1x128xf32>
    %c17_487 = arith.constant 17 : index
    %1487 = memref.load %arg5[%c17_487] : memref<18xf32, #tpu.memory_space<smem>>
    %1488 = vector.broadcast %1487 : f32 to vector<1x128xf32>
    %1489 = arith.mulf %1486, %1488 : vector<1x128xf32>
    %c23_488 = arith.constant 23 : index
    %c0_489 = arith.constant 0 : index
    %c0_490 = arith.constant 0 : index
    %1490 = vector.load %arg7[%c23_488, %c0_489, %c0_490] : memref<25x1x128xf32, #tpu.memory_space<vmem>>, vector<1x1x128xf32>
    %1491 = vector.shape_cast %1490 : vector<1x1x128xf32> to vector<1x128xf32>
    %1492 = vector.shape_cast %1489 : vector<1x128xf32> to vector<1x1x128xf32>
    tpu.vector_store %arg7[%c23_488, %c0_489, %c0_490], %1492 {strides = array<i32>} : memref<25x1x128xf32, #tpu.memory_space<vmem>>, vector<1x1x128xf32>,
    %c0_491 = arith.constant 0 : index
    %c0_492 = arith.constant 0 : index
    %c0_493 = arith.constant 0 : index
    %1493 = vector.load %arg1[%c0_491, %c0_492, %c0_493] : memref<30x1x128xf32, #tpu.memory_space<vmem>>, vector<1x1x128xf32>
    %1494 = vector.shape_cast %1493 : vector<1x1x128xf32> to vector<1x128xf32>
    %c1_494 = arith.constant 1 : index
    %c0_495 = arith.constant 0 : index
    %c0_496 = arith.constant 0 : index
    %1495 = vector.load %arg1[%c1_494, %c0_495, %c0_496] : memref<30x1x128xf32, #tpu.memory_space<vmem>>, vector<1x1x128xf32>
    %1496 = vector.shape_cast %1495 : vector<1x1x128xf32> to vector<1x128xf32>
    %c2_497 = arith.constant 2 : index
    %c0_498 = arith.constant 0 : index
    %c0_499 = arith.constant 0 : index
    %1497 = vector.load %arg1[%c2_497, %c0_498, %c0_499] : memref<30x1x128xf32, #tpu.memory_space<vmem>>, vector<1x1x128xf32>
    %1498 = vector.shape_cast %1497 : vector<1x1x128xf32> to vector<1x128xf32>
    %c6_500 = arith.constant 6 : index
    %c0_501 = arith.constant 0 : index
    %c0_502 = arith.constant 0 : index
    %1499 = vector.load %arg1[%c6_500, %c0_501, %c0_502] : memref<30x1x128xf32, #tpu.memory_space<vmem>>, vector<1x1x128xf32>
    %1500 = vector.shape_cast %1499 : vector<1x1x128xf32> to vector<1x128xf32>
    %c7_503 = arith.constant 7 : index
    %c0_504 = arith.constant 0 : index
    %c0_505 = arith.constant 0 : index
    %1501 = vector.load %arg1[%c7_503, %c0_504, %c0_505] : memref<30x1x128xf32, #tpu.memory_space<vmem>>, vector<1x1x128xf32>
    %1502 = vector.shape_cast %1501 : vector<1x1x128xf32> to vector<1x128xf32>
    %c8_506 = arith.constant 8 : index
    %c0_507 = arith.constant 0 : index
    %c0_508 = arith.constant 0 : index
    %1503 = vector.load %arg1[%c8_506, %c0_507, %c0_508] : memref<30x1x128xf32, #tpu.memory_space<vmem>>, vector<1x1x128xf32>
    %1504 = vector.shape_cast %1503 : vector<1x1x128xf32> to vector<1x128xf32>
    %c15_509 = arith.constant 15 : index
    %c0_510 = arith.constant 0 : index
    %c0_511 = arith.constant 0 : index
    %1505 = vector.load %arg1[%c15_509, %c0_510, %c0_511] : memref<30x1x128xf32, #tpu.memory_space<vmem>>, vector<1x1x128xf32>
    %1506 = vector.shape_cast %1505 : vector<1x1x128xf32> to vector<1x128xf32>
    %c16_512 = arith.constant 16 : index
    %c0_513 = arith.constant 0 : index
    %c0_514 = arith.constant 0 : index
    %1507 = vector.load %arg1[%c16_512, %c0_513, %c0_514] : memref<30x1x128xf32, #tpu.memory_space<vmem>>, vector<1x1x128xf32>
    %1508 = vector.shape_cast %1507 : vector<1x1x128xf32> to vector<1x128xf32>
    %c17_515 = arith.constant 17 : index
    %c0_516 = arith.constant 0 : index
    %c0_517 = arith.constant 0 : index
    %1509 = vector.load %arg1[%c17_515, %c0_516, %c0_517] : memref<30x1x128xf32, #tpu.memory_space<vmem>>, vector<1x1x128xf32>
    %1510 = vector.shape_cast %1509 : vector<1x1x128xf32> to vector<1x128xf32>
    %c21_518 = arith.constant 21 : index
    %c0_519 = arith.constant 0 : index
    %c0_520 = arith.constant 0 : index
    %1511 = vector.load %arg1[%c21_518, %c0_519, %c0_520] : memref<30x1x128xf32, #tpu.memory_space<vmem>>, vector<1x1x128xf32>
    %1512 = vector.shape_cast %1511 : vector<1x1x128xf32> to vector<1x128xf32>
    %c22_521 = arith.constant 22 : index
    %c0_522 = arith.constant 0 : index
    %c0_523 = arith.constant 0 : index
    %1513 = vector.load %arg1[%c22_521, %c0_522, %c0_523] : memref<30x1x128xf32, #tpu.memory_space<vmem>>, vector<1x1x128xf32>
    %1514 = vector.shape_cast %1513 : vector<1x1x128xf32> to vector<1x128xf32>
    %c23_524 = arith.constant 23 : index
    %c0_525 = arith.constant 0 : index
    %c0_526 = arith.constant 0 : index
    %1515 = vector.load %arg1[%c23_524, %c0_525, %c0_526] : memref<30x1x128xf32, #tpu.memory_space<vmem>>, vector<1x1x128xf32>
    %1516 = vector.shape_cast %1515 : vector<1x1x128xf32> to vector<1x128xf32>
    %c0_527 = arith.constant 0 : index
    %1517 = memref.load %arg2[%c0_527] : memref<72xf32, #tpu.memory_space<smem>>
    %1518 = vector.broadcast %1517 : f32 to vector<1x128xf32>
    %1519 = arith.mulf %1494, %1518 : vector<1x128xf32>
    %c0_528 = arith.constant 0 : index
    %1520 = memref.load %arg3[%c0_528] : memref<6xf32, #tpu.memory_space<smem>>
    %1521 = vector.broadcast %1520 : f32 to vector<1x128xf32>
    %1522 = arith.addf %1519, %1521 : vector<1x128xf32>
    %c1_529 = arith.constant 1 : index
    %1523 = memref.load %arg2[%c1_529] : memref<72xf32, #tpu.memory_space<smem>>
    %1524 = vector.broadcast %1523 : f32 to vector<1x128xf32>
    %1525 = arith.mulf %1496, %1524 : vector<1x128xf32>
    %1526 = arith.addf %1522, %1525 : vector<1x128xf32>
    %c2_530 = arith.constant 2 : index
    %1527 = memref.load %arg2[%c2_530] : memref<72xf32, #tpu.memory_space<smem>>
    %1528 = vector.broadcast %1527 : f32 to vector<1x128xf32>
    %1529 = arith.mulf %1498, %1528 : vector<1x128xf32>
    %1530 = arith.addf %1526, %1529 : vector<1x128xf32>
    %c3_531 = arith.constant 3 : index
    %1531 = memref.load %arg2[%c3_531] : memref<72xf32, #tpu.memory_space<smem>>
    %1532 = vector.broadcast %1531 : f32 to vector<1x128xf32>
    %1533 = arith.mulf %1500, %1532 : vector<1x128xf32>
    %1534 = arith.addf %1530, %1533 : vector<1x128xf32>
    %c4_532 = arith.constant 4 : index
    %1535 = memref.load %arg2[%c4_532] : memref<72xf32, #tpu.memory_space<smem>>
    %1536 = vector.broadcast %1535 : f32 to vector<1x128xf32>
    %1537 = arith.mulf %1502, %1536 : vector<1x128xf32>
    %c5_533 = arith.constant 5 : index
    %1538 = memref.load %arg2[%c5_533] : memref<72xf32, #tpu.memory_space<smem>>
    %1539 = vector.broadcast %1538 : f32 to vector<1x128xf32>
    %1540 = arith.mulf %1504, %1539 : vector<1x128xf32>
    %1541 = arith.addf %1537, %1540 : vector<1x128xf32>
    %c6_534 = arith.constant 6 : index
    %1542 = memref.load %arg2[%c6_534] : memref<72xf32, #tpu.memory_space<smem>>
    %1543 = vector.broadcast %1542 : f32 to vector<1x128xf32>
    %1544 = arith.mulf %1506, %1543 : vector<1x128xf32>
    %1545 = arith.addf %1541, %1544 : vector<1x128xf32>
    %c7_535 = arith.constant 7 : index
    %1546 = memref.load %arg2[%c7_535] : memref<72xf32, #tpu.memory_space<smem>>
    %1547 = vector.broadcast %1546 : f32 to vector<1x128xf32>
    %1548 = arith.mulf %1508, %1547 : vector<1x128xf32>
    %1549 = arith.addf %1545, %1548 : vector<1x128xf32>
    %c8_536 = arith.constant 8 : index
    %1550 = memref.load %arg2[%c8_536] : memref<72xf32, #tpu.memory_space<smem>>
    %1551 = vector.broadcast %1550 : f32 to vector<1x128xf32>
    %1552 = arith.mulf %1510, %1551 : vector<1x128xf32>
    %c9_537 = arith.constant 9 : index
    %1553 = memref.load %arg2[%c9_537] : memref<72xf32, #tpu.memory_space<smem>>
    %1554 = vector.broadcast %1553 : f32 to vector<1x128xf32>
    %1555 = arith.mulf %1512, %1554 : vector<1x128xf32>
    %1556 = arith.addf %1552, %1555 : vector<1x128xf32>
    %c10_538 = arith.constant 10 : index
    %1557 = memref.load %arg2[%c10_538] : memref<72xf32, #tpu.memory_space<smem>>
    %1558 = vector.broadcast %1557 : f32 to vector<1x128xf32>
    %1559 = arith.mulf %1514, %1558 : vector<1x128xf32>
    %1560 = arith.addf %1556, %1559 : vector<1x128xf32>
    %c11_539 = arith.constant 11 : index
    %1561 = memref.load %arg2[%c11_539] : memref<72xf32, #tpu.memory_space<smem>>
    %1562 = vector.broadcast %1561 : f32 to vector<1x128xf32>
    %1563 = arith.mulf %1516, %1562 : vector<1x128xf32>
    %1564 = arith.addf %1560, %1563 : vector<1x128xf32>
    %1565 = arith.addf %1534, %1549 : vector<1x128xf32>
    %1566 = arith.addf %1565, %1564 : vector<1x128xf32>
    %c0_540 = arith.constant 0 : index
    %c0_541 = arith.constant 0 : index
    %c0_542 = arith.constant 0 : index
    %1567 = vector.load %arg7[%c0_540, %c0_541, %c0_542] : memref<25x1x128xf32, #tpu.memory_space<vmem>>, vector<1x1x128xf32>
    %1568 = vector.shape_cast %1567 : vector<1x1x128xf32> to vector<1x128xf32>
    %1569 = vector.shape_cast %1566 : vector<1x128xf32> to vector<1x1x128xf32>
    tpu.vector_store %arg7[%c0_540, %c0_541, %c0_542], %1569 {strides = array<i32>} : memref<25x1x128xf32, #tpu.memory_space<vmem>>, vector<1x1x128xf32>,
    %c12_543 = arith.constant 12 : index
    %1570 = memref.load %arg2[%c12_543] : memref<72xf32, #tpu.memory_space<smem>>
    %1571 = vector.broadcast %1570 : f32 to vector<1x128xf32>
    %1572 = arith.mulf %1494, %1571 : vector<1x128xf32>
    %c1_544 = arith.constant 1 : index
    %1573 = memref.load %arg3[%c1_544] : memref<6xf32, #tpu.memory_space<smem>>
    %1574 = vector.broadcast %1573 : f32 to vector<1x128xf32>
    %1575 = arith.addf %1572, %1574 : vector<1x128xf32>
    %c13_545 = arith.constant 13 : index
    %1576 = memref.load %arg2[%c13_545] : memref<72xf32, #tpu.memory_space<smem>>
    %1577 = vector.broadcast %1576 : f32 to vector<1x128xf32>
    %1578 = arith.mulf %1496, %1577 : vector<1x128xf32>
    %1579 = arith.addf %1575, %1578 : vector<1x128xf32>
    %c14_546 = arith.constant 14 : index
    %1580 = memref.load %arg2[%c14_546] : memref<72xf32, #tpu.memory_space<smem>>
    %1581 = vector.broadcast %1580 : f32 to vector<1x128xf32>
    %1582 = arith.mulf %1498, %1581 : vector<1x128xf32>
    %1583 = arith.addf %1579, %1582 : vector<1x128xf32>
    %c15_547 = arith.constant 15 : index
    %1584 = memref.load %arg2[%c15_547] : memref<72xf32, #tpu.memory_space<smem>>
    %1585 = vector.broadcast %1584 : f32 to vector<1x128xf32>
    %1586 = arith.mulf %1500, %1585 : vector<1x128xf32>
    %1587 = arith.addf %1583, %1586 : vector<1x128xf32>
    %c16_548 = arith.constant 16 : index
    %1588 = memref.load %arg2[%c16_548] : memref<72xf32, #tpu.memory_space<smem>>
    %1589 = vector.broadcast %1588 : f32 to vector<1x128xf32>
    %1590 = arith.mulf %1502, %1589 : vector<1x128xf32>
    %c17_549 = arith.constant 17 : index
    %1591 = memref.load %arg2[%c17_549] : memref<72xf32, #tpu.memory_space<smem>>
    %1592 = vector.broadcast %1591 : f32 to vector<1x128xf32>
    %1593 = arith.mulf %1504, %1592 : vector<1x128xf32>
    %1594 = arith.addf %1590, %1593 : vector<1x128xf32>
    %c18_550 = arith.constant 18 : index
    %1595 = memref.load %arg2[%c18_550] : memref<72xf32, #tpu.memory_space<smem>>
    %1596 = vector.broadcast %1595 : f32 to vector<1x128xf32>
    %1597 = arith.mulf %1506, %1596 : vector<1x128xf32>
    %1598 = arith.addf %1594, %1597 : vector<1x128xf32>
    %c19_551 = arith.constant 19 : index
    %1599 = memref.load %arg2[%c19_551] : memref<72xf32, #tpu.memory_space<smem>>
    %1600 = vector.broadcast %1599 : f32 to vector<1x128xf32>
    %1601 = arith.mulf %1508, %1600 : vector<1x128xf32>
    %1602 = arith.addf %1598, %1601 : vector<1x128xf32>
    %c20_552 = arith.constant 20 : index
    %1603 = memref.load %arg2[%c20_552] : memref<72xf32, #tpu.memory_space<smem>>
    %1604 = vector.broadcast %1603 : f32 to vector<1x128xf32>
    %1605 = arith.mulf %1510, %1604 : vector<1x128xf32>
    %c21_553 = arith.constant 21 : index
    %1606 = memref.load %arg2[%c21_553] : memref<72xf32, #tpu.memory_space<smem>>
    %1607 = vector.broadcast %1606 : f32 to vector<1x128xf32>
    %1608 = arith.mulf %1512, %1607 : vector<1x128xf32>
    %1609 = arith.addf %1605, %1608 : vector<1x128xf32>
    %c22_554 = arith.constant 22 : index
    %1610 = memref.load %arg2[%c22_554] : memref<72xf32, #tpu.memory_space<smem>>
    %1611 = vector.broadcast %1610 : f32 to vector<1x128xf32>
    %1612 = arith.mulf %1514, %1611 : vector<1x128xf32>
    %1613 = arith.addf %1609, %1612 : vector<1x128xf32>
    %c23_555 = arith.constant 23 : index
    %1614 = memref.load %arg2[%c23_555] : memref<72xf32, #tpu.memory_space<smem>>
    %1615 = vector.broadcast %1614 : f32 to vector<1x128xf32>
    %1616 = arith.mulf %1516, %1615 : vector<1x128xf32>
    %1617 = arith.addf %1613, %1616 : vector<1x128xf32>
    %1618 = arith.addf %1587, %1602 : vector<1x128xf32>
    %1619 = arith.addf %1618, %1617 : vector<1x128xf32>
    %c1_556 = arith.constant 1 : index
    %c0_557 = arith.constant 0 : index
    %c0_558 = arith.constant 0 : index
    %1620 = vector.load %arg7[%c1_556, %c0_557, %c0_558] : memref<25x1x128xf32, #tpu.memory_space<vmem>>, vector<1x1x128xf32>
    %1621 = vector.shape_cast %1620 : vector<1x1x128xf32> to vector<1x128xf32>
    %1622 = vector.shape_cast %1619 : vector<1x128xf32> to vector<1x1x128xf32>
    tpu.vector_store %arg7[%c1_556, %c0_557, %c0_558], %1622 {strides = array<i32>} : memref<25x1x128xf32, #tpu.memory_space<vmem>>, vector<1x1x128xf32>,
    %c24_559 = arith.constant 24 : index
    %1623 = memref.load %arg2[%c24_559] : memref<72xf32, #tpu.memory_space<smem>>
    %1624 = vector.broadcast %1623 : f32 to vector<1x128xf32>
    %1625 = arith.mulf %1494, %1624 : vector<1x128xf32>
    %c2_560 = arith.constant 2 : index
    %1626 = memref.load %arg3[%c2_560] : memref<6xf32, #tpu.memory_space<smem>>
    %1627 = vector.broadcast %1626 : f32 to vector<1x128xf32>
    %1628 = arith.addf %1625, %1627 : vector<1x128xf32>
    %c25_561 = arith.constant 25 : index
    %1629 = memref.load %arg2[%c25_561] : memref<72xf32, #tpu.memory_space<smem>>
    %1630 = vector.broadcast %1629 : f32 to vector<1x128xf32>
    %1631 = arith.mulf %1496, %1630 : vector<1x128xf32>
    %1632 = arith.addf %1628, %1631 : vector<1x128xf32>
    %c26_562 = arith.constant 26 : index
    %1633 = memref.load %arg2[%c26_562] : memref<72xf32, #tpu.memory_space<smem>>
    %1634 = vector.broadcast %1633 : f32 to vector<1x128xf32>
    %1635 = arith.mulf %1498, %1634 : vector<1x128xf32>
    %1636 = arith.addf %1632, %1635 : vector<1x128xf32>
    %c27_563 = arith.constant 27 : index
    %1637 = memref.load %arg2[%c27_563] : memref<72xf32, #tpu.memory_space<smem>>
    %1638 = vector.broadcast %1637 : f32 to vector<1x128xf32>
    %1639 = arith.mulf %1500, %1638 : vector<1x128xf32>
    %1640 = arith.addf %1636, %1639 : vector<1x128xf32>
    %c28_564 = arith.constant 28 : index
    %1641 = memref.load %arg2[%c28_564] : memref<72xf32, #tpu.memory_space<smem>>
    %1642 = vector.broadcast %1641 : f32 to vector<1x128xf32>
    %1643 = arith.mulf %1502, %1642 : vector<1x128xf32>
    %c29_565 = arith.constant 29 : index
    %1644 = memref.load %arg2[%c29_565] : memref<72xf32, #tpu.memory_space<smem>>
    %1645 = vector.broadcast %1644 : f32 to vector<1x128xf32>
    %1646 = arith.mulf %1504, %1645 : vector<1x128xf32>
    %1647 = arith.addf %1643, %1646 : vector<1x128xf32>
    %c30 = arith.constant 30 : index
    %1648 = memref.load %arg2[%c30] : memref<72xf32, #tpu.memory_space<smem>>
    %1649 = vector.broadcast %1648 : f32 to vector<1x128xf32>
    %1650 = arith.mulf %1506, %1649 : vector<1x128xf32>
    %1651 = arith.addf %1647, %1650 : vector<1x128xf32>
    %c31 = arith.constant 31 : index
    %1652 = memref.load %arg2[%c31] : memref<72xf32, #tpu.memory_space<smem>>
    %1653 = vector.broadcast %1652 : f32 to vector<1x128xf32>
    %1654 = arith.mulf %1508, %1653 : vector<1x128xf32>
    %1655 = arith.addf %1651, %1654 : vector<1x128xf32>
    %c32 = arith.constant 32 : index
    %1656 = memref.load %arg2[%c32] : memref<72xf32, #tpu.memory_space<smem>>
    %1657 = vector.broadcast %1656 : f32 to vector<1x128xf32>
    %1658 = arith.mulf %1510, %1657 : vector<1x128xf32>
    %c33 = arith.constant 33 : index
    %1659 = memref.load %arg2[%c33] : memref<72xf32, #tpu.memory_space<smem>>
    %1660 = vector.broadcast %1659 : f32 to vector<1x128xf32>
    %1661 = arith.mulf %1512, %1660 : vector<1x128xf32>
    %1662 = arith.addf %1658, %1661 : vector<1x128xf32>
    %c34 = arith.constant 34 : index
    %1663 = memref.load %arg2[%c34] : memref<72xf32, #tpu.memory_space<smem>>
    %1664 = vector.broadcast %1663 : f32 to vector<1x128xf32>
    %1665 = arith.mulf %1514, %1664 : vector<1x128xf32>
    %1666 = arith.addf %1662, %1665 : vector<1x128xf32>
    %c35 = arith.constant 35 : index
    %1667 = memref.load %arg2[%c35] : memref<72xf32, #tpu.memory_space<smem>>
    %1668 = vector.broadcast %1667 : f32 to vector<1x128xf32>
    %1669 = arith.mulf %1516, %1668 : vector<1x128xf32>
    %1670 = arith.addf %1666, %1669 : vector<1x128xf32>
    %1671 = arith.addf %1640, %1655 : vector<1x128xf32>
    %1672 = arith.addf %1671, %1670 : vector<1x128xf32>
    %c2_566 = arith.constant 2 : index
    %c0_567 = arith.constant 0 : index
    %c0_568 = arith.constant 0 : index
    %1673 = vector.load %arg7[%c2_566, %c0_567, %c0_568] : memref<25x1x128xf32, #tpu.memory_space<vmem>>, vector<1x1x128xf32>
    %1674 = vector.shape_cast %1673 : vector<1x1x128xf32> to vector<1x128xf32>
    %1675 = vector.shape_cast %1672 : vector<1x128xf32> to vector<1x1x128xf32>
    tpu.vector_store %arg7[%c2_566, %c0_567, %c0_568], %1675 {strides = array<i32>} : memref<25x1x128xf32, #tpu.memory_space<vmem>>, vector<1x1x128xf32>,
    %c36 = arith.constant 36 : index
    %1676 = memref.load %arg2[%c36] : memref<72xf32, #tpu.memory_space<smem>>
    %1677 = vector.broadcast %1676 : f32 to vector<1x128xf32>
    %1678 = arith.mulf %1494, %1677 : vector<1x128xf32>
    %c3_569 = arith.constant 3 : index
    %1679 = memref.load %arg3[%c3_569] : memref<6xf32, #tpu.memory_space<smem>>
    %1680 = vector.broadcast %1679 : f32 to vector<1x128xf32>
    %1681 = arith.addf %1678, %1680 : vector<1x128xf32>
    %c37 = arith.constant 37 : index
    %1682 = memref.load %arg2[%c37] : memref<72xf32, #tpu.memory_space<smem>>
    %1683 = vector.broadcast %1682 : f32 to vector<1x128xf32>
    %1684 = arith.mulf %1496, %1683 : vector<1x128xf32>
    %1685 = arith.addf %1681, %1684 : vector<1x128xf32>
    %c38 = arith.constant 38 : index
    %1686 = memref.load %arg2[%c38] : memref<72xf32, #tpu.memory_space<smem>>
    %1687 = vector.broadcast %1686 : f32 to vector<1x128xf32>
    %1688 = arith.mulf %1498, %1687 : vector<1x128xf32>
    %1689 = arith.addf %1685, %1688 : vector<1x128xf32>
    %c39 = arith.constant 39 : index
    %1690 = memref.load %arg2[%c39] : memref<72xf32, #tpu.memory_space<smem>>
    %1691 = vector.broadcast %1690 : f32 to vector<1x128xf32>
    %1692 = arith.mulf %1500, %1691 : vector<1x128xf32>
    %1693 = arith.addf %1689, %1692 : vector<1x128xf32>
    %c40 = arith.constant 40 : index
    %1694 = memref.load %arg2[%c40] : memref<72xf32, #tpu.memory_space<smem>>
    %1695 = vector.broadcast %1694 : f32 to vector<1x128xf32>
    %1696 = arith.mulf %1502, %1695 : vector<1x128xf32>
    %c41 = arith.constant 41 : index
    %1697 = memref.load %arg2[%c41] : memref<72xf32, #tpu.memory_space<smem>>
    %1698 = vector.broadcast %1697 : f32 to vector<1x128xf32>
    %1699 = arith.mulf %1504, %1698 : vector<1x128xf32>
    %1700 = arith.addf %1696, %1699 : vector<1x128xf32>
    %c42 = arith.constant 42 : index
    %1701 = memref.load %arg2[%c42] : memref<72xf32, #tpu.memory_space<smem>>
    %1702 = vector.broadcast %1701 : f32 to vector<1x128xf32>
    %1703 = arith.mulf %1506, %1702 : vector<1x128xf32>
    %1704 = arith.addf %1700, %1703 : vector<1x128xf32>
    %c43 = arith.constant 43 : index
    %1705 = memref.load %arg2[%c43] : memref<72xf32, #tpu.memory_space<smem>>
    %1706 = vector.broadcast %1705 : f32 to vector<1x128xf32>
    %1707 = arith.mulf %1508, %1706 : vector<1x128xf32>
    %1708 = arith.addf %1704, %1707 : vector<1x128xf32>
    %c44 = arith.constant 44 : index
    %1709 = memref.load %arg2[%c44] : memref<72xf32, #tpu.memory_space<smem>>
    %1710 = vector.broadcast %1709 : f32 to vector<1x128xf32>
    %1711 = arith.mulf %1510, %1710 : vector<1x128xf32>
    %c45 = arith.constant 45 : index
    %1712 = memref.load %arg2[%c45] : memref<72xf32, #tpu.memory_space<smem>>
    %1713 = vector.broadcast %1712 : f32 to vector<1x128xf32>
    %1714 = arith.mulf %1512, %1713 : vector<1x128xf32>
    %1715 = arith.addf %1711, %1714 : vector<1x128xf32>
    %c46 = arith.constant 46 : index
    %1716 = memref.load %arg2[%c46] : memref<72xf32, #tpu.memory_space<smem>>
    %1717 = vector.broadcast %1716 : f32 to vector<1x128xf32>
    %1718 = arith.mulf %1514, %1717 : vector<1x128xf32>
    %1719 = arith.addf %1715, %1718 : vector<1x128xf32>
    %c47 = arith.constant 47 : index
    %1720 = memref.load %arg2[%c47] : memref<72xf32, #tpu.memory_space<smem>>
    %1721 = vector.broadcast %1720 : f32 to vector<1x128xf32>
    %1722 = arith.mulf %1516, %1721 : vector<1x128xf32>
    %1723 = arith.addf %1719, %1722 : vector<1x128xf32>
    %1724 = arith.addf %1693, %1708 : vector<1x128xf32>
    %1725 = arith.addf %1724, %1723 : vector<1x128xf32>
    %c3_570 = arith.constant 3 : index
    %c0_571 = arith.constant 0 : index
    %c0_572 = arith.constant 0 : index
    %1726 = vector.load %arg7[%c3_570, %c0_571, %c0_572] : memref<25x1x128xf32, #tpu.memory_space<vmem>>, vector<1x1x128xf32>
    %1727 = vector.shape_cast %1726 : vector<1x1x128xf32> to vector<1x128xf32>
    %1728 = vector.shape_cast %1725 : vector<1x128xf32> to vector<1x1x128xf32>
    tpu.vector_store %arg7[%c3_570, %c0_571, %c0_572], %1728 {strides = array<i32>} : memref<25x1x128xf32, #tpu.memory_space<vmem>>, vector<1x1x128xf32>,
    %c48 = arith.constant 48 : index
    %1729 = memref.load %arg2[%c48] : memref<72xf32, #tpu.memory_space<smem>>
    %1730 = vector.broadcast %1729 : f32 to vector<1x128xf32>
    %1731 = arith.mulf %1494, %1730 : vector<1x128xf32>
    %c4_573 = arith.constant 4 : index
    %1732 = memref.load %arg3[%c4_573] : memref<6xf32, #tpu.memory_space<smem>>
    %1733 = vector.broadcast %1732 : f32 to vector<1x128xf32>
    %1734 = arith.addf %1731, %1733 : vector<1x128xf32>
    %c49 = arith.constant 49 : index
    %1735 = memref.load %arg2[%c49] : memref<72xf32, #tpu.memory_space<smem>>
    %1736 = vector.broadcast %1735 : f32 to vector<1x128xf32>
    %1737 = arith.mulf %1496, %1736 : vector<1x128xf32>
    %1738 = arith.addf %1734, %1737 : vector<1x128xf32>
    %c50 = arith.constant 50 : index
    %1739 = memref.load %arg2[%c50] : memref<72xf32, #tpu.memory_space<smem>>
    %1740 = vector.broadcast %1739 : f32 to vector<1x128xf32>
    %1741 = arith.mulf %1498, %1740 : vector<1x128xf32>
    %1742 = arith.addf %1738, %1741 : vector<1x128xf32>
    %c51 = arith.constant 51 : index
    %1743 = memref.load %arg2[%c51] : memref<72xf32, #tpu.memory_space<smem>>
    %1744 = vector.broadcast %1743 : f32 to vector<1x128xf32>
    %1745 = arith.mulf %1500, %1744 : vector<1x128xf32>
    %1746 = arith.addf %1742, %1745 : vector<1x128xf32>
    %c52 = arith.constant 52 : index
    %1747 = memref.load %arg2[%c52] : memref<72xf32, #tpu.memory_space<smem>>
    %1748 = vector.broadcast %1747 : f32 to vector<1x128xf32>
    %1749 = arith.mulf %1502, %1748 : vector<1x128xf32>
    %c53 = arith.constant 53 : index
    %1750 = memref.load %arg2[%c53] : memref<72xf32, #tpu.memory_space<smem>>
    %1751 = vector.broadcast %1750 : f32 to vector<1x128xf32>
    %1752 = arith.mulf %1504, %1751 : vector<1x128xf32>
    %1753 = arith.addf %1749, %1752 : vector<1x128xf32>
    %c54 = arith.constant 54 : index
    %1754 = memref.load %arg2[%c54] : memref<72xf32, #tpu.memory_space<smem>>
    %1755 = vector.broadcast %1754 : f32 to vector<1x128xf32>
    %1756 = arith.mulf %1506, %1755 : vector<1x128xf32>
    %1757 = arith.addf %1753, %1756 : vector<1x128xf32>
    %c55 = arith.constant 55 : index
    %1758 = memref.load %arg2[%c55] : memref<72xf32, #tpu.memory_space<smem>>
    %1759 = vector.broadcast %1758 : f32 to vector<1x128xf32>
    %1760 = arith.mulf %1508, %1759 : vector<1x128xf32>
    %1761 = arith.addf %1757, %1760 : vector<1x128xf32>
    %c56 = arith.constant 56 : index
    %1762 = memref.load %arg2[%c56] : memref<72xf32, #tpu.memory_space<smem>>
    %1763 = vector.broadcast %1762 : f32 to vector<1x128xf32>
    %1764 = arith.mulf %1510, %1763 : vector<1x128xf32>
    %c57 = arith.constant 57 : index
    %1765 = memref.load %arg2[%c57] : memref<72xf32, #tpu.memory_space<smem>>
    %1766 = vector.broadcast %1765 : f32 to vector<1x128xf32>
    %1767 = arith.mulf %1512, %1766 : vector<1x128xf32>
    %1768 = arith.addf %1764, %1767 : vector<1x128xf32>
    %c58 = arith.constant 58 : index
    %1769 = memref.load %arg2[%c58] : memref<72xf32, #tpu.memory_space<smem>>
    %1770 = vector.broadcast %1769 : f32 to vector<1x128xf32>
    %1771 = arith.mulf %1514, %1770 : vector<1x128xf32>
    %1772 = arith.addf %1768, %1771 : vector<1x128xf32>
    %c59 = arith.constant 59 : index
    %1773 = memref.load %arg2[%c59] : memref<72xf32, #tpu.memory_space<smem>>
    %1774 = vector.broadcast %1773 : f32 to vector<1x128xf32>
    %1775 = arith.mulf %1516, %1774 : vector<1x128xf32>
    %1776 = arith.addf %1772, %1775 : vector<1x128xf32>
    %1777 = arith.addf %1746, %1761 : vector<1x128xf32>
    %1778 = arith.addf %1777, %1776 : vector<1x128xf32>
    %c4_574 = arith.constant 4 : index
    %c0_575 = arith.constant 0 : index
    %c0_576 = arith.constant 0 : index
    %1779 = vector.load %arg7[%c4_574, %c0_575, %c0_576] : memref<25x1x128xf32, #tpu.memory_space<vmem>>, vector<1x1x128xf32>
    %1780 = vector.shape_cast %1779 : vector<1x1x128xf32> to vector<1x128xf32>
    %1781 = vector.shape_cast %1778 : vector<1x128xf32> to vector<1x1x128xf32>
    tpu.vector_store %arg7[%c4_574, %c0_575, %c0_576], %1781 {strides = array<i32>} : memref<25x1x128xf32, #tpu.memory_space<vmem>>, vector<1x1x128xf32>,
    %c60 = arith.constant 60 : index
    %1782 = memref.load %arg2[%c60] : memref<72xf32, #tpu.memory_space<smem>>
    %1783 = vector.broadcast %1782 : f32 to vector<1x128xf32>
    %1784 = arith.mulf %1494, %1783 : vector<1x128xf32>
    %c5_577 = arith.constant 5 : index
    %1785 = memref.load %arg3[%c5_577] : memref<6xf32, #tpu.memory_space<smem>>
    %1786 = vector.broadcast %1785 : f32 to vector<1x128xf32>
    %1787 = arith.addf %1784, %1786 : vector<1x128xf32>
    %c61 = arith.constant 61 : index
    %1788 = memref.load %arg2[%c61] : memref<72xf32, #tpu.memory_space<smem>>
    %1789 = vector.broadcast %1788 : f32 to vector<1x128xf32>
    %1790 = arith.mulf %1496, %1789 : vector<1x128xf32>
    %1791 = arith.addf %1787, %1790 : vector<1x128xf32>
    %c62 = arith.constant 62 : index
    %1792 = memref.load %arg2[%c62] : memref<72xf32, #tpu.memory_space<smem>>
    %1793 = vector.broadcast %1792 : f32 to vector<1x128xf32>
    %1794 = arith.mulf %1498, %1793 : vector<1x128xf32>
    %1795 = arith.addf %1791, %1794 : vector<1x128xf32>
    %c63 = arith.constant 63 : index
    %1796 = memref.load %arg2[%c63] : memref<72xf32, #tpu.memory_space<smem>>
    %1797 = vector.broadcast %1796 : f32 to vector<1x128xf32>
    %1798 = arith.mulf %1500, %1797 : vector<1x128xf32>
    %1799 = arith.addf %1795, %1798 : vector<1x128xf32>
    %c64 = arith.constant 64 : index
    %1800 = memref.load %arg2[%c64] : memref<72xf32, #tpu.memory_space<smem>>
    %1801 = vector.broadcast %1800 : f32 to vector<1x128xf32>
    %1802 = arith.mulf %1502, %1801 : vector<1x128xf32>
    %c65 = arith.constant 65 : index
    %1803 = memref.load %arg2[%c65] : memref<72xf32, #tpu.memory_space<smem>>
    %1804 = vector.broadcast %1803 : f32 to vector<1x128xf32>
    %1805 = arith.mulf %1504, %1804 : vector<1x128xf32>
    %1806 = arith.addf %1802, %1805 : vector<1x128xf32>
    %c66 = arith.constant 66 : index
    %1807 = memref.load %arg2[%c66] : memref<72xf32, #tpu.memory_space<smem>>
    %1808 = vector.broadcast %1807 : f32 to vector<1x128xf32>
    %1809 = arith.mulf %1506, %1808 : vector<1x128xf32>
    %1810 = arith.addf %1806, %1809 : vector<1x128xf32>
    %c67 = arith.constant 67 : index
    %1811 = memref.load %arg2[%c67] : memref<72xf32, #tpu.memory_space<smem>>
    %1812 = vector.broadcast %1811 : f32 to vector<1x128xf32>
    %1813 = arith.mulf %1508, %1812 : vector<1x128xf32>
    %1814 = arith.addf %1810, %1813 : vector<1x128xf32>
    %c68 = arith.constant 68 : index
    %1815 = memref.load %arg2[%c68] : memref<72xf32, #tpu.memory_space<smem>>
    %1816 = vector.broadcast %1815 : f32 to vector<1x128xf32>
    %1817 = arith.mulf %1510, %1816 : vector<1x128xf32>
    %c69 = arith.constant 69 : index
    %1818 = memref.load %arg2[%c69] : memref<72xf32, #tpu.memory_space<smem>>
    %1819 = vector.broadcast %1818 : f32 to vector<1x128xf32>
    %1820 = arith.mulf %1512, %1819 : vector<1x128xf32>
    %1821 = arith.addf %1817, %1820 : vector<1x128xf32>
    %c70 = arith.constant 70 : index
    %1822 = memref.load %arg2[%c70] : memref<72xf32, #tpu.memory_space<smem>>
    %1823 = vector.broadcast %1822 : f32 to vector<1x128xf32>
    %1824 = arith.mulf %1514, %1823 : vector<1x128xf32>
    %1825 = arith.addf %1821, %1824 : vector<1x128xf32>
    %c71 = arith.constant 71 : index
    %1826 = memref.load %arg2[%c71] : memref<72xf32, #tpu.memory_space<smem>>
    %1827 = vector.broadcast %1826 : f32 to vector<1x128xf32>
    %1828 = arith.mulf %1516, %1827 : vector<1x128xf32>
    %1829 = arith.addf %1825, %1828 : vector<1x128xf32>
    %1830 = arith.addf %1799, %1814 : vector<1x128xf32>
    %1831 = arith.addf %1830, %1829 : vector<1x128xf32>
    %c5_578 = arith.constant 5 : index
    %c0_579 = arith.constant 0 : index
    %c0_580 = arith.constant 0 : index
    %1832 = vector.load %arg7[%c5_578, %c0_579, %c0_580] : memref<25x1x128xf32, #tpu.memory_space<vmem>>, vector<1x1x128xf32>
    %1833 = vector.shape_cast %1832 : vector<1x1x128xf32> to vector<1x128xf32>
    %1834 = vector.shape_cast %1831 : vector<1x128xf32> to vector<1x1x128xf32>
    tpu.vector_store %arg7[%c5_578, %c0_579, %c0_580], %1834 {strides = array<i32>} : memref<25x1x128xf32, #tpu.memory_space<vmem>>, vector<1x1x128xf32>,
    %c0_581 = arith.constant 0 : index
    %1835 = memref.load %arg6[%c0_581] : memref<1xf32, #tpu.memory_space<smem>>
    %cst_582 = arith.constant 5.000000e-01 : f32
    %1836 = vector.broadcast %cst_582 : f32 to vector<1x128xf32>
    %1837 = arith.mulf %1836, %1465 : vector<1x128xf32>
    %1838 = vector.broadcast %1835 : f32 to vector<1x128xf32>
    %1839 = arith.subf %1838, %1837 : vector<1x128xf32>
    %c24_583 = arith.constant 24 : index
    %c0_584 = arith.constant 0 : index
    %c0_585 = arith.constant 0 : index
    %1840 = vector.load %arg7[%c24_583, %c0_584, %c0_585] : memref<25x1x128xf32, #tpu.memory_space<vmem>>, vector<1x1x128xf32>
    %1841 = vector.shape_cast %1840 : vector<1x1x128xf32> to vector<1x128xf32>
    %1842 = vector.shape_cast %1839 : vector<1x128xf32> to vector<1x1x128xf32>
    tpu.vector_store %arg7[%c24_583, %c0_584, %c0_585], %1842 {strides = array<i32>} : memref<25x1x128xf32, #tpu.memory_space<vmem>>, vector<1x1x128xf32>,
    return
  }
  func.func @transform_0(%arg0: i32) -> (i32, i32, i32) {
    %c0_i32 = arith.constant 0 : i32
    %c0_i32_0 = arith.constant 0 : i32
    %c0_i32_1 = arith.constant 0 : i32
    return %c0_i32, %arg0, %c0_i32_0 : i32, i32, i32
  }
  func.func @transform_1(%arg0: i32) -> i32 {
    %c0_i32 = arith.constant 0 : i32
    %c0_i32_0 = arith.constant 0 : i32
    return %c0_i32 : i32
  }
  func.func @transform_2(%arg0: i32) -> i32 {
    %c0_i32 = arith.constant 0 : i32
    %c0_i32_0 = arith.constant 0 : i32
    return %c0_i32 : i32
  }
  func.func @transform_3(%arg0: i32) -> i32 {
    %c0_i32 = arith.constant 0 : i32
    %c0_i32_0 = arith.constant 0 : i32
    return %c0_i32 : i32
  }
  func.func @transform_4(%arg0: i32) -> i32 {
    %c0_i32 = arith.constant 0 : i32
    %c0_i32_0 = arith.constant 0 : i32
    return %c0_i32 : i32
  }
  func.func @transform_5(%arg0: i32) -> i32 {
    %c0_i32 = arith.constant 0 : i32
    %c0_i32_0 = arith.constant 0 : i32
    return %c0_i32 : i32
  }
  func.func @transform_6(%arg0: i32) -> (i32, i32, i32) {
    %c0_i32 = arith.constant 0 : i32
    %c0_i32_0 = arith.constant 0 : i32
    %c0_i32_1 = arith.constant 0 : i32
    return %c0_i32, %arg0, %c0_i32_0 : i32, i32, i32
  }
}

</mosaic_0001>

<bundles_post_ra>
// kernel: tpu_custom_call.1
= control target key start
LH: loop header
LB: loop body
LE: loop exit
PB: predicated region body
PF: predicated region fallthrough
CT: control target
= control target key end

     0   :  { %s4310_s0 = inlined_call_operand.hbm [shape: f32[30,1,128], index: 0, kind: input, shape index: {}]   ;;  %s4311_s1 = inlined_call_operand.vmem [shape: f32[72], index: 1, kind: input, shape index: {}]   ;;  %s4312_s2 = inlined_call_operand.vmem [shape: f32[6], index: 2, kind: input, shape index: {}]   ;;  %s4313_s3 = inlined_call_operand.vmem [shape: f32[18], index: 3, kind: input, shape index: {}]   ;;  %s4314_s4 = inlined_call_operand.vmem [shape: f32[18], index: 4, kind: input, shape index: {}]   ;;  %s4315_s5 = inlined_call_operand.<no memory space> [shape: f32[1], index: 5, kind: input, shape index: {}]   ;;  %s4316_s6 = inlined_call_operand.hbm [shape: f32[25,1,128], index: 6, kind: output, shape index: {}]  }
   0x1   :  { %4342 = sst [smem:[#allocation35_spill]] %s4315_s5 }
   0x2   :  { %4343 = sst [smem:[#allocation36_spill]] %s4316_s6 }
   0x3   :  { %12 = vsyncpa [#allocation4], 0 }
   0x4   :  { %13 = vsyncpa [#allocation6], 0 }
   0x5   :  { %14 = vsyncpa [#allocation9], 0 }
   0x6   :  { %15 = vsyncpa [#allocation12], 0  ;;  %s44_s23 = sshll.u32 %s4312_s2, 4  ;;  %s45_s23 = int_to_ptr.vmem [resolvable:$true] %s44_s23 }
   0x7   :  { %16 = vsyncpa [#allocation5], 0  ;;  %s21_s26 = sshll.u32 %s4310_s0, 4  ;;  %s2216_s27 = smov [#allocation8]   ;;  %s22_s26 = int_to_ptr.hbm [resolvable:$true] %s21_s26 }
   0x8   :  { %47 = dma.vmem_to_smem %s45_s23, 16, %s2216_s27, [#allocation9]  }
   0x9   :  { %s2217_s28 = smov [#allocation3]   ;;  %s4340_s30 = smov 16  }
   0xa   :  { %s23_s29 = sshll.u32 %s2217_s28, 4  ;;  %s4341_s7 = smov 1   ;;  %s24_s29 = int_to_ptr.vmem [resolvable:$true] %s23_s29 }
   0xb   :  { %29 = dma.hbm_to_vmem [thread:$0]  %s22_s26, 480, %s24_s29, [#allocation4], %s4340_s30, %s4340_s30, %s4341_s7  }
   0xc   :  { %s35_s9 = sshll.u32 %s4311_s1, 4  ;;  %s53_s0 = sshll.u32 %s4313_s3, 4  ;;  %s36_s9 = int_to_ptr.vmem [resolvable:$true] %s35_s9  ;;  %s54_s0 = int_to_ptr.vmem [resolvable:$true] %s53_s0 }
   0xd   :  { %s2220_s12 = smov [#allocation7]   ;;  %s2221_s13 = smov [#allocation10]  }
   0xe   :  { %38 = dma.vmem_to_smem %s36_s9, 16, %s2220_s12, [#allocation6]  }
   0xf   :  { %56 = dma.vmem_to_smem %s54_s0, 16, %s2221_s13, [#allocation9]  }
  0x10   :  { %s62_s16 = sshll.u32 %s4314_s4, 4  ;;  %s2222_s17 = smov [#allocation11]   ;;  %s63_s16 = int_to_ptr.vmem [resolvable:$true] %s62_s16 }
  0x11   :  { %65 = dma.vmem_to_smem %s63_s16, 16, %s2222_s17, [#allocation12]  }
  0x12   :  { %2206 = dma.done.wait [#allocation4], 480  }
  0x13   :  { %2207 = vsyncadd [#allocation4], 4294966816 }
  0x14   :  { %2208 = dma.done.wait [#allocation6], 16  }
  0x15   :  { %2209 = vsyncadd [#allocation6], 4294967280 }
  0x16   :  { %2210 = dma.done.wait [#allocation9], 32  }
  0x17   :  { %2211 = vsyncadd [#allocation9], 4294967264 }
  0x18   :  { %2212 = dma.done.wait [#allocation12], 16  }
  0x19   :  { %2213 = vsyncadd [#allocation12], 4294967280 }
  0x1a   :  { %88 = sfence }
  0x1b   :  { %v90_v0 = vld [vmem:[#allocation3 + $0x3] sm:$0x1]  ;;  %v92_v1 = vld [vmem:[#allocation3 + $0x4] sm:$0x1]  ;;  %v94_v2 = vld [vmem:[#allocation3 + $0x5] sm:$0x1] }
  0x1c   :  { %v95_v3 = vld [vmem:[#allocation3] sm:$0x1]  ;;  %v97_v4 = vld [vmem:[#allocation3 + $0x1] sm:$0x1]  ;;  %v99_v5 = vld [vmem:[#allocation3 + $0x2] sm:$0x1] }
  0x1d   :  { %v2277_v6 = vld [vmem:[#allocation3 + $0x6] sm:$0x1]  ;;  %v2279_v7 = vld [vmem:[#allocation3 + $0x7] sm:$0x1]  ;;  %v2281_v8 = vld [vmem:[#allocation3 + $0x8] sm:$0x1]  ;;  %v112_v9 = vsub.f32 %v90_v0, %v95_v3  ;;  %v113_v10 = vsub.f32 %v92_v1, %v97_v4  ;;  %v114_v11 = vsub.f32 %v94_v2, %v99_v5  ;;  %v212_v47 = vsub.f32 %v95_v3, %v90_v0 }
  0x1e   :  { %v2284_v12 = vsub.f32 %v2277_v6, %v95_v3  ;;  %v2287_v13 = vsub.f32 %v2279_v7, %v97_v4  ;;  %v2290_v14 = vsub.f32 %v2281_v8, %v99_v5  ;;  %v2292_v18 = vld [vmem:[#allocation3 + $0x9] sm:$0x1]  ;;  %v2294_v19 = vld [vmem:[#allocation3 + $0xa] sm:$0x1]  ;;  %v2303_v24 = vld [vmem:[#allocation3 + $0xb] sm:$0x1]  ;;  %v213_v48 = vsub.f32 %v97_v4, %v92_v1 }
  0x1f   :  { %v118_v15 = vmul.f32 %v112_v9, %v112_v9  ;;  %v119_v16 = vmul.f32 %v113_v10, %v113_v10  ;;  %v121_v17 = vmul.f32 %v114_v11, %v114_v11  ;;  %v2305_v25 = vld [vmem:[#allocation3 + $0x6] sm:$0x1]  ;;  %v2308_v28 = vld [vmem:[#allocation3 + $0x7] sm:$0x1]  ;;  %v2310_v29 = vld [vmem:[#allocation3 + $0x8] sm:$0x1]  ;;  %v214_v49 = vsub.f32 %v99_v5, %v94_v2 }
  0x20   :  { %v123_v20 = vmul.f32 %v2284_v12, %v2284_v12  ;;  %v124_v21 = vmul.f32 %v2287_v13, %v2287_v13  ;;  %v126_v22 = vmul.f32 %v2290_v14, %v2290_v14  ;;  %v140_v23 = vmul.f32 %v2284_v12, %v112_v9  ;;  %v2323_v35 = vld [vmem:[#allocation3] sm:$0x1]  ;;  %v2325_v36 = vld [vmem:[#allocation3 + $0x1] sm:$0x1]  ;;  %v2327_v37 = vld [vmem:[#allocation3 + $0x2] sm:$0x1] }
  0x21   :  { %v120_v26 = vadd.f32 %v119_v16, %v118_v15  ;;  %v141_v27 = vmul.f32 %v2287_v13, %v113_v10  ;;  %v2314_v30 = vsub.f32 %v2292_v18, %v2305_v25  ;;  %v2318_v32 = vsub.f32 %v2294_v19, %v2308_v28  ;;  %v107_v50 = vld [vmem:[#allocation3 + $0xf] sm:$0x1]  ;;  %v109_v51 = vld [vmem:[#allocation3 + $0x10] sm:$0x1]  ;;  %v111_v52 = vld [vmem:[#allocation3 + $0x11] sm:$0x1] }
  0x22   :  { %v125_v31 = vadd.f32 %v124_v21, %v123_v20  ;;  %v143_v34 = vmul.f32 %v2290_v14, %v114_v11  ;;  %v2331_v38 = vsub.f32 %v2303_v24, %v2310_v29  ;;  %v2346_v44 = vsub.f32 %v2323_v35, %v2305_v25  ;;  %s2786_s1 = sld [smem:[#allocation10]] }
  0x23   :  { %v2320_v33 = vadd.f32 %v121_v17, %v120_v26  ;;  %v142_v40 = vadd.f32 %v141_v27, %v140_v23  ;;  %v359_v41 = vmul.f32 %v2314_v30, %v2314_v30  ;;  %v360_v42 = vmul.f32 %v2318_v32, %v2318_v32  ;;  %s2795_s3 = sld [smem:[#allocation11]] }
  0x24   :  { %v2333_v39 = vadd.f32 %v126_v22, %v125_v31  ;;  %v2350_v45 = vsub.f32 %v2325_v36, %v2308_v28  ;;  %v2354_v46 = vsub.f32 %v2327_v37, %v2310_v29  ;;  %v362_v55 = vmul.f32 %v2331_v38, %v2331_v38  ;;  %s2811_s4 = sld [smem:[#allocation10 + $0x2]] }
  0x25   :  { %2026 = vrsqrt.f32 %v2320_v33  ;;  %v2357_v53 = vadd.f32 %v143_v34, %v142_v40  ;;  %v361_v54 = vadd.f32 %v360_v42, %v359_v41  ;;  %v218_v56 = vmul.f32 %v213_v48, %v2290_v14  ;;  %s2830_s18 = sld [smem:[#allocation11 + $0x2]] }
  0x26   :  { %v2342_v43 = vmul.f32 %v2333_v39, %v2320_v33  ;;  %2028 = vrsqrt.f32 %v2333_v39  ;;  %v219_v57 = vmul.f32 %v214_v49, %v2287_v13  ;;  %v221_v58 = vmul.f32 %v214_v49, %v2284_v12  ;;  %s2858_s19 = sld [smem:[#allocation10 + $0x1]] }
  0x27   :  { %v222_v59 = vmul.f32 %v212_v47, %v2290_v14  ;;  %v224_v60 = vmul.f32 %v212_v47, %v2287_v13  ;;  %v225_v61 = vmul.f32 %v213_v48, %v2284_v12  ;;  %v364_v62 = vmul.f32 %v2346_v44, %v2346_v44  ;;  %s2864_s20 = sld [smem:[#allocation11 + $0x1]] }
  0x28   :  { %2030 = vrsqrt.f32 %v2342_v43  ;;  %v365_v63 = vmul.f32 %v2350_v45, %v2350_v45  ;;  %vm152_vm0 = vweird.f32 %v2342_v43  ;;  %v215_v1 = vsub.f32 %v107_v50, %v2277_v6  ;;  %s2900_s21 = sld [smem:[#allocation10 + $0x3]] }
  0x29   :  { %v216_v2 = vsub.f32 %v109_v51, %v2279_v7  ;;  %v217_v3 = vsub.f32 %v111_v52, %v2281_v8  ;;  %v2380_v5 = vsub.f32 %v218_v56, %v219_v57  ;;  %v2382_v9 = vsub.f32 %v221_v58, %v222_v59  ;;  %s2908_s22 = sld [smem:[#allocation11 + $0x3]] }
  0x2a   :  { %v2384_v10 = vsub.f32 %v224_v60, %v225_v61  ;;  %v230_v6 = vmul.f32 %v215_v1, %v2290_v14  ;;  %v366_v21 = vadd.f32 %v365_v63, %v364_v62  ;;  %v367_v22 = vmul.f32 %v2354_v46, %v2354_v46  ;;  %s2936_s23 = sld [smem:[#allocation10 + $0x5]] }
  0x2b   :  { %v2372_v0 = vpop.eup %2026  ;;  %v227_v15 = vmul.f32 %v217_v3, %v2287_v13  ;;  %v228_v16 = vmul.f32 %v216_v2, %v2290_v14  ;;  %v231_v7 = vmul.f32 %v217_v3, %v2284_v12  ;;  %v236_v17 = vmul.f32 %v2382_v9, %v2290_v14  ;;  %s2965_s24 = sld [smem:[#allocation11 + $0x5]] }
  0x2c   :  { %v129_v4 = vmul.f32 %v2372_v0, %v2320_v33  ;;  %v2386_v11 = vpop.eup %2028  ;;  %v237_v20 = vmul.f32 %v2384_v10, %v2287_v13  ;;  %v239_v31 = vmul.f32 %v2384_v10, %v2284_v12  ;;  %v233_v40 = vmul.f32 %v216_v2, %v2284_v12  ;;  %s2994_s25 = sld [smem:[#allocation10 + $0x4]] }
  0x2d   :  { %v229_v27 = vsub.f32 %v227_v15, %v228_v16  ;;  %v232_v34 = vsub.f32 %v230_v6, %v231_v7  ;;  %v234_v41 = vmul.f32 %v215_v1, %v2287_v13  ;;  %v240_v48 = vmul.f32 %v2380_v5, %v2290_v14  ;;  %s3003_s26 = sld [smem:[#allocation11 + $0x4]] }
  0x2e   :  { %v2031_v8 = vpop.eup %2030  ;;  %v130_v23 = vmul.f32 %v2372_v0, %v129_v4  ;;  %v238_v42 = vsub.f32 %v236_v17, %v237_v20  ;;  %v242_v49 = vmul.f32 %v2380_v5, %v2287_v13  ;;  %v243_v50 = vmul.f32 %v2382_v9, %v2284_v12  ;;  %s3201_s27 = sld [smem:[#allocation10 + $0x6]] }
  0x2f   :  { %v147_v26 = vmul.f32 %v2031_v8, %v2342_v43  ;;  %vm153_vm1 = vweird.f32 %v2031_v8  ;;  %v235_v51 = vsub.f32 %v233_v40, %v234_v41  ;;  %v246_v52 = vmul.f32 %v2386_v11, %v2333_v39  ;;  %s3231_s28 = sld [smem:[#allocation11 + $0x6]] }
  0x30   :  { %v255_v56 = vmul.f32 %v238_v42, %v229_v27  ;;  %v241_v58 = vsub.f32 %v239_v31, %v240_v48  ;;  %v244_v59 = vsub.f32 %v242_v49, %v243_v50  ;;  %v261_v60 = vmul.f32 %v229_v27, %v2380_v5  ;;  %vm154_vm3 = vmor %vm152_vm0, %vm153_vm1  ;;  %v2448_v27 = vld [vmem:[#allocation3 + $0x9] sm:$0x1]  ;;  %v2450_v31 = vld [vmem:[#allocation3 + $0xa] sm:$0x1]  ;;  %s3298_s29 = sld [smem:[#allocation10 + $0x7]] }
  0x31   :  { %v148_v47 = vmul.f32 %v2031_v8, %v147_v26  ;;  %v2413_v61 = vmul.f32 0.5, %v130_v23  ;;  %v247_v14 = vmul.f32 %v2386_v11, %v246_v52  ;;  %vm251_vm2 = vweird.f32 %v2333_v39  ;;  %v2443_v26 = vld [vmem:[#allocation3 + $0xd] sm:$0x1]  ;;  %v351_v48 = vld [vmem:[#allocation3 + $0x10] sm:$0x1]  ;;  %s3304_s8 = sld [smem:[#allocation11 + $0x7]] }
  0x32   :  { %v2417_v13 = vadd.f32 %v362_v55, %v361_v54  ;;  %v256_v62 = vmul.f32 %v241_v58, %v232_v34  ;;  %v258_v63 = vmul.f32 %v244_v59, %v235_v51  ;;  %v262_v1 = vmul.f32 %v232_v34, %v2382_v9  ;;  %v352_v49 = vld [vmem:[#allocation3 + $0x11] sm:$0x1]  ;;  %s3312_s2 = sld [smem:[#allocation10 + $0x8]] }
  0x33   :  { %v149_v57 = vmul.f32 0.5, %v148_v47  ;;  %v248_v2 = vmul.f32 0.5, %v247_v14  ;;  %vm252_vm4 = vweird.f32 %v2386_v11  ;;  %v264_v3 = vmul.f32 %v235_v51, %v2384_v10  ;;  %v350_v47 = vld [vmem:[#allocation3 + $0xf] sm:$0x1]  ;;  %s3319_s9 = sld [smem:[#allocation11 + $0x8]] }
  0x34   :  { %v2425_v4 = vadd.f32 %v367_v22, %v366_v21  ;;  %v257_v16 = vadd.f32 %v256_v62, %v255_v56  ;;  %v263_v54 = vadd.f32 %v262_v1, %v261_v60  ;;  %v381_v55 = vmul.f32 %v2346_v44, %v2314_v30  ;;  %vm253_vm5 = vmor %vm251_vm2, %vm252_vm4  ;;  %v2441_v30 = vld [vmem:[#allocation3 + $0xc] sm:$0x1]  ;;  %v2497_v62 = vld [vmem:[#allocation3 + $0xb] sm:$0x1]  ;;  %s3455_s10 = sld [smem:[#allocation10 + $0x9]] }
  0x35   :  { %v150_v12 = vsub.f32 1.5, %v149_v57  ;;  %v249_v6 = vsub.f32 1.5, %v248_v2  ;;  %v382_v7 = vmul.f32 %v2350_v45, %v2318_v32  ;;  %v132_v32 = vsub.f32 1.5, %v2413_v61  ;;  %s3467_s11 = sld [smem:[#allocation11 + $0x9]] }
  0x36   :  { %v259_v43 = vadd.f32 %v258_v63, %v257_v16  ;;  %v2433_v20 = vadd.f32 %v264_v3, %v263_v54  ;;  %v2439_v23 = vmul.f32 %v2425_v4, %v2417_v13  ;;  %v384_v39 = vmul.f32 %v2354_v46, %v2331_v38  ;;  %s3495_s0 = sld [smem:[#allocation10 + $0xb]] }
  0x37   :  { %v151_v15 = vmul.f32 %v2031_v8, %v150_v12  ;;  %v250_v22 = vmul.f32 %v2386_v11, %v249_v6  ;;  %v453_v38 = vsub.f32 %v2305_v25, %v2292_v18  ;;  %v454_v42 = vsub.f32 %v2308_v28, %v2294_v19  ;;  %v2495_v12 = vld [vmem:[#allocation3 + $0xe] sm:$0x1]  ;;  %s3578_s12 = sld [smem:[#allocation11 + $0xb]] }
  0x38   :  { %v2458_v40 = vand.u32 2147483647, %v2433_v20  ;;  %2032 = vrsqrt.f32 %v2439_v23  ;;  %v455_v50 = vsub.f32 %v2310_v29, %v2303_v24  ;;  %v2475_v51 = vsub.f32 %v2441_v30, %v2448_v27  ;;  %s3604_s13 = sld [smem:[#allocation10 + $0xa]] }
  0x39   :  { %v155_v17 = vsel %vm154_vm3, %v2031_v8, %v151_v15  ;;  %v383_v8 = vadd.f32 %v382_v7, %v381_v55  ;;  %v2455_v34 = vsel %vm253_vm5, %v2386_v11, %v250_v22  ;;  %2034 = vrsqrt.f32 %v2425_v4  ;;  %s3610_s14 = sld [smem:[#allocation11 + $0xa]] }
  0x3a   :  { %v156_v21 = vmul.f32 %v155_v17, %v2357_v53  ;;  %v2462_v41 = vmul.f32 %v259_v43, %v2455_v34  ;;  %v2479_v18 = vsub.f32 %v2443_v26, %v2450_v31  ;;  %v459_v25 = vmul.f32 %v454_v42, %v2354_v46  ;;  %s3766_s15 = sld [smem:[#allocation10 + $0xc]] }
  0x3b   :  { %v463_v28 = vmul.f32 %v453_v38, %v2354_v46  ;;  %v465_v52 = vmul.f32 %v453_v38, %v2350_v45  ;;  %v460_v24 = vmul.f32 %v455_v50, %v2350_v45  ;;  %v462_v29 = vmul.f32 %v455_v50, %v2346_v44  ;;  %s3768_s16 = sld [smem:[#allocation11 + $0xc]] }
  0x3c   :  { %v2452_v53 = vclamps-f32 %v156_v21, 1.0  ;;  %v2482_v19 = vand.u32 2147483647, %v2462_v41  ;;  %v466_v57 = vmul.f32 %v454_v42, %v2346_v44  ;;  %v456_v59 = vsub.f32 %v350_v47, %v2323_v35  ;;  %s3815_s17 = sld [smem:[#allocation10 + $0xd]] }
  0x3d   :  { %v457_v60 = vsub.f32 %v351_v48, %v2325_v36  ;;  %v458_v14 = vsub.f32 %v352_v49, %v2327_v37  ;;  %v385_v2 = vadd.f32 %v384_v39, %v383_v8  ;;  %v2501_v3 = vsub.f32 %v462_v29, %v463_v28  ;;  %s3947_s30 = sld [smem:[#allocation7 + $0x13]] }
  0x3e   :  { %4344 = vst [vmem:[#allocation19_spill] sm:$0xff] %v2452_v53  ;;  %v159_v11 = vmul.f32 %v2452_v53, %v2452_v53  ;;  %v268_v58 = vmax.f32 %v2482_v19, %v2458_v40  ;;  %v2033_v63 = vpop.eup %2032  ;;  %v2503_v15 = vsub.f32 %v465_v52, %v466_v57  ;;  %vm393_vm6 = vweird.f32 %v2439_v23  ;;  %s3950_s7 = sld [smem:[#allocation7 + $0x14]] }
  0x3f   :  { %v2505_v16 = vpop.eup %2034  ;;  %v388_v35 = vmul.f32 %v2033_v63, %v2439_v23  ;;  %v468_v36 = vmul.f32 %v458_v14, %v2350_v45  ;;  %vm394_vm7 = vweird.f32 %v2033_v63  ;;  %v2511_v37 = vsub.f32 %v459_v25, %v460_v24  ;;  %s3953_s6 = sld [smem:[#allocation7 + $0x15]] }
  0x40   :  { %v160_v56 = vsub.f32 1.0, %v159_v11  ;;  %2036 = vrcp.f32 %v268_v58  ;;  %v2515_v54 = vsub.f32 %v2495_v12, %v2497_v62  ;;  %v469_v6 = vmul.f32 %v457_v60, %v2354_v46  ;;  %vm2541_vm8 = vmor %vm393_vm6, %vm394_vm7  ;;  %s3963_s5 = sld [smem:[#allocation7 + $0x18]] }
  0x41   :  { %v389_v55 = vmul.f32 %v2033_v63, %v388_v35  ;;  %v471_v7 = vmul.f32 %v456_v59, %v2354_v46  ;;  %v472_v17 = vmul.f32 %v458_v14, %v2346_v44  ;;  %v474_v43 = vmul.f32 %v457_v60, %v2346_v44 }
  0x42   :  { %v2499_v1 = vmax.f32 %v160_v56, 0.0  ;;  %v475_v21 = vmul.f32 %v456_v59, %v2350_v45  ;;  %v477_v22 = vmul.f32 %v2501_v3, %v2354_v46  ;;  %v478_v8 = vmul.f32 %v2503_v15, %v2350_v45 }
  0x43   :  { %v390_v39 = vmul.f32 0.5, %v389_v55  ;;  %v470_v38 = vsub.f32 %v468_v36, %v469_v6  ;;  %v473_v42 = vsub.f32 %v471_v7, %v472_v17  ;;  %v480_v11 = vmul.f32 %v2503_v15, %v2346_v44 }
  0x44   :  { %2038 = vrsqrt.f32 %v2499_v1  ;;  %v269_v47 = vmin.f32 %v2482_v19, %v2458_v40  ;;  %v476_v48 = vsub.f32 %v474_v43, %v475_v21  ;;  %v479_v49 = vsub.f32 %v477_v22, %v478_v8 }
  0x45   :  { %v481_v50 = vmul.f32 %v2511_v37, %v2354_v46  ;;  %v391_v28 = vsub.f32 1.5, %v390_v39  ;;  %v483_v52 = vmul.f32 %v2511_v37, %v2350_v45  ;;  %v484_v56 = vmul.f32 %v2501_v3, %v2346_v44  ;;  %v2555_v39 = vld [vmem:[#allocation3 + $0x6] sm:$0x1] }
  0x46   :  { %v2037_v25 = vpop.eup %2036  ;;  %v487_v24 = vmul.f32 %v2505_v16, %v2425_v4  ;;  %vm492_vm9 = vweird.f32 %v2425_v4  ;;  %vm493_vm10 = vweird.f32 %v2505_v16  ;;  %vm169_vm11 = vcmp.eq.f32.partialorder %v2499_v1, inf }
  0x47   :  { %v271_v57 = vmul.f32 %v2037_v25, %v268_v58  ;;  %v482_v46 = vsub.f32 %v480_v11, %v481_v50  ;;  %v392_v44 = vmul.f32 %v2033_v63, %v391_v28  ;;  %v485_v60 = vsub.f32 %v483_v52, %v484_v56  ;;  %v2557_v11 = vld [vmem:[#allocation3 + $0x7] sm:$0x1]  ;;  %v2561_v52 = vld [vmem:[#allocation3 + $0x8] sm:$0x1]  ;;  %vm494_vm13 = vmor %vm492_vm9, %vm493_vm10 }
  0x48   :  { %v488_v14 = vmul.f32 %v2505_v16, %v487_v24  ;;  %v496_v35 = vmul.f32 %v479_v49, %v470_v38  ;;  %v502_v36 = vmul.f32 %v470_v38, %v2511_v37  ;;  %vm171_vm12 = vcmp.eq.f32.partialorder %v2499_v1, 0.0 }
  0x49   :  { %v272_v58 = vsub.f32 2.0, %v271_v57  ;;  %v497_v23 = vmul.f32 %v482_v46, %v473_v42  ;;  %v396_v6 = vsel %vm2541_vm8, %v2033_v63, %v392_v44  ;;  %v499_v17 = vmul.f32 %v485_v60, %v476_v48 }
  0x4a   :  { %v2039_v29 = vpop.eup %2038  ;;  %v489_v7 = vmul.f32 0.5, %v488_v14  ;;  %v397_v21 = vmul.f32 %v396_v6, %v385_v2  ;;  %v503_v8 = vmul.f32 %v473_v42, %v2501_v3  ;;  %v172_v38 = vand.u32 2147483648, %v2499_v1 }
  0x4b   :  { %v163_v45 = vmul.f32 %v2039_v29, %v2499_v1  ;;  %v273_v43 = vmul.f32 %v2037_v25, %v272_v58  ;;  %v498_v22 = vadd.f32 %v497_v23, %v496_v35  ;;  %v505_v28 = vmul.f32 %v476_v48, %v2503_v15 }
  0x4c   :  { %v490_v50 = vsub.f32 1.5, %v489_v7  ;;  %v2565_v56 = vclamps-f32 %v397_v21, 1.0  ;;  %v504_v42 = vadd.f32 %v503_v8, %v502_v36  ;;  %v2574_v57 = vsub.f32 %v2555_v39, %v2448_v27 }
  0x4d   :  { %v164_v55 = vmul.f32 %v2039_v29, %v163_v45  ;;  %v2563_v63 = vmul.f32 %v273_v43, %v269_v47  ;;  %v500_v2 = vadd.f32 %v499_v17, %v498_v22  ;;  %v2578_v47 = vsub.f32 %v2557_v11, %v2450_v31 }
  0x4e   :  { %4347 = vst [vmem:[#allocation20_spill] sm:$0xff] %v2565_v56  ;;  %v491_v24 = vmul.f32 %v2505_v16, %v490_v50  ;;  %v400_v4 = vmul.f32 %v2565_v56, %v2565_v56  ;;  %v2586_v59 = vadd.f32 %v505_v28, %v504_v42  ;;  %v2590_v46 = vsub.f32 %v2561_v52, %v2497_v62 }
  0x4f   :  { %v165_v49 = vmul.f32 0.5, %v164_v55  ;;  %v2582_v48 = vmul.f32 %v2563_v63, %v2563_v63  ;;  %v601_v60 = vmul.f32 %v2475_v51, %v2475_v51  ;;  %v602_v14 = vmul.f32 %v2479_v18, %v2479_v18 }
  0x50   :  { %4348 = vst [vmem:[#allocation21_spill] sm:$0xff] %v2586_v59  ;;  %v2593_v44 = vsel %vm494_vm13, %v2505_v16, %v491_v24  ;;  %v401_v35 = vsub.f32 1.0, %v400_v4  ;;  %v2604_v36 = vand.u32 2147483647, %v2586_v59  ;;  %v604_v16 = vmul.f32 %v2515_v54, %v2515_v54 }
  0x51   :  { %v166_v25 = vsub.f32 1.5, %v165_v49  ;;  %v276_v58 = vmul.f32 -0.001516384, %v2582_v48  ;;  %v2601_v23 = vmul.f32 %v500_v2, %v2593_v44  ;;  %v603_v55 = vadd.f32 %v602_v14, %v601_v60 }
  0x52   :  { %v606_v6 = vmul.f32 %v2574_v57, %v2574_v57  ;;  %v2611_v17 = vmax.f32 %v401_v35, 0.0  ;;  %v607_v21 = vmul.f32 %v2578_v47, %v2578_v47  ;;  %v133_v22 = vmul.f32 %v2372_v0, %v132_v32 }
  0x53   :  { %v167_v45 = vmul.f32 %v2039_v29, %v166_v25  ;;  %4349 = vst [vmem:[#allocation22_spill] sm:$0xff] %v2601_v23  ;;  %v277_v7 = vadd.f32 0.009606271, %v276_v58  ;;  %v2614_v43 = vand.u32 2147483647, %v2601_v23  ;;  %v609_v61 = vmul.f32 %v2590_v46, %v2590_v46 }
  0x54   :  { %v2625_v49 = vand.u32 2147483647, %v2452_v53  ;;  %2040 = vrsqrt.f32 %v2611_v17  ;;  %v2640_v42 = vadd.f32 %v604_v16, %v603_v55  ;;  %v608_v25 = vadd.f32 %v607_v21, %v606_v6 }
  0x55   :  { %v168_v29 = vmul.f32 %v167_v45, %v2499_v1  ;;  %v278_v28 = vmul.f32 %v277_v7, %v2582_v48  ;;  %v509_v32 = vmax.f32 %v2614_v43, %v2604_v36  ;;  %vm135_vm14 = vcmp.eq.f32.partialorder %v2320_v33, inf }
  0x56   :  { %4351 = vst [vmem:[#allocation24_spill] sm:$0xff] %v2640_v42  ;;  %v2647_v4 = vadd.f32 %v609_v61, %v608_v25  ;;  %v2659_v55 = vand.u32 2147483647, %v2565_v56  ;;  %v623_v16 = vmul.f32 %v2574_v57, %v2475_v51  ;;  %v304_v7 = vmul.f32 %v2380_v5, %v2380_v5 }
  0x57   :  { %v170_v8 = vsel %vm169_vm11, %v2499_v1, %v168_v29  ;;  %v279_v2 = vadd.f32 -0.028581347, %v278_v28  ;;  %v134_v1 = vmul.f32 %v133_v22, %v2320_v33  ;;  %2042 = vrcp.f32 %v509_v32  ;;  %v2670_v22 = vld [vmem:[#allocation3 + $0x12] sm:$0x1] }
  0x58   :  { %v2629_v50 = vsel %vm171_vm12, %v172_v38, %v170_v8  ;;  %4352 = vst [vmem:[#allocation25_spill] sm:$0xff] %v2647_v4  ;;  %v2652_v58 = vmul.f32 %v2647_v4, %v2640_v42  ;;  %v305_v21 = vmul.f32 %v2382_v9, %v2382_v9  ;;  %vm410_vm15 = vcmp.eq.f32.partialorder %v2611_v17, inf  ;;  %v2672_v8 = vld [vmem:[#allocation3 + $0xf] sm:$0x1]  ;;  %v2695_v42 = vld [vmem:[#allocation3 + $0x11] sm:$0x1] }
  0x59   :  { %4350 = vst [vmem:[#allocation23_spill] sm:$0xff] %v2629_v50  ;;  %v2636_v0 = vand.u32 2147483647, %v2629_v50  ;;  %v280_v24 = vmul.f32 %v279_v2, %v2582_v48  ;;  %v2655_v35 = vsel %vm135_vm14, %v2320_v33, %v134_v1  ;;  %vm412_vm0 = vcmp.eq.f32.partialorder %v2611_v17, 0.0  ;;  %v2699_v50 = vld [vmem:[#allocation3 + $0x15] sm:$0x1] }
  0x5a   :  { %v2041_v45 = vpop.eup %2040  ;;  %4353 = vst [vmem:[#allocation26_spill] sm:$0xff] %v2670_v22  ;;  %v413_v51 = vand.u32 2147483648, %v2611_v17  ;;  %v624_v5 = vmul.f32 %v2578_v47, %v2479_v18  ;;  %v306_v25 = vadd.f32 %v305_v21, %v304_v7  ;;  %v307_v9 = vmul.f32 %v2384_v10, %v2384_v10  ;;  %v2693_v21 = vld [vmem:[#allocation3 + $0x14] sm:$0x1] }
  0x5b   :  { %v176_v38 = vmax.f32 %v2636_v0, %v2625_v49  ;;  %v281_v14 = vadd.f32 0.055144176, %v280_v24  ;;  %v404_v29 = vmul.f32 %v2041_v45, %v2611_v17  ;;  %v2680_v24 = vld [vmem:[#allocation3 + $0x13] sm:$0x1]  ;;  %v626_v4 = vmul.f32 %v2590_v46, %v2515_v54  ;;  %4356 = vst [vmem:[#allocation29_spill] sm:$0xff] %v2693_v21 }
  0x5c   :  { %4354 = vst [vmem:[#allocation27_spill] sm:$0xff] %v2680_v24  ;;  %v2690_v18 = vsub.f32 %v2670_v22, %v2672_v8  ;;  %v625_v59 = vadd.f32 %v624_v5, %v623_v16  ;;  %v2711_v16 = vsub.f32 %v2693_v21, %v2695_v42  ;;  %vm137_vm1 = vcmp.eq.f32.partialorder %v2320_v33, 0.0 }
  0x5d   :  { %2044 = vrcp.f32 %v176_v38  ;;  %v282_v6 = vmul.f32 %v281_v14, %v2582_v48  ;;  %v2043_v28 = vpop.eup %2042  ;;  %v405_v61 = vmul.f32 %v2041_v45, %v404_v29  ;;  %v2682_v14 = vld [vmem:[#allocation3 + $0x10] sm:$0x1]  ;;  %v177_v29 = vmin.f32 %v2636_v0, %v2625_v49  ;;  %4357 = vst [vmem:[#allocation30_spill] sm:$0xff] %v2695_v42 }
  0x5e   :  { %2046 = vrsqrt.f32 %v2652_v58  ;;  %v512_v1 = vmul.f32 %v2043_v28, %v509_v32  ;;  %4355 = vst [vmem:[#allocation28_spill] sm:$0xff] %v2682_v14  ;;  %v308_v32 = vadd.f32 %v307_v9, %v306_v25  ;;  %v2703_v54 = vsub.f32 %v2680_v24, %v2682_v14 }
  0x5f   :  { %v283_v2 = vadd.f32 -0.08222694, %v282_v6  ;;  %v406_v56 = vmul.f32 0.5, %v405_v61  ;;  %v510_v61 = vmin.f32 %v2614_v43, %v2604_v36  ;;  %4358 = vst [vmem:[#allocation31_spill] sm:$0xff] %v2699_v50  ;;  %v310_v9 = vmul.f32 %v2455_v34, %v2455_v34 }
  0x60   :  { %v513_v7 = vsub.f32 2.0, %v512_v1  ;;  %v309_v25 = vmul.f32 %v308_v32, %v2320_v33  ;;  %4359 = vst [vmem:[#allocation32_spill] sm:$0xff] %v2711_v16  ;;  %v846_v32 = vmul.f32 %v2690_v18, %v2690_v18  ;;  %vm635_vm2 = vweird.f32 %v2652_v58 }
  0x61   :  { %v284_v10 = vmul.f32 %v283_v2, %v2582_v48  ;;  %v407_v23 = vsub.f32 1.5, %v406_v56  ;;  %vm295_vm5 = vcmp.gt.f32.partialorder %v2482_v19, %v2458_v40  ;;  %vm298_vm6 = vcmp.ge.f32.partialorder %v2433_v20, 0.0 }
  0x62   :  { %v514_v56 = vmul.f32 %v2043_v28, %v513_v7  ;;  %v2722_v28 = vld [vmem:[#allocation3 + $0x16] sm:$0x1]  ;;  %vm301_vm7 = vcmp.ge.f32.partialorder %v2462_v41, 0.0  ;;  %v334_v20 = vstv %s2830_s18  ;;  %vm376_vm8 = vcmp.eq.f32.partialorder %v2417_v13, inf  ;;  %s3828_s18 = sld [smem:[#allocation7]] }
  0x63   :  { %v2045_v60 = vpop.eup %2044  ;;  %v285_v2 = vadd.f32 0.10882225, %v284_v10  ;;  %v408_v1 = vmul.f32 %v2041_v45, %v407_v23  ;;  %v2717_v10 = vsub.f32 %v2699_v50, %v2672_v8  ;;  %4360 = vst [vmem:[#allocation33_spill] sm:$0xff] %v2722_v28  ;;  %vm378_vm9 = vcmp.eq.f32.partialorder %v2417_v13, 0.0 }
  0x64   :  { %v179_v6 = vmul.f32 %v2045_v60, %v176_v38  ;;  %v2047_v38 = vpop.eup %2046  ;;  %v2720_v23 = vmul.f32 %v514_v56, %v510_v61  ;;  %vm203_vm10 = vcmp.gt.f32.partialorder %v2636_v0, %v2625_v49  ;;  %v573_v0 = vstv %s2936_s23  ;;  %s3856_s23 = sld [smem:[#allocation7 + $0x4]] }
  0x65   :  { %v630_v53 = vmul.f32 %v2047_v38, %v2652_v58  ;;  %v286_v24 = vmul.f32 %v285_v2, %v2582_v48  ;;  %v409_v34 = vmul.f32 %v408_v1, %v2611_v17  ;;  %vm636_vm3 = vweird.f32 %v2047_v38 }
  0x66   :  { %v180_v22 = vsub.f32 2.0, %v179_v6  ;;  %v311_v6 = vmul.f32 %v310_v9, %v309_v25  ;;  %v2738_v25 = vld [vmem:[#allocation3 + $0x17] sm:$0x1]  ;;  %v2751_v1 = vsub.f32 %v2722_v28, %v2682_v14  ;;  %vm2760_vm4 = vmor %vm635_vm2, %vm636_vm3 }
  0x67   :  { %v631_v45 = vmul.f32 %v2047_v38, %v630_v53  ;;  %v411_v2 = vsel %vm410_vm15, %v2611_v17, %v409_v34  ;;  %v2736_v53 = vmul.f32 %v2720_v23, %v2720_v23  ;;  %4361 = vst [vmem:[#allocation34_spill] sm:$0xff] %v2738_v25  ;;  %v627_v34 = vadd.f32 %v626_v4, %v625_v59 }
  0x68   :  { %v181_v5 = vmul.f32 %v2045_v60, %v180_v22  ;;  %v287_v60 = vadd.f32 -0.14248416, %v286_v24  ;;  %v847_v22 = vmul.f32 %v2703_v54, %v2703_v54  ;;  %v2747_v9 = vsel %vm412_vm0, %v413_v51, %v411_v2 }
  0x69   :  { %v632_v61 = vmul.f32 0.5, %v631_v45  ;;  %v2754_v56 = vand.u32 2147483647, %v2747_v9  ;;  %v2766_v51 = vsub.f32 %v2738_v25, %v2695_v42  ;;  %v849_v4 = vmul.f32 %v2711_v16, %v2711_v16 }
  0x6a   :  { %v2726_v7 = vmul.f32 %v181_v5, %v177_v29  ;;  %v288_v29 = vmul.f32 %v287_v60, %v2582_v48  ;;  %v517_v5 = vmul.f32 -0.001516384, %v2736_v53  ;;  %v848_v60 = vadd.f32 %v847_v22, %v846_v32 }
  0x6b   :  { %v633_v45 = vsub.f32 1.5, %v632_v61  ;;  %v417_v2 = vmax.f32 %v2754_v56, %v2659_v55  ;;  %v852_v14 = vmul.f32 %v2751_v1, %v2751_v1  ;;  %v2790_v42 = vsub.f32 %v2448_v27, %v2441_v30 }
  0x6c   :  { %v2742_v24 = vmul.f32 %v2726_v7, %v2726_v7  ;;  %v289_v21 = vadd.f32 0.19996625, %v288_v29  ;;  %v518_v28 = vadd.f32 0.009606271, %v517_v5  ;;  %v851_v29 = vmul.f32 %v2717_v10, %v2717_v10 }
  0x6d   :  { %v634_v59 = vmul.f32 %v2047_v38, %v633_v45  ;;  %2048 = vrcp.f32 %v417_v2  ;;  %v2808_v30 = vsub.f32 %v2450_v31, %v2443_v26  ;;  %v546_v26 = vmul.f32 %v2501_v3, %v2501_v3 }
  0x6e   :  { %v184_v50 = vmul.f32 -0.001516384, %v2742_v24  ;;  %v290_v58 = vmul.f32 %v289_v21, %v2582_v48  ;;  %v519_v32 = vmul.f32 %v518_v28, %v2736_v53  ;;  %v2792_v28 = vadd.f32 %v849_v4, %v848_v60 }
  0x6f   :  { %v638_v22 = vsel %vm2760_vm4, %v2047_v38, %v634_v59  ;;  %2050 = vlog2.f32 %v311_v6  ;;  %v2817_v60 = vsub.f32 %v2497_v62, %v2495_v12  ;;  %v2825_v31 = vmul.f32 %v2790_v42, %v2590_v46  ;;  %v592_v62 = vld [vmem:[#allocation3] sm:$0x1] }
  0x70   :  { %v185_v61 = vadd.f32 0.009606271, %v184_v50  ;;  %v291_v45 = vadd.f32 -0.33333194, %v290_v58  ;;  %v639_v25 = vmul.f32 %v638_v22, %v627_v34  ;;  %v4364_v50 = vand.u32 2147483648, %v2320_v33 }
  0x71   :  { %v520_v16 = vadd.f32 -0.028581347, %v519_v32  ;;  %v2797_v34 = vadd.f32 %v852_v14, %v851_v29  ;;  %v2801_v33 = vmul.f32 %v2766_v51, %v2766_v51  ;;  %v545_v14 = vmul.f32 %v2511_v37, %v2511_v37  ;;  %v593_v22 = vld [vmem:[#allocation3 + $0x1] sm:$0x1] }
  0x72   :  { %v186_v5 = vmul.f32 %v185_v61, %v2742_v24  ;;  %v139_v21 = vsel %vm137_vm1, %v4364_v50, %v2655_v35  ;;  %v292_v17 = vmul.f32 %v291_v45, %v2582_v48  ;;  %v2804_v59 = vclamps-f32 %v639_v25, 1.0 }
  0x73   :  { %v521_v35 = vmul.f32 %v520_v16, %v2736_v53  ;;  %v2049_v6 = vpop.eup %2048  ;;  %v418_v16 = vmin.f32 %v2754_v56, %v2659_v55  ;;  %v547_v58 = vadd.f32 %v546_v26, %v545_v14  ;;  %v548_v3 = vmul.f32 %v2503_v15, %v2503_v15 }
  0x74   :  { %v187_v38 = vadd.f32 -0.028581347, %v186_v5  ;;  %v293_v48 = vadd.f32 1.0, %v292_v17  ;;  %v420_v12 = vmul.f32 %v2049_v6, %v417_v2  ;;  %v642_v29 = vmul.f32 %v2804_v59, %v2804_v59 }
  0x75   :  { %v522_v25 = vadd.f32 0.055144176, %v521_v35  ;;  %2052 = vrsqrt.f32 %v2417_v13  ;;  %v2051_v5 = vpop.eup %2050  ;;  %v549_v50 = vadd.f32 %v548_v3, %v547_v58  ;;  %v315_v35 = vstv %s2786_s1  ;;  %s3818_s1 = sld [smem:[#allocation11 + $0xd]] }
  0x76   :  { %v188_v27 = vmul.f32 %v187_v38, %v2742_v24  ;;  %v294_v61 = vmul.f32 %v293_v48, %v2563_v63  ;;  %v421_v2 = vsub.f32 2.0, %v420_v12  ;;  %v2841_v38 = vsub.f32 %v592_v62, %v2555_v39 }
  0x77   :  { %v523_v37 = vmul.f32 %v522_v25, %v2736_v53  ;;  %v316_v14 = vsub.f32 %v139_v21, %v315_v35  ;;  %v2850_v25 = vsub.f32 %v593_v22, %v2557_v11  ;;  %v643_v12 = vsub.f32 1.0, %v642_v29 }
  0x78   :  { %v189_v4 = vadd.f32 0.055144176, %v188_v27  ;;  %v296_v32 = vsub.f32 1.5707964, %v294_v61  ;;  %v318_v27 = vstv %s2795_s3  ;;  %v422_v39 = vmul.f32 %v2049_v6, %v421_v2  ;;  %s3821_s3 = sld [smem:[#allocation10 + $0xe]] }
  0x79   :  { %v524_v45 = vadd.f32 -0.08222694, %v523_v37  ;;  %v319_v40 = vmul.f32 %v318_v27, %v316_v14  ;;  %v551_v3 = vmul.f32 %v2593_v44, %v2593_v44  ;;  %v701_v29 = vmul.f32 %v2808_v30, %v2590_v46 }
  0x7a   :  { %v190_v63 = vmul.f32 %v189_v4, %v2742_v24  ;;  %v297_v17 = vsel %vm295_vm5, %v296_v32, %v294_v61  ;;  %v331_v4 = vstv %s2811_s4  ;;  %v550_v61 = vmul.f32 %v549_v50, %v2417_v13  ;;  %s3823_s4 = sld [smem:[#allocation11 + $0xe]] }
  0x7b   :  { %v299_v48 = vsub.f32 3.1415927, %v297_v17  ;;  %v525_v19 = vmul.f32 %v524_v45, %v2736_v53  ;;  %v2053_v37 = vpop.eup %2052  ;;  %v2860_v11 = vmul.f32 %v422_v39, %v418_v16  ;;  %321 = vst [vmem:[#allocation13 + $0x6] sm:$0x1] %v319_v40  ;;  %v704_v41 = vmul.f32 %v2817_v60, %v2574_v57 }
  0x7c   :  { %v191_v15 = vadd.f32 -0.08222694, %v190_v63  ;;  %v370_v6 = vmul.f32 %v2053_v37, %v2417_v13  ;;  %v702_v63 = vmul.f32 %v2817_v60, %v2578_v47  ;;  %v552_v50 = vmul.f32 %v551_v3, %v550_v61 }
  0x7d   :  { %v300_v62 = vsel %vm298_vm6, %v297_v17, %v299_v48  ;;  %v2877_v44 = vmul.f32 %v2860_v11, %v2860_v11  ;;  %v526_v2 = vadd.f32 0.10882225, %v525_v19  ;;  %v594_v48 = vld [vmem:[#allocation3 + $0x2] sm:$0x1]  ;;  %v313_v14 = vmul.f32 0.6931472, %v2051_v5 }
  0x7e   :  { %v192_v26 = vmul.f32 %v191_v15, %v2742_v24  ;;  %v302_v21 = vsub.f32 0.0, %v300_v62  ;;  %v371_v45 = vmul.f32 %v2053_v37, %v370_v6  ;;  %v2879_v15 = vmax.f32 %v643_v12, 0.0 }
  0x7f   :  { %v425_v35 = vmul.f32 -0.001516384, %v2877_v44  ;;  %v527_v27 = vmul.f32 %v526_v2, %v2736_v53  ;;  %2054 = vlog2.f32 %v552_v50  ;;  %v700_v19 = vsub.f32 %v594_v48, %v2561_v52 }
  0x80   :  { %v193_v58 = vadd.f32 0.10882225, %v192_v26  ;;  %v303_v16 = vsel %vm301_vm7, %v300_v62, %v302_v21  ;;  %v372_v39 = vmul.f32 0.5, %v371_v45  ;;  %2056 = vrsqrt.f32 %v2879_v15 }
  0x81   :  { %v332_v22 = vsub.f32 %v303_v16, %v331_v4  ;;  %v426_v62 = vadd.f32 0.009606271, %v425_v35  ;;  %v528_v12 = vadd.f32 -0.14248416, %v527_v27  ;;  %v2888_v61 = vsub.f32 %v701_v29, %v702_v63 }
  0x82   :  { %v194_v32 = vmul.f32 %v193_v58, %v2742_v24  ;;  %v373_v40 = vsub.f32 1.5, %v372_v39  ;;  %v707_v60 = vmul.f32 %v2790_v42, %v2578_v47  ;;  %v2895_v3 = vsub.f32 %v704_v41, %v2825_v31 }
  0x83   :  { %v335_v26 = vmul.f32 %v334_v20, %v332_v22  ;;  %v427_v58 = vmul.f32 %v426_v62, %v2877_v44  ;;  %v529_v21 = vmul.f32 %v528_v12, %v2736_v53  ;;  %v323_v20 = vstv %s2858_s19  ;;  %s3833_s19 = sld [smem:[#allocation7 + $0xc]] }
  0x84   :  { %v195_v17 = vadd.f32 -0.14248416, %v194_v32  ;;  %v326_v6 = vstv %s2864_s20  ;;  %v374_v32 = vmul.f32 %v2053_v37, %v373_v40  ;;  %v379_v16 = vand.u32 2147483648, %v2417_v13  ;;  %s3836_s20 = sld [smem:[#allocation8]] }
  0x85   :  { %337 = vst [vmem:[#allocation13 + $0x8] sm:$0x1] %v335_v26  ;;  %v428_v42 = vadd.f32 -0.028581347, %v427_v58  ;;  %v530_v29 = vadd.f32 0.19996625, %v529_v21  ;;  %v2055_v63 = vpop.eup %2054  ;;  %v708_v35 = vmul.f32 %v2808_v30, %v2574_v57  ;;  %v710_v26 = vmul.f32 %v700_v19, %v2578_v47 }
  0x86   :  { %v196_v4 = vmul.f32 %v195_v17, %v2742_v24  ;;  %v375_v31 = vmul.f32 %v374_v32, %v2417_v13  ;;  %v655_v37 = vand.u32 2147483648, %v2879_v15  ;;  %v2912_v2 = vand.u32 2147483647, %v2804_v59  ;;  %v2057_v22 = vpop.eup %2056 }
  0x87   :  { %v429_v50 = vmul.f32 %v428_v42, %v2877_v44  ;;  %v531_v17 = vmul.f32 %v530_v29, %v2736_v53  ;;  %v554_v48 = vmul.f32 0.6931472, %v2055_v63  ;;  %v646_v41 = vmul.f32 %v2057_v22, %v2879_v15 }
  0x88   :  { %v197_v5 = vadd.f32 0.19996625, %v196_v4  ;;  %v377_v27 = vsel %vm376_vm8, %v2417_v13, %v375_v31  ;;  %v4365_v4 = vld [vmem:[#allocation19_spill] sm:$0xff]  ;;  %v711_v40 = vmul.f32 %v2850_v25, %v2590_v46  ;;  %v713_v58 = vmul.f32 %v2841_v38, %v2590_v46 }
  0x89   :  { %vm206_vm11 = vcmp.ge.f32.partialorder %v4365_v4, 0.0  ;;  %v430_v62 = vadd.f32 0.055144176, %v429_v50  ;;  %v532_v12 = vadd.f32 -0.33333194, %v531_v17  ;;  %v647_v30 = vmul.f32 %v2057_v22, %v646_v41  ;;  %v4370_v4 = vld [vmem:[#allocation25_spill] sm:$0xff] }
  0x8a   :  { %v198_v52 = vmul.f32 %v197_v5, %v2742_v24  ;;  %v2927_v5 = vadd.f32 %v554_v48, %v313_v14  ;;  %v714_v21 = vmul.f32 %v700_v19, %v2574_v57  ;;  %v4366_v14 = vld [vmem:[#allocation23_spill] sm:$0xff]  ;;  %vm652_vm13 = vcmp.eq.f32.partialorder %v2879_v15, inf }
  0x8b   :  { %v533_v42 = vmul.f32 %v532_v12, %v2736_v53  ;;  %vm209_vm12 = vcmp.ge.f32.partialorder %v4366_v14, 0.0  ;;  %v648_v29 = vmul.f32 0.5, %v647_v30  ;;  %v2940_v63 = vsub.f32 %v707_v60, %v708_v35  ;;  %v4367_v30 = vld [vmem:[#allocation21_spill] sm:$0xff] }
  0x8c   :  { %v199_v45 = vadd.f32 -0.33333194, %v198_v52  ;;  %v431_v52 = vmul.f32 %v430_v62, %v2877_v44  ;;  %v716_v19 = vmul.f32 %v2850_v25, %v2574_v57  ;;  %v717_v13 = vmul.f32 %v2841_v38, %v2578_v47 }
  0x8d   :  { %v557_v53 = vstv %s2900_s21  ;;  %vm654_vm14 = vcmp.eq.f32.partialorder %v2879_v15, 0.0  ;;  %vm536_vm15 = vcmp.gt.f32.partialorder %v2614_v43, %v2604_v36  ;;  %v560_v17 = vstv %s2908_s22  ;;  %s3844_s21 = sld [smem:[#allocation7 + $0x1]] }
  0x8e   :  { %v200_v39 = vmul.f32 %v199_v45, %v2742_v24  ;;  %v380_v24 = vsel %vm378_vm9, %v379_v16, %v377_v27  ;;  %v432_v16 = vadd.f32 -0.08222694, %v431_v52  ;;  %v534_v45 = vadd.f32 1.0, %v533_v42  ;;  %s3850_s22 = sld [smem:[#allocation7 + $0x2]] }
  0x8f   :  { %v558_v50 = vsub.f32 %v380_v24, %v557_v53  ;;  %v2952_v60 = vsub.f32 %v710_v26, %v711_v40  ;;  %v2956_v38 = vsub.f32 %v713_v58, %v714_v21  ;;  %v649_v48 = vsub.f32 1.5, %v648_v29  ;;  %v4368_v58 = vld [vmem:[#allocation22_spill] sm:$0xff]  ;;  %v4369_v21 = vld [vmem:[#allocation24_spill] sm:$0xff] }
  0x90   :  { %v201_v32 = vadd.f32 1.0, %v200_v39  ;;  %v433_v25 = vmul.f32 %v432_v16, %v2877_v44  ;;  %v535_v27 = vmul.f32 %v534_v45, %v2720_v23  ;;  %v2958_v41 = vsub.f32 %v716_v19, %v717_v13 }
  0x91   :  { %v719_v39 = vmul.f32 %v2895_v3, %v2590_v46  ;;  %v720_v23 = vmul.f32 %v2940_v63, %v2578_v47  ;;  %vm539_vm0 = vcmp.ge.f32.partialorder %v4367_v30, 0.0  ;;  %vm542_vm1 = vcmp.ge.f32.partialorder %v4368_v58, 0.0 }
  0x92   :  { %v202_v31 = vmul.f32 %v201_v32, %v2726_v7  ;;  %v561_v7 = vmul.f32 %v560_v17, %v558_v50  ;;  %v434_v62 = vadd.f32 0.10882225, %v433_v25  ;;  %v537_v12 = vsub.f32 1.5707964, %v535_v27 }
  0x93   :  { %2058 = vrsqrt.f32 %v4369_v21  ;;  %v650_v24 = vmul.f32 %v2057_v22, %v649_v48  ;;  %v721_v29 = vsub.f32 %v719_v39, %v720_v23  ;;  %v722_v19 = vmul.f32 %v2940_v63, %v2574_v57 }
  0x94   :  { %v204_v35 = vsub.f32 1.5707964, %v202_v31  ;;  %563 = vst [vmem:[#allocation13 + $0x9] sm:$0x1] %v561_v7  ;;  %v435_v32 = vmul.f32 %v434_v62, %v2877_v44  ;;  %v538_v49 = vsel %vm536_vm15, %v537_v12, %v535_v27  ;;  %v723_v45 = vmul.f32 %v2888_v61, %v2590_v46 }
  0x95   :  { %v540_v42 = vsub.f32 3.1415927, %v538_v49  ;;  %v651_v16 = vmul.f32 %v650_v24, %v2879_v15  ;;  %v725_v43 = vmul.f32 %v2888_v61, %v2578_v47  ;;  %v726_v22 = vmul.f32 %v2895_v3, %v2574_v57 }
  0x96   :  { %v205_v26 = vsel %vm203_vm10, %v204_v35, %v202_v31  ;;  %v436_v31 = vadd.f32 -0.14248416, %v435_v32  ;;  %2060 = vrsqrt.f32 %v4370_v4  ;;  %v724_v14 = vsub.f32 %v722_v19, %v723_v45 }
  0x97   :  { %v207_v40 = vsub.f32 3.1415927, %v205_v26  ;;  %v541_v36 = vsel %vm539_vm0, %v538_v49, %v540_v42  ;;  %v653_v46 = vsel %vm652_vm13, %v2879_v15, %v651_v16  ;;  %v727_v25 = vsub.f32 %v725_v43, %v726_v22  ;;  %v4371_v42 = vld [vmem:[#allocation20_spill] sm:$0xff] }
  0x98   :  { %v437_v50 = vmul.f32 %v436_v31, %v2877_v44  ;;  %v543_v17 = vsub.f32 0.0, %v541_v36  ;;  %v3009_v57 = vsel %vm654_vm14, %v655_v37, %v653_v46  ;;  %v576_v48 = vstv %s2965_s24  ;;  %s3861_s24 = sld [smem:[#allocation7 + $0x3]] }
  0x99   :  { %v208_v52 = vsel %vm206_vm11, %v205_v26, %v207_v40  ;;  %v2999_v47 = vpop.eup %2058  ;;  %v3015_v39 = vand.u32 2147483647, %v3009_v57  ;;  %v3023_v15 = vadd.f32 %v2801_v33, %v2797_v34  ;;  %v738_v23 = vmul.f32 %v721_v29, %v2952_v60 }
  0x9a   :  { %v210_v13 = vsub.f32 0.0, %v208_v52  ;;  %v438_v27 = vadd.f32 0.19996625, %v437_v50  ;;  %v544_v7 = vsel %vm542_vm1, %v541_v36, %v543_v17  ;;  %v612_v62 = vmul.f32 %v2999_v47, %v4369_v21  ;;  %v4372_v17 = vld [vmem:[#allocation26_spill] sm:$0xff] }
  0x9b   :  { %v574_v26 = vsub.f32 %v544_v7, %v573_v0  ;;  %v659_v12 = vmax.f32 %v3015_v39, %v2912_v2  ;;  %v868_v40 = vmul.f32 %v2717_v10, %v2690_v18  ;;  %v739_v58 = vmul.f32 %v724_v14, %v2956_v38 }
  0x9c   :  { %v211_v53 = vsel %vm209_vm12, %v208_v52, %v210_v13  ;;  %v439_v37 = vmul.f32 %v438_v27, %v2877_v44  ;;  %v2061_v30 = vpop.eup %2060  ;;  %v741_v34 = vmul.f32 %v727_v25, %v2958_v41  ;;  %v744_v33 = vmul.f32 %v2952_v60, %v2888_v61  ;;  %v4375_v25 = vld [vmem:[#allocation27_spill] sm:$0xff]  ;;  %v4376_v27 = vld [vmem:[#allocation28_spill] sm:$0xff] }
  0x9d   :  { %v324_v35 = vsub.f32 %v211_v53, %v323_v20  ;;  %2062 = vrcp.f32 %v659_v12  ;;  %v729_v49 = vmul.f32 %v2061_v30, %v4370_v4  ;;  %v869_v0 = vmul.f32 %v2751_v1, %v2703_v54 }
  0x9e   :  { %v440_v32 = vadd.f32 -0.33333194, %v439_v37  ;;  %vm444_vm2 = vcmp.gt.f32.partialorder %v2754_v56, %v2659_v55  ;;  %v613_v18 = vmul.f32 %v2999_v47, %v612_v62  ;;  %v745_v24 = vmul.f32 %v2956_v38, %v2895_v3  ;;  %v4381_v55 = vld [vmem:[#allocation33_spill] sm:$0xff] }
  0x9f   :  { %v327_v20 = vmul.f32 %v326_v6, %v324_v35  ;;  %v577_v6 = vmul.f32 %v576_v48, %v574_v26  ;;  %v747_v52 = vmul.f32 %v2958_v41, %v2940_v63  ;;  %vm447_vm3 = vcmp.ge.f32.partialorder %v4371_v42, 0.0  ;;  %v4377_v48 = vld [vmem:[#allocation29_spill] sm:$0xff] }
  0xa0   :  { %v441_v60 = vmul.f32 %v440_v32, %v2877_v44  ;;  %v565_v29 = vstv %s2994_s25  ;;  %v730_v19 = vmul.f32 %v2061_v30, %v729_v49  ;;  %v568_v13 = vstv %s3003_s26  ;;  %s3865_s25 = sld [smem:[#allocation7 + $0x5]] }
  0xa1   :  { %329 = vst [vmem:[#allocation13 + $0x7] sm:$0x1] %v327_v20  ;;  %v740_v54 = vadd.f32 %v739_v58, %v738_v23  ;;  %v746_v31 = vadd.f32 %v745_v24, %v744_v33  ;;  %v3051_v16 = vmul.f32 %v3023_v15, %v2792_v28  ;;  %vm734_vm4 = vweird.f32 %v4370_v4  ;;  %v4378_v20 = vld [vmem:[#allocation30_spill] sm:$0xff]  ;;  %v838_v23 = vld [vmem:[#allocation3 + $0x7] sm:$0x1]  ;;  %s3870_s26 = sld [smem:[#allocation7 + $0x6]] }
  0xa2   :  { %579 = vst [vmem:[#allocation13 + $0xb] sm:$0x1] %v577_v6  ;;  %v442_v45 = vadd.f32 1.0, %v441_v60  ;;  %v731_v36 = vmul.f32 0.5, %v730_v19  ;;  %vm735_vm5 = vweird.f32 %v2061_v30  ;;  %vm450_vm6 = vcmp.ge.f32.partialorder %v2747_v9, 0.0  ;;  %v4380_v19 = vld [vmem:[#allocation31_spill] sm:$0xff] }
  0xa3   :  { %v3055_v38 = vmul.f32 0.5, %v613_v18  ;;  %v660_v44 = vmin.f32 %v3015_v39, %v2912_v2  ;;  %v3059_v41 = vadd.f32 %v747_v52, %v746_v31  ;;  %2064 = vrsqrt.f32 %v3051_v16  ;;  %v2063_v43 = vpop.eup %2062  ;;  %vm3065_vm7 = vmor %vm734_vm4, %vm735_vm5  ;;  %v839_v58 = vld [vmem:[#allocation3 + $0x8] sm:$0x1] }
  0xa4   :  { %v443_v22 = vmul.f32 %v442_v45, %v2860_v11  ;;  %v732_v53 = vsub.f32 1.5, %v731_v36  ;;  %v870_v50 = vadd.f32 %v869_v0, %v868_v40  ;;  %v940_v4 = vsub.f32 %v2672_v8, %v4372_v17  ;;  %v837_v11 = vld [vmem:[#allocation3 + $0x6] sm:$0x1]  ;;  %v4382_v45 = vld [vmem:[#allocation34_spill] sm:$0xff] }
  0xa5   :  { %v662_v46 = vmul.f32 %v2063_v43, %v659_v12  ;;  %v742_v14 = vadd.f32 %v741_v34, %v740_v54  ;;  %v941_v7 = vsub.f32 %v4376_v27, %v4375_v25  ;;  %v942_v26 = vsub.f32 %v4378_v20, %v4377_v48  ;;  %v4379_v40 = vld [vmem:[#allocation32_spill] sm:$0xff] }
  0xa6   :  { %v445_v62 = vsub.f32 1.5707964, %v443_v22  ;;  %v733_v37 = vmul.f32 %v2061_v30, %v732_v53  ;;  %v871_v6 = vmul.f32 %v2766_v51, %v4379_v40  ;;  %2066 = vrsqrt.f32 %v3023_v15 }
  0xa7   :  { %v663_v8 = vsub.f32 2.0, %v662_v46  ;;  %v3077_v12 = vand.u32 2147483647, %v3059_v41  ;;  %vm880_vm8 = vweird.f32 %v3051_v16  ;;  %v950_v34 = vmul.f32 %v940_v4, %v2766_v51 }
  0xa8   :  { %v446_v33 = vsel %vm444_vm2, %v445_v62, %v443_v22  ;;  %v3086_v32 = vsel %vm3065_vm7, %v2061_v30, %v733_v37  ;;  %v946_v49 = vmul.f32 %v941_v7, %v2766_v51  ;;  %v947_v0 = vmul.f32 %v942_v26, %v2751_v1 }
  0xa9   :  { %v2065_v18 = vpop.eup %2064  ;;  %v448_v24 = vsub.f32 3.1415927, %v446_v33  ;;  %v664_v52 = vmul.f32 %v2063_v43, %v663_v8  ;;  %v3091_v60 = vmul.f32 %v742_v14, %v3086_v32  ;;  %v943_v54 = vsub.f32 %v837_v11, %v4380_v19 }
  0xaa   :  { %v875_v31 = vmul.f32 %v2065_v18, %v3051_v16  ;;  %v944_v56 = vsub.f32 %v838_v23, %v4381_v55  ;;  %v945_v36 = vsub.f32 %v839_v58, %v4382_v45  ;;  %v949_v30 = vmul.f32 %v942_v26, %v2717_v10 }
  0xab   :  { %v449_v22 = vsel %vm447_vm3, %v446_v33, %v448_v24  ;;  %v3100_v53 = vmul.f32 %v664_v52, %v660_v44  ;;  %v3103_v43 = vand.u32 2147483647, %v3091_v60  ;;  %v952_v17 = vmul.f32 %v940_v4, %v2751_v1 }
  0xac   :  { %v3106_v46 = vpop.eup %2066  ;;  %v451_v35 = vsub.f32 0.0, %v449_v22  ;;  %v876_v14 = vmul.f32 %v2065_v18, %v875_v31  ;;  %vm881_vm9 = vweird.f32 %v2065_v18  ;;  %v953_v25 = vmul.f32 %v941_v7, %v2717_v10 }
  0xad   :  { %v3111_v27 = vmul.f32 %v3100_v53, %v3100_v53  ;;  %v751_v42 = vmax.f32 %v3103_v43, %v3077_v12  ;;  %v752_v44 = vmin.f32 %v3103_v43, %v3077_v12  ;;  %v3117_v48 = vsub.f32 %v949_v30, %v950_v34  ;;  %vm3136_vm10 = vmor %vm880_vm8, %vm881_vm9 }
  0xae   :  { %v452_v4 = vsel %vm450_vm6, %v449_v22, %v451_v35  ;;  %v877_v20 = vmul.f32 0.5, %v876_v14  ;;  %v955_v26 = vmul.f32 %v945_v36, %v2751_v1  ;;  %v956_v7 = vmul.f32 %v944_v56, %v2766_v51 }
  0xaf   :  { %v566_v62 = vsub.f32 %v452_v4, %v565_v29  ;;  %v667_v37 = vmul.f32 -0.001516384, %v3111_v27  ;;  %2068 = vrcp.f32 %v751_v42  ;;  %v3126_v11 = vsub.f32 %v952_v17, %v953_v25 }
  0xb0   :  { %v615_v23 = vsub.f32 1.5, %v3055_v38  ;;  %v872_v40 = vadd.f32 %v871_v6, %v870_v50  ;;  %v878_v8 = vsub.f32 1.5, %v877_v20  ;;  %v3129_v58 = vsub.f32 %v946_v49, %v947_v0 }
  0xb1   :  { %v569_v9 = vmul.f32 %v568_v13, %v566_v62  ;;  %v668_v34 = vadd.f32 0.009606271, %v667_v37  ;;  %v958_v29 = vmul.f32 %v943_v54, %v2766_v51  ;;  %v959_v24 = vmul.f32 %v945_v36, %v2717_v10 }
  0xb2   :  { %v879_v52 = vmul.f32 %v2065_v18, %v878_v8  ;;  %v957_v38 = vsub.f32 %v955_v26, %v956_v7  ;;  %v961_v50 = vmul.f32 %v944_v56, %v2717_v10  ;;  %v962_v6 = vmul.f32 %v943_v54, %v2751_v1 }
  0xb3   :  { %571 = vst [vmem:[#allocation13 + $0xa] sm:$0x1] %v569_v9  ;;  %v669_v13 = vmul.f32 %v668_v34, %v3111_v27  ;;  %v964_v16 = vmul.f32 %v3117_v48, %v2766_v51  ;;  %v965_v49 = vmul.f32 %v3126_v11, %v2751_v1  ;;  %v967_v0 = vmul.f32 %v3126_v11, %v2717_v10 }
  0xb4   :  { %v787_v19 = vmul.f32 %v2888_v61, %v2888_v61  ;;  %v788_v31 = vmul.f32 %v2895_v3, %v2895_v3  ;;  %v883_v54 = vsel %vm3136_vm10, %v2065_v18, %v879_v52  ;;  %v968_v55 = vmul.f32 %v3129_v58, %v2766_v51 }
  0xb5   :  { %v2069_v56 = vpop.eup %2068  ;;  %v670_v45 = vadd.f32 -0.028581347, %v669_v13  ;;  %v884_v36 = vmul.f32 %v883_v54, %v872_v40  ;;  %v960_v30 = vsub.f32 %v958_v29, %v959_v24  ;;  %v970_v22 = vmul.f32 %v3129_v58, %v2751_v1 }
  0xb6   :  { %v754_v17 = vmul.f32 %v2069_v56, %v751_v42  ;;  %v789_v35 = vadd.f32 %v788_v31, %v787_v19  ;;  %v790_v61 = vmul.f32 %v2940_v63, %v2940_v63  ;;  %v971_v3 = vmul.f32 %v3117_v48, %v2717_v10 }
  0xb7   :  { %v671_v18 = vmul.f32 %v670_v45, %v3111_v27  ;;  %v3166_v14 = vclamps-f32 %v884_v36, 1.0  ;;  %v963_v51 = vsub.f32 %v961_v50, %v962_v6  ;;  %v974_v25 = vmul.f32 %v3106_v46, %v3023_v15 }
  0xb8   :  { %v755_v4 = vsub.f32 2.0, %v754_v17  ;;  %v791_v20 = vadd.f32 %v790_v61, %v789_v35  ;;  %v966_v26 = vsub.f32 %v964_v16, %v965_v49  ;;  %v969_v1 = vsub.f32 %v967_v0, %v968_v55  ;;  %v3212_v61 = vld [vmem:[#allocation3 + $0x19] sm:$0x1] }
  0xb9   :  { %v672_v42 = vadd.f32 0.055144176, %v671_v18  ;;  %v887_v7 = vmul.f32 %v3166_v14, %v3166_v14  ;;  %v972_v63 = vsub.f32 %v970_v22, %v971_v3  ;;  %v975_v62 = vmul.f32 %v3106_v46, %v974_v25  ;;  %v3223_v25 = vld [vmem:[#allocation3 + $0x16] sm:$0x1] }
  0xba   :  { %v756_v10 = vmul.f32 %v2069_v56, %v755_v4  ;;  %v792_v37 = vmul.f32 %v791_v20, %v4369_v21  ;;  %v793_v40 = vmul.f32 %v3086_v32, %v3086_v32  ;;  %vm979_vm11 = vweird.f32 %v3023_v15 }
  0xbb   :  { %v673_v8 = vmul.f32 %v672_v42, %v3111_v27  ;;  %2070 = vrsqrt.f32 %v2792_v28  ;;  %v888_v9 = vsub.f32 1.0, %v887_v7  ;;  %v976_v34 = vmul.f32 0.5, %v975_v62 }
  0xbc   :  { %v3179_v33 = vmul.f32 %v756_v10, %v752_v44  ;;  %v794_v29 = vmul.f32 %v793_v40, %v792_v37  ;;  %vm980_vm12 = vweird.f32 %v3106_v46  ;;  %v983_v24 = vmul.f32 %v966_v26, %v957_v38 }
  0xbd   :  { %v674_v52 = vadd.f32 -0.08222694, %v673_v8  ;;  %v3182_v50 = vmax.f32 %v888_v9, 0.0  ;;  %v977_v6 = vsub.f32 1.5, %v976_v34  ;;  %v984_v13 = vmul.f32 %v969_v1, %v960_v30  ;;  %vm981_vm13 = vmor %vm979_vm11, %vm980_vm12 }
  0xbe   :  { %v616_v32 = vmul.f32 %v2999_v47, %v615_v23  ;;  %v3187_v16 = vmul.f32 %v3179_v33, %v3179_v33  ;;  %2072 = vlog2.f32 %v794_v29  ;;  %v986_v49 = vmul.f32 %v972_v63, %v963_v51 }
  0xbf   :  { %v675_v44 = vmul.f32 %v674_v52, %v3111_v27  ;;  %2074 = vrsqrt.f32 %v3182_v50  ;;  %v989_v0 = vmul.f32 %v957_v38, %v3129_v58  ;;  %v978_v31 = vmul.f32 %v3106_v46, %v977_v6 }
  0xc0   :  { %v759_v19 = vmul.f32 -0.001516384, %v3187_v16  ;;  %v985_v47 = vadd.f32 %v984_v13, %v983_v24  ;;  %v990_v55 = vmul.f32 %v960_v30, %v3117_v48  ;;  %v992_v56 = vmul.f32 %v963_v51, %v3126_v11  ;;  %v3210_v30 = vld [vmem:[#allocation3 + $0x18] sm:$0x1]  ;;  %v3221_v51 = vld [vmem:[#allocation3 + $0x15] sm:$0x1] }
  0xc1   :  { %v3196_v23 = vpop.eup %2070  ;;  %v676_v54 = vadd.f32 0.10882225, %v675_v44  ;;  %v617_v45 = vmul.f32 %v616_v32, %v4369_v21  ;;  %v3204_v15 = vsel %vm981_vm13, %v3106_v46, %v978_v31  ;;  %vm618_vm14 = vcmp.eq.f32.partialorder %v4369_v21, inf  ;;  %v3246_v24 = vld [vmem:[#allocation3 + $0x12] sm:$0x1] }
  0xc2   :  { %v760_v36 = vadd.f32 0.009606271, %v759_v19  ;;  %v987_v38 = vadd.f32 %v986_v49, %v985_v47  ;;  %v857_v17 = vmul.f32 %v3196_v23, %v2792_v28  ;;  %v991_v35 = vadd.f32 %v990_v55, %v989_v0  ;;  %v3256_v32 = vld [vmem:[#allocation3 + $0x1a] sm:$0x1]  ;;  %v3258_v49 = vld [vmem:[#allocation3 + $0x17] sm:$0x1] }
  0xc3   :  { %v677_v22 = vmul.f32 %v676_v54, %v3111_v27  ;;  %vm620_vm15 = vcmp.eq.f32.partialorder %v4369_v21, 0.0  ;;  %vm778_vm0 = vcmp.gt.f32.partialorder %v3103_v43, %v3077_v12  ;;  %v621_v20 = vand.u32 2147483648, %v4369_v21  ;;  %v3267_v55 = vld [vmem:[#allocation3 + $0x13] sm:$0x1] }
  0xc4   :  { %v2073_v3 = vpop.eup %2072  ;;  %v761_v18 = vmul.f32 %v760_v36, %v3187_v16  ;;  %v3219_v46 = vmul.f32 %v987_v38, %v3204_v15  ;;  %v3226_v42 = vadd.f32 %v992_v56, %v991_v35  ;;  %v619_v7 = vsel %vm618_vm14, %v4369_v21, %v617_v45  ;;  %v3273_v56 = vld [vmem:[#allocation3 + $0x14] sm:$0x1] }
  0xc5   :  { %v2075_v4 = vpop.eup %2074  ;;  %v678_v26 = vadd.f32 -0.14248416, %v677_v22  ;;  %v796_v1 = vmul.f32 0.6931472, %v2073_v3  ;;  %v858_v8 = vmul.f32 %v3196_v23, %v857_v17  ;;  %v1082_v52 = vsub.f32 %v3210_v30, %v3221_v51 }
  0xc6   :  { %v762_v63 = vadd.f32 -0.028581347, %v761_v18  ;;  %v891_v62 = vmul.f32 %v2075_v4, %v3182_v50  ;;  %v3235_v10 = vand.u32 2147483647, %v3219_v46  ;;  %v3243_v9 = vand.u32 2147483647, %v3226_v42 }
  0xc7   :  { %v679_v37 = vmul.f32 %v678_v26, %v3111_v27  ;;  %v3239_v40 = vadd.f32 %v796_v1, %v2927_v5  ;;  %v3252_v6 = vsub.f32 %v3212_v61, %v3223_v25  ;;  %v622_v44 = vsel %vm620_vm15, %v621_v20, %v619_v7 }
  0xc8   :  { %v763_v34 = vmul.f32 %v762_v63, %v3187_v16  ;;  %v892_v29 = vmul.f32 %v2075_v4, %v891_v62  ;;  %v996_v5 = vmax.f32 %v3235_v10, %v3243_v9  ;;  %v3263_v31 = vand.u32 2147483647, %v3166_v14 }
  0xc9   :  { %v680_v13 = vadd.f32 0.19996625, %v679_v37  ;;  %v859_v54 = vmul.f32 0.5, %v858_v8  ;;  %vm897_vm1 = vcmp.eq.f32.partialorder %v3182_v50, inf  ;;  %vm686_vm2 = vcmp.gt.f32.partialorder %v3015_v39, %v2912_v2 }
  0xca   :  { %v764_v0 = vadd.f32 0.055144176, %v763_v34  ;;  %v893_v19 = vmul.f32 0.5, %v892_v29  ;;  %2076 = vrcp.f32 %v996_v5  ;;  %vm899_vm3 = vcmp.eq.f32.partialorder %v3182_v50, 0.0 }
  0xcb   :  { %v681_v47 = vmul.f32 %v680_v13, %v3111_v27  ;;  %v1088_v45 = vmul.f32 %v1082_v52, %v1082_v52  ;;  %v1089_v36 = vmul.f32 %v3252_v6, %v3252_v6  ;;  %v1084_v17 = vsub.f32 %v3256_v32, %v3258_v49 }
  0xcc   :  { %v765_v21 = vmul.f32 %v764_v0, %v3187_v16  ;;  %v894_v22 = vsub.f32 1.5, %v893_v19  ;;  %v3281_v35 = vsub.f32 %v3246_v24, %v3221_v51  ;;  %v799_v18 = vstv %s3201_s27  ;;  %s3875_s27 = sld [smem:[#allocation10 + $0xf]] }
  0xcd   :  { %v682_v38 = vadd.f32 -0.33333194, %v681_v47  ;;  %v802_v20 = vstv %s3231_s28  ;;  %v3287_v26 = vsub.f32 %v3267_v55, %v3223_v25  ;;  %v800_v7 = vsub.f32 %v622_v44, %v799_v18  ;;  %s3884_s28 = sld [smem:[#allocation10 + $0x10]] }
  0xce   :  { %v766_v3 = vadd.f32 -0.08222694, %v765_v21  ;;  %v860_v63 = vsub.f32 1.5, %v859_v54  ;;  %v3292_v62 = vsub.f32 %v3273_v56, %v3258_v49  ;;  %v895_v8 = vmul.f32 %v2075_v4, %v894_v22 }
  0xcf   :  { %v683_v1 = vmul.f32 %v682_v38, %v3111_v27  ;;  %v900_v34 = vand.u32 2147483648, %v3182_v50  ;;  %v1090_v29 = vadd.f32 %v1089_v36, %v1088_v45  ;;  %v803_v19 = vmul.f32 %v802_v20, %v800_v7 }
  0xd0   :  { %v767_v37 = vmul.f32 %v766_v3, %v3187_v16  ;;  %v2077_v13 = vpop.eup %2076  ;;  %v997_v47 = vmin.f32 %v3235_v10, %v3243_v9  ;;  %v1091_v21 = vmul.f32 %v1084_v17, %v1084_v17  ;;  %v896_v44 = vmul.f32 %v895_v8, %v3182_v50 }
  0xd1   :  { %v684_v0 = vadd.f32 1.0, %v683_v1  ;;  %v999_v54 = vmul.f32 %v2077_v13, %v996_v5  ;;  %v1093_v38 = vmul.f32 %v3281_v35, %v3281_v35  ;;  %805 = vst [vmem:[#allocation13 + $0xc] sm:$0x1] %v803_v19  ;;  %v861_v45 = vmul.f32 %v3196_v23, %v860_v63 }
  0xd2   :  { %v768_v27 = vadd.f32 0.10882225, %v767_v37  ;;  %v1094_v36 = vmul.f32 %v3287_v26, %v3287_v26  ;;  %v1096_v22 = vmul.f32 %v3292_v62, %v3292_v62  ;;  %v898_v5 = vsel %vm897_vm1, %v3182_v50, %v896_v44 }
  0xd3   :  { %v685_v4 = vmul.f32 %v684_v0, %v3100_v53  ;;  %v1000_v53 = vsub.f32 2.0, %v999_v54  ;;  %v3317_v18 = vadd.f32 %v1091_v21, %v1090_v29  ;;  %v3323_v23 = vsel %vm899_vm3, %v900_v34, %v898_v5 }
  0xd4   :  { %v769_v3 = vmul.f32 %v768_v27, %v3187_v16  ;;  %v1095_v1 = vadd.f32 %v1094_v36, %v1093_v38  ;;  %v1110_v7 = vmul.f32 %v3281_v35, %v1082_v52  ;;  %v3327_v37 = vand.u32 2147483647, %v3323_v23 }
  0xd5   :  { %v687_v20 = vsub.f32 1.5707964, %v685_v4  ;;  %v1001_v8 = vmul.f32 %v2077_v13, %v1000_v53  ;;  %v1111_v0 = vmul.f32 %v3287_v26, %v3252_v6  ;;  %vm689_vm4 = vcmp.ge.f32.partialorder %v2804_v59, 0.0 }
  0xd6   :  { %v770_v63 = vadd.f32 -0.14248416, %v769_v3  ;;  %vm692_vm5 = vcmp.ge.f32.partialorder %v3009_v57, 0.0  ;;  %v3336_v50 = vadd.f32 %v1096_v22, %v1095_v1  ;;  %v3340_v13 = vmul.f32 %v861_v45, %v2792_v28 }
  0xd7   :  { %v688_v29 = vsel %vm686_vm2, %v687_v20, %v685_v4  ;;  %v904_v6 = vmax.f32 %v3327_v37, %v3263_v31  ;;  %v866_v2 = vand.u32 2147483648, %v2792_v28  ;;  %v3345_v39 = vmul.f32 %v1001_v8, %v997_v47 }
  0xd8   :  { %v690_v52 = vsub.f32 3.1415927, %v688_v29  ;;  %v771_v34 = vmul.f32 %v770_v63, %v3187_v16  ;;  %v1113_v59 = vmul.f32 %v3292_v62, %v1084_v17  ;;  %v3350_v19 = vmul.f32 %v3336_v50, %v3317_v18 }
  0xd9   :  { %2078 = vrcp.f32 %v904_v6  ;;  %v1112_v44 = vadd.f32 %v1111_v0, %v1110_v7  ;;  %v807_v38 = vstv %s3298_s29  ;;  %v3355_v4 = vmul.f32 %v3345_v39, %v3345_v39  ;;  %v1080_v0 = vld [vmem:[#allocation3 + $0x10] sm:$0x1]  ;;  %s3886_s29 = sld [smem:[#allocation11 + $0xf]] }
  0xda   :  { %v691_v21 = vsel %vm689_vm4, %v688_v29, %v690_v52  ;;  %v772_v27 = vadd.f32 0.19996625, %v771_v34  ;;  %2080 = vrsqrt.f32 %v3350_v19  ;;  %v810_v17 = vstv %s3304_s8  ;;  %s3890_s8 = sld [smem:[#allocation11 + $0x10]] }
  0xdb   :  { %v693_v54 = vsub.f32 0.0, %v691_v21  ;;  %v1183_v45 = vsub.f32 %v3223_v25, %v3212_v61  ;;  %v1184_v36 = vsub.f32 %v3258_v49, %v3256_v32  ;;  %v815_v3 = vstv %s3312_s2  ;;  %v1081_v61 = vld [vmem:[#allocation3 + $0x11] sm:$0x1]  ;;  %s3894_s2 = sld [smem:[#allocation10 + $0x11]] }
  0xdc   :  { %v773_v47 = vmul.f32 %v772_v27, %v3187_v16  ;;  %v818_v5 = vstv %s3319_s9  ;;  %v1004_v53 = vmul.f32 -0.001516384, %v3355_v4  ;;  %v905_v7 = vmin.f32 %v3327_v37, %v3263_v31  ;;  %s3896_s9 = sld [smem:[#allocation11 + $0x11]] }
  0xdd   :  { %v694_v22 = vsel %vm692_vm5, %v691_v21, %v693_v54  ;;  %v3371_v63 = vadd.f32 %v1113_v59, %v1112_v44  ;;  %vm1122_vm6 = vweird.f32 %v3350_v19  ;;  %v1182_v57 = vsub.f32 %v3221_v51, %v3210_v30 }
  0xde   :  { %v774_v20 = vadd.f32 -0.33333194, %v773_v47  ;;  %v808_v1 = vsub.f32 %v694_v22, %v807_v38  ;;  %v1005_v8 = vadd.f32 0.009606271, %v1004_v53  ;;  %2082 = vrsqrt.f32 %v3336_v50 }
  0xdf   :  { %v2079_v25 = vpop.eup %2078  ;;  %vm781_vm7 = vcmp.ge.f32.partialorder %v3059_v41, 0.0  ;;  %v1188_v29 = vmul.f32 %v1183_v45, %v3292_v62  ;;  %v1189_v52 = vmul.f32 %v1184_v36, %v3287_v26  ;;  %v1032_v27 = vmul.f32 %v3129_v58, %v3129_v58 }
  0xe0   :  { %v775_v32 = vmul.f32 %v774_v20, %v3187_v16  ;;  %v811_v49 = vmul.f32 %v810_v17, %v808_v1  ;;  %v2081_v34 = vpop.eup %2080  ;;  %v907_v59 = vmul.f32 %v2079_v25, %v904_v6  ;;  %v1006_v21 = vmul.f32 %v1005_v8, %v3355_v4  ;;  %v1079_v8 = vld [vmem:[#allocation3 + $0xf] sm:$0x1] }
  0xe1   :  { %v1033_v30 = vmul.f32 %v3117_v48, %v3117_v48  ;;  %v1117_v16 = vmul.f32 %v2081_v34, %v3350_v19  ;;  %v1186_v44 = vsub.f32 %v1080_v0, %v3267_v55  ;;  %v1187_v54 = vsub.f32 %v1081_v61, %v3273_v56 }
  0xe2   :  { %v776_v51 = vadd.f32 1.0, %v775_v32  ;;  %813 = vst [vmem:[#allocation13 + $0xd] sm:$0x1] %v811_v49  ;;  %vm784_vm8 = vcmp.ge.f32.partialorder %v3091_v60, 0.0  ;;  %vm863_vm9 = vcmp.eq.f32.partialorder %v2792_v28, inf  ;;  %v908_v6 = vsub.f32 2.0, %v907_v59 }
  0xe3   :  { %v1007_v38 = vadd.f32 -0.028581347, %v1006_v21  ;;  %v1034_v47 = vadd.f32 %v1033_v30, %v1032_v27  ;;  %v1035_v58 = vmul.f32 %v3126_v11, %v3126_v11  ;;  %v1118_v17 = vmul.f32 %v2081_v34, %v1117_v16 }
  0xe4   :  { %v777_v48 = vmul.f32 %v776_v51, %v3179_v33  ;;  %v1191_v22 = vmul.f32 %v1184_v36, %v3281_v35  ;;  %v1192_v53 = vmul.f32 %v1182_v57, %v3292_v62  ;;  %v3396_v55 = vpop.eup %2082  ;;  %v909_v56 = vmul.f32 %v2079_v25, %v908_v6 }
  0xe5   :  { %v1008_v20 = vmul.f32 %v1007_v38, %v3355_v4  ;;  %v1036_v1 = vadd.f32 %v1035_v58, %v1034_v47  ;;  %vm1123_vm10 = vweird.f32 %v2081_v34  ;;  %v1119_v61 = vmul.f32 0.5, %v1118_v17 }
  0xe6   :  { %v779_v0 = vsub.f32 1.5707964, %v777_v48  ;;  %v1194_v32 = vmul.f32 %v1182_v57, %v3287_v26  ;;  %v1195_v11 = vmul.f32 %v1183_v45, %v3281_v35  ;;  %v3401_v33 = vmul.f32 %v909_v56, %v905_v7  ;;  %vm3420_vm11 = vmor %vm1122_vm6, %vm1123_vm10 }
  0xe7   :  { %v1009_v49 = vadd.f32 0.055144176, %v1008_v20  ;;  %v1037_v36 = vmul.f32 %v1036_v1, %v2792_v28  ;;  %v1038_v59 = vmul.f32 %v3204_v15, %v3204_v15  ;;  %v1120_v21 = vsub.f32 1.5, %v1119_v61 }
  0xe8   :  { %v780_v25 = vsel %vm778_vm0, %v779_v0, %v777_v48  ;;  %v1185_v27 = vsub.f32 %v1079_v8, %v3246_v24  ;;  %v3410_v30 = vsub.f32 %v1191_v22, %v1192_v53  ;;  %v3414_v45 = vmul.f32 %v3401_v33, %v3401_v33 }
  0xe9   :  { %v782_v57 = vsub.f32 3.1415927, %v780_v25  ;;  %v1010_v7 = vmul.f32 %v1009_v49, %v3355_v4  ;;  %v1039_v51 = vmul.f32 %v1038_v59, %v1037_v36  ;;  %v1121_v12 = vmul.f32 %v2081_v34, %v1120_v21  ;;  %v3469_v59 = vld [vmem:[#allocation3 + $0x1b] sm:$0x1] }
  0xea   :  { %v3424_v43 = vsub.f32 %v1194_v32, %v1195_v11  ;;  %v1197_v24 = vmul.f32 %v1187_v54, %v3287_v26  ;;  %v1198_v16 = vmul.f32 %v1186_v44, %v3292_v62  ;;  %vm865_vm12 = vcmp.eq.f32.partialorder %v2792_v28, 0.0 }
  0xeb   :  { %v783_v6 = vsel %vm781_vm7, %v780_v25, %v782_v57  ;;  %v912_v38 = vmul.f32 -0.001516384, %v3414_v45  ;;  %v1011_v19 = vadd.f32 -0.08222694, %v1010_v7  ;;  %2084 = vlog2.f32 %v1039_v51  ;;  %v3474_v7 = vld [vmem:[#allocation3 + $0x1c] sm:$0x1] }
  0xec   :  { %v785_v47 = vsub.f32 0.0, %v783_v6  ;;  %v1125_v58 = vsel %vm3420_vm11, %v2081_v34, %v1121_v12  ;;  %v3434_v48 = vsub.f32 %v1188_v29, %v1189_v52  ;;  %v1200_v17 = vmul.f32 %v1185_v27, %v3292_v62 }
  0xed   :  { %v913_v22 = vadd.f32 0.009606271, %v912_v38  ;;  %v1012_v53 = vmul.f32 %v1011_v19, %v3355_v4  ;;  %v1126_v41 = vmul.f32 %v1125_v58, %v3371_v63  ;;  %v1201_v56 = vmul.f32 %v1187_v54, %v3281_v35 }
  0xee   :  { %v786_v20 = vsel %vm784_vm8, %v783_v6, %v785_v47  ;;  %v864_v34 = vsel %vm863_vm9, %v2792_v28, %v3340_v13  ;;  %v1206_v29 = vmul.f32 %v3410_v30, %v3292_v62  ;;  %v1207_v52 = vmul.f32 %v3424_v43, %v3287_v26 }
  0xef   :  { %v816_v1 = vsub.f32 %v786_v20, %v815_v3  ;;  %v914_v63 = vmul.f32 %v913_v22, %v3414_v45  ;;  %v1013_v8 = vadd.f32 0.10882225, %v1012_v53  ;;  %v3453_v54 = vsub.f32 %v1197_v24, %v1198_v16  ;;  %v3483_v24 = vld [vmem:[#allocation3 + $0x19] sm:$0x1] }
  0xf0   :  { %v3457_v60 = vclamps-f32 %v1126_v41, 1.0  ;;  %v1203_v0 = vmul.f32 %v1186_v44, %v3281_v35  ;;  %v1209_v13 = vmul.f32 %v3424_v43, %v3281_v35  ;;  %v1210_v61 = vmul.f32 %v3434_v48, %v3292_v62  ;;  %v3476_v62 = vld [vmem:[#allocation3 + $0x18] sm:$0x1]  ;;  %v3510_v41 = vld [vmem:[#allocation3 + $0x1d] sm:$0x1] }
  0xf1   :  { %v2085_v32 = vpop.eup %2084  ;;  %v819_v3 = vmul.f32 %v818_v5, %v816_v1  ;;  %v915_v11 = vadd.f32 -0.028581347, %v914_v63  ;;  %v1014_v49 = vmul.f32 %v1013_v8, %v3355_v4  ;;  %v1202_v36 = vsub.f32 %v1200_v17, %v1201_v56  ;;  %v3512_v56 = vld [vmem:[#allocation3 + $0x1a] sm:$0x1] }
  0xf2   :  { %v1041_v25 = vmul.f32 0.6931472, %v2085_v32  ;;  %v1129_v44 = vmul.f32 %v3457_v60, %v3457_v60  ;;  %v1204_v21 = vmul.f32 %v1185_v27, %v3287_v26  ;;  %v1208_v57 = vsub.f32 %v1206_v29, %v1207_v52 }
  0xf3   :  { %821 = vst [vmem:[#allocation13 + $0xe] sm:$0x1] %v819_v3  ;;  %v916_v5 = vmul.f32 %v915_v11, %v3414_v45  ;;  %v1015_v51 = vadd.f32 -0.14248416, %v1014_v49  ;;  %v1212_v15 = vmul.f32 %v3434_v48, %v3287_v26  ;;  %v1213_v12 = vmul.f32 %v3410_v30, %v3281_v35 }
  0xf4   :  { %v3486_v16 = vadd.f32 %v1041_v25, %v3239_v40  ;;  %v1130_v27 = vsub.f32 1.0, %v1129_v44  ;;  %v1211_v6 = vsub.f32 %v1209_v13, %v1210_v61  ;;  %v1216_v38 = vmul.f32 %v3396_v55, %v3336_v50  ;;  %v3499_v40 = vld [vmem:[#allocation3 + $0x12] sm:$0x1] }
  0xf5   :  { %v917_v19 = vadd.f32 0.055144176, %v916_v5  ;;  %v1016_v47 = vmul.f32 %v1015_v51, %v3355_v4  ;;  %v867_v26 = vsel %vm865_vm12, %v866_v2, %v864_v34  ;;  %v3503_v58 = vsub.f32 %v3469_v59, %v3476_v62 }
  0xf6   :  { %v3497_v35 = vmax.f32 %v1130_v27, 0.0  ;;  %v3507_v17 = vsub.f32 %v3474_v7, %v3483_v24  ;;  %v1205_v2 = vsub.f32 %v1203_v0, %v1204_v21  ;;  %v1214_v53 = vsub.f32 %v1212_v15, %v1213_v12  ;;  %v3537_v15 = vld [vmem:[#allocation3 + $0x13] sm:$0x1] }
  0xf7   :  { %v918_v22 = vmul.f32 %v917_v19, %v3414_v45  ;;  %v1017_v28 = vadd.f32 0.19996625, %v1016_v47  ;;  %v1217_v20 = vmul.f32 %v3396_v55, %v1216_v38  ;;  %v1225_v34 = vmul.f32 %v1208_v57, %v3453_v54  ;;  %v3547_v47 = vld [vmem:[#allocation3 + $0x14] sm:$0x1] }
  0xf8   :  { %2086 = vrsqrt.f32 %v3497_v35  ;;  %v1226_v29 = vmul.f32 %v1211_v6, %v1202_v36  ;;  %v1044_v63 = vstv %s3455_s10  ;;  %v1047_v8 = vstv %s3467_s11  ;;  %s3898_s10 = sld [smem:[#allocation7 + $0x7]] }
  0xf9   :  { %v919_v52 = vadd.f32 -0.08222694, %v918_v22  ;;  %v1018_v1 = vmul.f32 %v1017_v28, %v3355_v4  ;;  %vm1023_vm13 = vcmp.gt.f32.partialorder %v3235_v10, %v3243_v9  ;;  %v1045_v0 = vsub.f32 %v867_v26, %v1044_v63  ;;  %s3902_s11 = sld [smem:[#allocation7 + $0x8]] }
  0xfa   :  { %v3524_v13 = vsub.f32 %v3510_v41, %v3512_v56  ;;  %v3528_v61 = vsub.f32 %v3499_v40, %v3476_v62  ;;  %vm1221_vm14 = vweird.f32 %v3336_v50  ;;  %vm1222_vm15 = vweird.f32 %v3396_v55 }
  0xfb   :  { %v920_v32 = vmul.f32 %v919_v52, %v3414_v45  ;;  %v1019_v3 = vadd.f32 -0.33333194, %v1018_v1  ;;  %v1048_v11 = vmul.f32 %v1047_v8, %v1045_v0  ;;  %v1218_v49 = vmul.f32 0.5, %v1217_v20  ;;  %vm3555_vm3 = vmor %vm1221_vm14, %vm1222_vm15 }
  0xfc   :  { %v1227_v25 = vadd.f32 %v1226_v29, %v1225_v34  ;;  %v1228_v44 = vmul.f32 %v1214_v53, %v1205_v2  ;;  %v1231_v5 = vmul.f32 %v3453_v54, %v3434_v48  ;;  %v1232_v51 = vmul.f32 %v1202_v36, %v3410_v30 }
  0xfd   :  { %v921_v21 = vadd.f32 0.10882225, %v920_v32  ;;  %v1020_v57 = vmul.f32 %v1019_v3, %v3355_v4  ;;  %vm1026_vm0 = vcmp.ge.f32.partialorder %v3226_v42, 0.0  ;;  %1050 = vst [vmem:[#allocation13 + $0xf] sm:$0x1] %v1048_v11  ;;  %v1060_v27 = vstv %s3495_s0  ;;  %s3905_s0 = sld [smem:[#allocation7 + $0x9]] }
  0xfe   :  { %v2087_v12 = vpop.eup %2086  ;;  %2088 = vrsqrt.f32 %v3317_v18  ;;  %v3543_v6 = vand.u32 2147483647, %v3457_v60  ;;  %v1219_v54 = vsub.f32 1.5, %v1218_v49  ;;  %vm1029_vm1 = vcmp.ge.f32.partialorder %v3219_v46, 0.0 }
  0xff   :  { %v922_v38 = vmul.f32 %v921_v21, %v3414_v45  ;;  %v1021_v4 = vadd.f32 1.0, %v1020_v57  ;;  %v1133_v19 = vmul.f32 %v2087_v12, %v3497_v35  ;;  %vm1139_vm2 = vcmp.eq.f32.partialorder %v3497_v35, inf }
 0x100   :  { %v1229_v26 = vadd.f32 %v1228_v44, %v1227_v25  ;;  %v1233_v22 = vadd.f32 %v1232_v51, %v1231_v5  ;;  %v1234_v28 = vmul.f32 %v1205_v2, %v3424_v43  ;;  %v3562_v53 = vsub.f32 %v3537_v15, %v3483_v24 }
 0x101   :  { %v923_v20 = vadd.f32 -0.14248416, %v922_v38  ;;  %v1022_v34 = vmul.f32 %v1021_v4, %v3345_v39  ;;  %v1134_v29 = vmul.f32 %v2087_v12, %v1133_v19  ;;  %vm1141_vm4 = vcmp.eq.f32.partialorder %v3497_v35, 0.0 }
 0x102   :  { %v1220_v50 = vmul.f32 %v3396_v55, %v1219_v54  ;;  %v3567_v52 = vadd.f32 %v1234_v28, %v1233_v22  ;;  %v3571_v1 = vsub.f32 %v3547_v47, %v3512_v56  ;;  %v1330_v2 = vmul.f32 %v3503_v58, %v3503_v58 }
 0x103   :  { %v1331_v63 = vmul.f32 %v3507_v17, %v3507_v17  ;;  %v924_v8 = vmul.f32 %v923_v20, %v3414_v45  ;;  %v1024_v39 = vsub.f32 1.5707964, %v1022_v34  ;;  %v1135_v0 = vmul.f32 0.5, %v1134_v29 }
 0x104   :  { %v3583_v32 = vsel %vm3555_vm3, %v3396_v55, %v1220_v50  ;;  %v2089_v3 = vpop.eup %2088  ;;  %v3589_v49 = vand.u32 2147483647, %v3567_v52  ;;  %v1333_v44 = vmul.f32 %v3524_v13, %v3524_v13  ;;  %v1142_v38 = vand.u32 2147483648, %v3497_v35 }
 0x105   :  { %v3586_v11 = vmul.f32 %v1229_v26, %v3583_v32  ;;  %v1332_v25 = vadd.f32 %v1331_v63, %v1330_v2  ;;  %v925_v21 = vadd.f32 0.19996625, %v924_v8  ;;  %v1025_v57 = vsel %vm1023_vm13, %v1024_v39, %v1022_v34 }
 0x106   :  { %v1099_v5 = vmul.f32 %v2089_v3, %v3317_v18  ;;  %v1136_v55 = vsub.f32 1.5, %v1135_v0  ;;  %v1027_v51 = vsub.f32 3.1415927, %v1025_v57  ;;  %v1335_v19 = vmul.f32 %v3528_v61, %v3528_v61 }
 0x107   :  { %v3599_v4 = vand.u32 2147483647, %v3586_v11  ;;  %v926_v54 = vmul.f32 %v925_v21, %v3414_v45  ;;  %v1336_v10 = vmul.f32 %v3562_v53, %v3562_v53  ;;  %v3614_v28 = vadd.f32 %v1333_v44, %v1332_v25 }
 0x108   :  { %v1100_v36 = vmul.f32 %v2089_v3, %v1099_v5  ;;  %v1137_v26 = vmul.f32 %v2087_v12, %v1136_v55  ;;  %v1028_v9 = vsel %vm1026_vm0, %v1025_v57, %v1027_v51  ;;  %v1338_v20 = vmul.f32 %v3571_v1, %v3571_v1 }
 0x109   :  { %v1238_v22 = vmax.f32 %v3599_v4, %v3589_v49  ;;  %v927_v34 = vadd.f32 -0.33333194, %v926_v54  ;;  %v1030_v12 = vsub.f32 0.0, %v1028_v9  ;;  %v1337_v42 = vadd.f32 %v1336_v10, %v1335_v19 }
 0x10a   :  { %v1101_v29 = vmul.f32 0.5, %v1100_v36  ;;  %v1138_v50 = vmul.f32 %v1137_v26, %v3497_v35  ;;  %v1352_v2 = vmul.f32 %v3528_v61, %v3503_v58  ;;  %v1353_v63 = vmul.f32 %v3562_v53, %v3507_v17 }
 0x10b   :  { %2090 = vrcp.f32 %v1238_v22  ;;  %v928_v8 = vmul.f32 %v927_v34, %v3414_v45  ;;  %v1031_v39 = vsel %vm1029_vm1, %v1028_v9, %v1030_v12  ;;  %v1063_v0 = vstv %s3578_s12  ;;  %v1322_v9 = vld [vmem:[#allocation3 + $0x16] sm:$0x1]  ;;  %s3909_s12 = sld [smem:[#allocation7 + $0xa]] }
 0x10c   :  { %v1140_v25 = vsel %vm1139_vm2, %v3497_v35, %v1138_v50  ;;  %vm931_vm5 = vcmp.gt.f32.partialorder %v3327_v37, %v3263_v31  ;;  %v1061_v44 = vsub.f32 %v1031_v39, %v1060_v27  ;;  %v3638_v45 = vadd.f32 %v1338_v20, %v1337_v42  ;;  %v1323_v20 = vld [vmem:[#allocation3 + $0x17] sm:$0x1] }
 0x10d   :  { %v3636_v58 = vsel %vm1141_vm4, %v1142_v38, %v1140_v25  ;;  %v929_v46 = vadd.f32 1.0, %v928_v8  ;;  %vm934_vm6 = vcmp.ge.f32.partialorder %v3166_v14, 0.0  ;;  %v1102_v17 = vsub.f32 1.5, %v1101_v29 }
 0x10e   :  { %v3642_v21 = vand.u32 2147483647, %v3636_v58  ;;  %vm937_vm7 = vcmp.ge.f32.partialorder %v3323_v23, 0.0  ;;  %v1064_v57 = vmul.f32 %v1063_v0, %v1061_v44  ;;  %v1354_v5 = vadd.f32 %v1353_v63, %v1352_v2 }
 0x10f   :  { %v1355_v27 = vmul.f32 %v3571_v1, %v3524_v13  ;;  %v3649_v35 = vmul.f32 %v3638_v45, %v3614_v28  ;;  %v930_v55 = vmul.f32 %v929_v46, %v3401_v33  ;;  %v1052_v51 = vstv %s3604_s13  ;;  %s3912_s13 = sld [smem:[#allocation7 + $0xb]] }
 0x110   :  { %v1146_v38 = vmax.f32 %v3642_v21, %v3543_v6  ;;  %2092 = vrsqrt.f32 %v3638_v45  ;;  %v1055_v54 = vstv %s3610_s14  ;;  %1066 = vst [vmem:[#allocation13 + $0x11] sm:$0x1] %v1064_v57  ;;  %v1239_v36 = vmin.f32 %v3599_v4, %v3589_v49  ;;  %s3917_s14 = sld [smem:[#allocation8 + $0x1]] }
 0x111   :  { %v2091_v19 = vpop.eup %2090  ;;  %2094 = vrsqrt.f32 %v3649_v35  ;;  %v1424_v13 = vsub.f32 %v3476_v62, %v3469_v59  ;;  %v932_v26 = vsub.f32 1.5707964, %v930_v55  ;;  %v3662_v10 = vmul.f32 %v2089_v3, %v1102_v17  ;;  %v1321_v3 = vld [vmem:[#allocation3 + $0x15] sm:$0x1] }
 0x112   :  { %2096 = vrcp.f32 %v1146_v38  ;;  %v1241_v33 = vmul.f32 %v2091_v19, %v1238_v22  ;;  %v1147_v34 = vmin.f32 %v3642_v21, %v3543_v6  ;;  %v3666_v12 = vadd.f32 %v1355_v27, %v1354_v5 }
 0x113   :  { %v1425_v29 = vsub.f32 %v3483_v24, %v3474_v7  ;;  %v1426_v50 = vsub.f32 %v3512_v56, %v3510_v41  ;;  %v933_v59 = vsel %vm931_vm5, %v932_v26, %v930_v55  ;;  %vm1364_vm8 = vweird.f32 %v3649_v35 }
 0x114   :  { %v1242_v62 = vsub.f32 2.0, %v1241_v33  ;;  %v1434_v22 = vmul.f32 %v1424_v13, %v3571_v1  ;;  %v935_v42 = vsub.f32 3.1415927, %v933_v59  ;;  %v1428_v2 = vsub.f32 %v1322_v9, %v3537_v15 }
 0x115   :  { %v1429_v63 = vsub.f32 %v1323_v20, %v3547_v47  ;;  %v1436_v7 = vmul.f32 %v1424_v13, %v3562_v53  ;;  %v1430_v56 = vmul.f32 %v1425_v29, %v3571_v1  ;;  %v1431_v31 = vmul.f32 %v1426_v50, %v3562_v53 }
 0x116   :  { %v3680_v24 = vpop.eup %2092  ;;  %v1243_v41 = vmul.f32 %v2091_v19, %v1242_v62  ;;  %v1433_v37 = vmul.f32 %v1426_v50, %v3528_v61  ;;  %v936_v39 = vsel %vm934_vm6, %v933_v59, %v935_v42  ;;  %v1427_v0 = vsub.f32 %v1321_v3, %v3499_v40 }
 0x117   :  { %v2095_v8 = vpop.eup %2094  ;;  %v1437_v15 = vmul.f32 %v1425_v29, %v3528_v61  ;;  %v1439_v47 = vmul.f32 %v1429_v63, %v3562_v53  ;;  %v938_v44 = vsub.f32 0.0, %v936_v39  ;;  %v1440_v57 = vmul.f32 %v1428_v2, %v3571_v1 }
 0x118   :  { %v2097_v25 = vpop.eup %2096  ;;  %v3690_v46 = vmul.f32 %v1243_v41, %v1239_v36  ;;  %v1359_v17 = vmul.f32 %v2095_v8, %v3649_v35  ;;  %vm1365_vm9 = vweird.f32 %v2095_v8  ;;  %v3694_v27 = vsub.f32 %v1430_v56, %v1431_v31 }
 0x119   :  { %v1149_v5 = vmul.f32 %v2097_v25, %v1146_v38  ;;  %v3696_v14 = vsub.f32 %v1433_v37, %v1434_v22  ;;  %v939_v40 = vsel %vm937_vm7, %v936_v39, %v938_v44  ;;  %v3704_v36 = vsub.f32 %v1436_v7, %v1437_v15  ;;  %vm3721_vm11 = vmor %vm1364_vm8, %vm1365_vm9 }
 0x11a   :  { %v3702_v55 = vmul.f32 %v3690_v46, %v3690_v46  ;;  %v1360_v19 = vmul.f32 %v2095_v8, %v1359_v17  ;;  %v1053_v13 = vsub.f32 %v939_v40, %v1052_v51  ;;  %v1274_v38 = vmul.f32 %v3434_v48, %v3434_v48 }
 0x11b   :  { %v1150_v26 = vsub.f32 2.0, %v1149_v5  ;;  %v1275_v33 = vmul.f32 %v3410_v30, %v3410_v30  ;;  %v1442_v23 = vmul.f32 %v1427_v0, %v3571_v1  ;;  %v1443_v29 = vmul.f32 %v1429_v63, %v3528_v61 }
 0x11c   :  { %v1246_v9 = vmul.f32 -0.001516384, %v3702_v55  ;;  %v1361_v20 = vmul.f32 0.5, %v1360_v19  ;;  %v1056_v50 = vmul.f32 %v1055_v54, %v1053_v13  ;;  %v1277_v51 = vmul.f32 %v3424_v43, %v3424_v43 }
 0x11d   :  { %v1151_v59 = vmul.f32 %v2097_v25, %v1150_v26  ;;  %v1276_v62 = vadd.f32 %v1275_v33, %v1274_v38  ;;  %v1441_v42 = vsub.f32 %v1439_v47, %v1440_v57  ;;  %v1444_v48 = vsub.f32 %v1442_v23, %v1443_v29 }
 0x11e   :  { %v1247_v3 = vadd.f32 0.009606271, %v1246_v9  ;;  %v1362_v22 = vsub.f32 1.5, %v1361_v20  ;;  %1058 = vst [vmem:[#allocation13 + $0x10] sm:$0x1] %v1056_v50  ;;  %vm1105_vm10 = vcmp.eq.f32.partialorder %v3317_v18, inf  ;;  %v1445_v63 = vmul.f32 %v1428_v2, %v3528_v61 }
 0x11f   :  { %v3716_v30 = vmul.f32 %v1151_v59, %v1147_v34  ;;  %v1278_v7 = vadd.f32 %v1277_v51, %v1276_v62  ;;  %v1448_v43 = vmul.f32 %v3696_v14, %v3571_v1  ;;  %v1449_v34 = vmul.f32 %v3704_v36, %v3562_v53 }
 0x120   :  { %v1248_v41 = vmul.f32 %v1247_v3, %v3702_v55  ;;  %v1363_v56 = vmul.f32 %v2095_v8, %v1362_v22  ;;  %v1451_v31 = vmul.f32 %v3704_v36, %v3528_v61  ;;  %v1280_v2 = vmul.f32 %v3583_v32, %v3583_v32 }
 0x121   :  { %v3735_v35 = vmul.f32 %v3716_v30, %v3716_v30  ;;  %v1279_v37 = vmul.f32 %v1278_v7, %v3317_v18  ;;  %v1446_v39 = vmul.f32 %v1427_v0, %v3562_v53  ;;  %v1450_v25 = vsub.f32 %v1448_v43, %v1449_v34 }
 0x122   :  { %v1249_v15 = vadd.f32 -0.028581347, %v1248_v41  ;;  %v1367_v47 = vsel %vm3721_vm11, %v2095_v8, %v1363_v56  ;;  %v1452_v44 = vmul.f32 %v3694_v27, %v3571_v1  ;;  %v1454_v40 = vmul.f32 %v3694_v27, %v3562_v53 }
 0x123   :  { %v1154_v17 = vmul.f32 -0.001516384, %v3735_v35  ;;  %v1281_v57 = vmul.f32 %v1280_v2, %v1279_v37  ;;  %v1368_v5 = vmul.f32 %v1367_v47, %v3666_v12  ;;  %vm1107_vm12 = vcmp.eq.f32.partialorder %v3317_v18, 0.0 }
 0x124   :  { %v1250_v32 = vmul.f32 %v1249_v15, %v3702_v55  ;;  %v1453_v0 = vsub.f32 %v1451_v31, %v1452_v44  ;;  %v1455_v8 = vmul.f32 %v3696_v14, %v3528_v61  ;;  %v1458_v19 = vmul.f32 %v3680_v24, %v3638_v45 }
 0x125   :  { %v1155_v1 = vadd.f32 0.009606271, %v1154_v17  ;;  %2098 = vlog2.f32 %v1281_v57  ;;  %v3755_v13 = vclamps-f32 %v1368_v5, 1.0  ;;  %v1447_v26 = vsub.f32 %v1445_v63, %v1446_v39 }
 0x126   :  { %v1104_v12 = vmul.f32 %v3662_v10, %v3317_v18  ;;  %v1251_v53 = vadd.f32 0.055144176, %v1250_v32  ;;  %v1456_v38 = vsub.f32 %v1454_v40, %v1455_v8  ;;  %v1459_v33 = vmul.f32 %v3680_v24, %v1458_v19 }
 0x127   :  { %v1108_v9 = vand.u32 2147483648, %v3317_v18  ;;  %v1156_v20 = vmul.f32 %v1155_v1, %v3735_v35  ;;  %v1371_v61 = vmul.f32 %v3755_v13, %v3755_v13  ;;  %vm1463_vm13 = vweird.f32 %v3638_v45 }
 0x128   :  { %v1252_v23 = vmul.f32 %v1251_v53, %v3702_v55  ;;  %v1460_v29 = vmul.f32 0.5, %v1459_v33  ;;  %v1467_v50 = vmul.f32 %v1450_v25, %v1441_v42  ;;  %v1468_v10 = vmul.f32 %v1453_v0, %v1444_v48 }
 0x129   :  { %v1157_v59 = vadd.f32 -0.028581347, %v1156_v20  ;;  %v1372_v62 = vsub.f32 1.0, %v1371_v61  ;;  %vm1464_vm14 = vweird.f32 %v3680_v24  ;;  %v1470_v51 = vmul.f32 %v1456_v38, %v1447_v26 }
 0x12a   :  { %v1106_v3 = vsel %vm1105_vm10, %v3317_v18, %v1104_v12  ;;  %v1253_v22 = vadd.f32 -0.08222694, %v1252_v23  ;;  %v1461_v7 = vsub.f32 1.5, %v1460_v29  ;;  %v1469_v54 = vadd.f32 %v1468_v10, %v1467_v50  ;;  %vm1465_vm15 = vmor %vm1463_vm13, %vm1464_vm14 }
 0x12b   :  { %v2099_v63 = vpop.eup %2098  ;;  %v1158_v43 = vmul.f32 %v1157_v59, %v3735_v35  ;;  %v3775_v41 = vmax.f32 %v1372_v62, 0.0  ;;  %v1473_v56 = vmul.f32 %v1441_v42, %v3694_v27  ;;  %v1474_v34 = vmul.f32 %v1444_v48, %v3696_v14 }
 0x12c   :  { %v1254_v31 = vmul.f32 %v1253_v22, %v3702_v55  ;;  %v1283_v37 = vmul.f32 0.6931472, %v2099_v63  ;;  %v1462_v2 = vmul.f32 %v3680_v24, %v1461_v7  ;;  %v1471_v39 = vadd.f32 %v1470_v51, %v1469_v54 }
 0x12d   :  { %v1159_v15 = vadd.f32 0.055144176, %v1158_v43  ;;  %2100 = vrsqrt.f32 %v3775_v41  ;;  %v1109_v42 = vsel %vm1107_vm12, %v1108_v9, %v1106_v3  ;;  %v1475_v17 = vadd.f32 %v1474_v34, %v1473_v56 }
 0x12e   :  { %v1255_v47 = vadd.f32 0.10882225, %v1254_v31  ;;  %v3785_v25 = vadd.f32 %v1283_v37, %v3486_v16  ;;  %v3791_v44 = vsel %vm1465_vm15, %v3680_v24, %v1462_v2  ;;  %v1476_v5 = vmul.f32 %v1447_v26, %v3704_v36 }
 0x12f   :  { %v1160_v48 = vmul.f32 %v1159_v15, %v3735_v35  ;;  %v3795_v57 = vmul.f32 %v1471_v39, %v3791_v44  ;;  %v1286_v32 = vstv %s3766_s15  ;;  %v1289_v16 = vstv %s3768_s16  ;;  %s3921_s15 = sld [smem:[#allocation7 + $0xd]] }
 0x130   :  { %v1256_v45 = vmul.f32 %v1255_v47, %v3702_v55  ;;  %v1287_v8 = vsub.f32 %v1109_v42, %v1286_v32  ;;  %v3801_v1 = vadd.f32 %v1476_v5, %v1475_v17  ;;  %vm1381_vm0 = vcmp.eq.f32.partialorder %v3775_v41, inf  ;;  %s3927_s16 = sld [smem:[#allocation7 + $0xe]] }
 0x131   :  { %v1161_v40 = vadd.f32 -0.08222694, %v1160_v48  ;;  %v3804_v24 = vand.u32 2147483647, %v3795_v57  ;;  %v1384_v63 = vand.u32 2147483648, %v3775_v41  ;;  %vm1383_vm1 = vcmp.eq.f32.partialorder %v3775_v41, 0.0 }
 0x132   :  { %v1257_v0 = vadd.f32 -0.14248416, %v1256_v45  ;;  %v1290_v53 = vmul.f32 %v1289_v16, %v1287_v8  ;;  %v3809_v26 = vand.u32 2147483647, %v3801_v1  ;;  %vm1265_vm2 = vcmp.gt.f32.partialorder %v3599_v4, %v3589_v49 }
 0x133   :  { %v2101_v18 = vpop.eup %2100  ;;  %v1162_v19 = vmul.f32 %v1161_v40, %v3735_v35  ;;  %v3842_v39 = vand.u32 2147483647, %v3755_v13  ;;  %vm1268_vm3 = vcmp.ge.f32.partialorder %v3567_v52, 0.0  ;;  %vm1271_vm4 = vcmp.ge.f32.partialorder %v3586_v11, 0.0 }
 0x134   :  { %v1258_v12 = vmul.f32 %v1257_v0, %v3702_v55  ;;  %v1375_v38 = vmul.f32 %v2101_v18, %v3775_v41  ;;  %1292 = vst [vmem:[#allocation13 + $0x12] sm:$0x1] %v1290_v53  ;;  %v1480_v23 = vmax.f32 %v3804_v24, %v3809_v26  ;;  %vm1173_vm5 = vcmp.gt.f32.partialorder %v3642_v21, %v3543_v6 }
 0x135   :  { %v1163_v33 = vadd.f32 0.10882225, %v1162_v19  ;;  %v1302_v8 = vstv %s3821_s3  ;;  %v1305_v19 = vstv %s3823_s4  ;;  %vm1176_vm6 = vcmp.ge.f32.partialorder %v3457_v60, 0.0  ;;  %s3939_s3 = sld [smem:[#allocation7 + $0x11]] }
 0x136   :  { %v1259_v9 = vadd.f32 0.19996625, %v1258_v12  ;;  %v1376_v61 = vmul.f32 %v2101_v18, %v1375_v38  ;;  %2102 = vrcp.f32 %v1480_v23  ;;  %vm1179_vm7 = vcmp.ge.f32.partialorder %v3636_v58, 0.0  ;;  %s3944_s4 = sld [smem:[#allocation7 + $0x12]] }
 0x137   :  { %v1164_v20 = vmul.f32 %v1163_v33, %v3735_v35  ;;  %2104 = vrsqrt.f32 %v3614_v28  ;;  %v1297_v58 = vstv %s3818_s1  ;;  %s3936_s1 = sld [smem:[#allocation7 + $0x10]]  ;;  %vm1347_vm8 = vcmp.eq.f32.partialorder %v3614_v28, inf }
 0x138   :  { %v1260_v29 = vmul.f32 %v1259_v9, %v3702_v55  ;;  %v1377_v10 = vmul.f32 0.5, %v1376_v61  ;;  %vm1349_vm9 = vcmp.eq.f32.partialorder %v3614_v28, 0.0  ;;  %vm1507_vm10 = vcmp.gt.f32.partialorder %v3804_v24, %v3809_v26 }
 0x139   :  { %v1165_v50 = vadd.f32 -0.14248416, %v1164_v20  ;;  %vm1510_vm11 = vcmp.ge.f32.partialorder %v3801_v1, 0.0  ;;  %vm1513_vm12 = vcmp.ge.f32.partialorder %v3795_v57, 0.0  ;;  %vm1418_vm14 = vcmp.ge.f32.partialorder %v3755_v13, 0.0 }
 0x13a   :  { %v1261_v59 = vadd.f32 -0.33333194, %v1260_v29  ;;  %v1378_v51 = vsub.f32 1.5, %v1377_v10 }
 0x13b   :  { %v1166_v62 = vmul.f32 %v1165_v50, %v3735_v35  ;;  %v1294_v50 = vstv %s3815_s17  ;;  %s3929_s17 = sld [smem:[#allocation7 + $0xf]] }
 0x13c   :  { %v1262_v3 = vmul.f32 %v1261_v59, %v3702_v55  ;;  %v1379_v7 = vmul.f32 %v2101_v18, %v1378_v51  ;;  %v2103_v43 = vpop.eup %2102 }
 0x13d   :  { %v1167_v22 = vadd.f32 0.19996625, %v1166_v62  ;;  %v1483_v31 = vmul.f32 %v2103_v43, %v1480_v23  ;;  %v3858_v4 = vpop.eup %2104 }
 0x13e   :  { %v1263_v54 = vadd.f32 1.0, %v1262_v3  ;;  %v1380_v55 = vmul.f32 %v1379_v7, %v3775_v41  ;;  %v1341_v16 = vmul.f32 %v3858_v4, %v3614_v28 }
 0x13f   :  { %v1168_v56 = vmul.f32 %v1167_v22, %v3735_v35  ;;  %v1484_v42 = vsub.f32 2.0, %v1483_v31 }
 0x140   :  { %v1264_v34 = vmul.f32 %v1263_v54, %v3690_v46  ;;  %v1382_v2 = vsel %vm1381_vm0, %v3775_v41, %v1380_v55  ;;  %v1481_v46 = vmin.f32 %v3804_v24, %v3809_v26  ;;  %v1342_v21 = vmul.f32 %v3858_v4, %v1341_v16 }
 0x141   :  { %v1169_v37 = vadd.f32 -0.33333194, %v1168_v56  ;;  %v3846_v47 = vsel %vm1383_vm1, %v1384_v63, %v1382_v2  ;;  %v1485_v17 = vmul.f32 %v2103_v43, %v1484_v42  ;;  %v1516_v63 = vmul.f32 %v3694_v27, %v3694_v27 }
 0x142   :  { %v1266_v15 = vsub.f32 1.5707964, %v1264_v34  ;;  %v3854_v49 = vand.u32 2147483647, %v3846_v47  ;;  %v1343_v10 = vmul.f32 0.5, %v1342_v21  ;;  %v1517_v56 = vmul.f32 %v3696_v14, %v3696_v14 }
 0x143   :  { %v1170_v48 = vmul.f32 %v1169_v37, %v3735_v35  ;;  %v3868_v35 = vmul.f32 %v1485_v17, %v1481_v46  ;;  %v1519_v37 = vmul.f32 %v3704_v36, %v3704_v36  ;;  %v1350_v16 = vand.u32 2147483648, %v3614_v28 }
 0x144   :  { %v1267_v41 = vsel %vm1265_vm2, %v1266_v15, %v1264_v34  ;;  %v1388_v40 = vmax.f32 %v3854_v49, %v3842_v39  ;;  %v1389_v59 = vmin.f32 %v3854_v49, %v3842_v39  ;;  %v1344_v43 = vsub.f32 1.5, %v1343_v10 }
 0x145   :  { %v1171_v45 = vadd.f32 1.0, %v1170_v48  ;;  %v1269_v5 = vsub.f32 3.1415927, %v1267_v41  ;;  %v3882_v11 = vmul.f32 %v3868_v35, %v3868_v35  ;;  %v1518_v2 = vadd.f32 %v1517_v56, %v1516_v63 }
 0x146   :  { %2106 = vrcp.f32 %v1388_v40  ;;  %v1345_v15 = vmul.f32 %v3858_v4, %v1344_v43  ;;  %v1522_v48 = vmul.f32 %v3791_v44, %v3791_v44  ;;  %v1644_v26 = vstv %s3947_s30  ;;  %s4109_s30 = sld [smem:[#allocation7 + $0x29]] }
 0x147   :  { %v1172_v52 = vmul.f32 %v1171_v45, %v3716_v30  ;;  %v1270_v32 = vsel %vm1268_vm3, %v1267_v41, %v1269_v5  ;;  %v1488_v12 = vmul.f32 -0.001516384, %v3882_v11  ;;  %v1520_v46 = vadd.f32 %v1519_v37, %v1518_v2 }
 0x148   :  { %v1272_v0 = vsub.f32 0.0, %v1270_v32  ;;  %v1346_v4 = vmul.f32 %v1345_v15, %v3614_v28  ;;  %v1589_v2 = vstv %s3870_s26  ;;  %s4038_s26 = sld [smem:[#allocation7 + $0x1e]]  ;;  %vm1415_vm13 = vcmp.gt.f32.partialorder %v3854_v49, %v3842_v39 }
 0x149   :  { %v1174_v18 = vsub.f32 1.5707964, %v1172_v52  ;;  %v1489_v33 = vadd.f32 0.009606271, %v1488_v12  ;;  %v1521_v41 = vmul.f32 %v1520_v46, %v3614_v28  ;;  %v1567_v12 = vstv %s3836_s20  ;;  %s3988_s20 = sld [smem:[#allocation7 + $0x17]] }
 0x14a   :  { %v1273_v30 = vsel %vm1271_vm4, %v1270_v32, %v1272_v0  ;;  %v1564_v32 = vstv %s3828_s18  ;;  %s3977_s18 = sld [smem:[#allocation7 + $0x16]]  ;;  %vm1421_vm15 = vcmp.ge.f32.partialorder %v3846_v47, 0.0 }
 0x14b   :  { %v1175_v53 = vsel %vm1173_vm5, %v1174_v18, %v1172_v52  ;;  %v1303_v6 = vsub.f32 %v1273_v30, %v1302_v8  ;;  %v1490_v60 = vmul.f32 %v1489_v33, %v3882_v11  ;;  %v1523_v5 = vmul.f32 %v1522_v48, %v1521_v41  ;;  %v3957_v52 = vld [vmem:[#allocation3] sm:$0x1]  ;;  %v3966_v30 = vld [vmem:[#allocation3 + $0x1] sm:$0x1] }
 0x14c   :  { %v1177_v38 = vsub.f32 3.1415927, %v1175_v53  ;;  %v2107_v9 = vpop.eup %2106  ;;  %v1565_v0 = vmul.f32 %v1564_v32, %v3957_v52  ;;  %v1582_v33 = vstv %s3856_s23  ;;  %s4009_s23 = sld [smem:[#allocation7 + $0x1a]]  ;;  %v4025_v32 = vld [vmem:[#allocation3 + $0x11] sm:$0x1] }
 0x14d   :  { %v1306_v20 = vmul.f32 %v1305_v19, %v1303_v6  ;;  %v1391_v23 = vmul.f32 %v2107_v9, %v1388_v40  ;;  %v1491_v51 = vadd.f32 -0.028581347, %v1490_v60  ;;  %2108 = vlog2.f32 %v1523_v5  ;;  %v3968_v19 = vld [vmem:[#allocation3 + $0x7] sm:$0x1] }
 0x14e   :  { %v1178_v61 = vsel %vm1176_vm6, %v1175_v53, %v1177_v38  ;;  %v1570_v53 = vstv %s3844_s21  ;;  %v1348_v6 = vsel %vm1347_vm8, %v3614_v28, %v1346_v4  ;;  %v1568_v21 = vadd.f32 %v1567_v12, %v1565_v0  ;;  %s4001_s21 = sld [smem:[#allocation8 + $0x2]]  ;;  %v4034_v12 = vld [vmem:[#allocation3 + $0x15] sm:$0x1] }
 0x14f   :  { %v1180_v29 = vsub.f32 0.0, %v1178_v61  ;;  %1308 = vst [vmem:[#allocation13 + $0x14] sm:$0x1] %v1306_v20  ;;  %v1392_v62 = vsub.f32 2.0, %v1391_v23  ;;  %v1492_v54 = vmul.f32 %v1491_v51, %v3882_v11  ;;  %v1571_v38 = vmul.f32 %v1570_v53, %v3966_v30  ;;  %v3982_v23 = vld [vmem:[#allocation3 + $0x8] sm:$0x1] }
 0x150   :  { %v1574_v60 = vstv %s3850_s22  ;;  %v1583_v10 = vmul.f32 %v1582_v33, %v3968_v19  ;;  %s4005_s22 = sld [smem:[#allocation7 + $0x19]]  ;;  %v1531_v4 = vstv %s3886_s29  ;;  %v1536_v5 = vstv %s3884_s28 }
 0x151   :  { %v1181_v3 = vsel %vm1179_vm7, %v1178_v61, %v1180_v29  ;;  %v1393_v7 = vmul.f32 %v2107_v9, %v1392_v62  ;;  %v1493_v31 = vadd.f32 0.055144176, %v1492_v54  ;;  %v3980_v61 = vld [vmem:[#allocation3 + $0x2] sm:$0x1]  ;;  %v1572_v29 = vadd.f32 %v1571_v38, %v1568_v21  ;;  %s4056_s29 = sld [smem:[#allocation7 + $0x20]] }
 0x152   :  { %v1295_v22 = vsub.f32 %v1181_v3, %v1294_v50  ;;  %v1575_v50 = vmul.f32 %v1574_v60, %v3980_v61  ;;  %v1351_v62 = vsel %vm1349_vm9, %v1350_v16, %v1348_v6  ;;  %v1544_v0 = vstv %s3894_s2  ;;  %s4135_s2 = sld [smem:[#allocation7 + $0x2d]] }
 0x153   :  { %v3923_v34 = vmul.f32 %v1393_v7, %v1389_v59  ;;  %v1494_v14 = vmul.f32 %v1493_v31, %v3882_v11  ;;  %v1585_v59 = vstv %s3865_s25  ;;  %v1578_v7 = vstv %s3861_s24  ;;  %v2109_v54 = vpop.eup %2108  ;;  %s4027_s24 = sld [smem:[#allocation7 + $0x1c]] }
 0x154   :  { %v1298_v55 = vmul.f32 %v1297_v58, %v1295_v22  ;;  %v3993_v58 = vld [vmem:[#allocation3 + $0x6] sm:$0x1]  ;;  %v3995_v22 = vld [vmem:[#allocation3 + $0xf] sm:$0x1]  ;;  %v1576_v63 = vadd.f32 %v1575_v50, %v1572_v29  ;;  %v1586_v56 = vmul.f32 %v1585_v59, %v3982_v23  ;;  %v1525_v37 = vmul.f32 0.6931472, %v2109_v54 }
 0x155   :  { %v3933_v27 = vmul.f32 %v3923_v34, %v3923_v34  ;;  %v1495_v42 = vadd.f32 -0.08222694, %v1494_v14  ;;  %v1579_v43 = vmul.f32 %v1578_v7, %v3993_v58  ;;  %v1590_v46 = vmul.f32 %v1589_v2, %v3995_v22  ;;  %s4032_s25 = sld [smem:[#allocation7 + $0x1d]] }
 0x156   :  { %1300 = vst [vmem:[#allocation13 + $0x13] sm:$0x1] %v1298_v55  ;;  %v1615_v55 = vstv %s3833_s19  ;;  %v1587_v15 = vadd.f32 %v1586_v56, %v1583_v10  ;;  %v4013_v41 = vadd.f32 %v1525_v37, %v3785_v25  ;;  %s4016_s19 = sld [smem:[#allocation7 + $0x1b]]  ;;  %v1593_v6 = vstv %s3898_s10 }
 0x157   :  { %v1396_v36 = vmul.f32 -0.001516384, %v3933_v27  ;;  %v1496_v45 = vmul.f32 %v1495_v42, %v3882_v11  ;;  %v1580_v14 = vadd.f32 %v1579_v43, %v1576_v63  ;;  %v1597_v21 = vstv %s3902_s11  ;;  %s4063_s10 = sld [smem:[#allocation7 + $0x21]] }
 0x158   :  { %v1591_v53 = vadd.f32 %v1590_v46, %v1587_v15  ;;  %v1598_v29 = vmul.f32 %v1597_v21, %v4025_v32  ;;  %v1600_v50 = vstv %s3905_s0  ;;  %v1604_v10 = vstv %s3909_s12  ;;  %s4066_s11 = sld [smem:[#allocation7 + $0x22]] }
 0x159   :  { %v1397_v17 = vadd.f32 0.009606271, %v1396_v36  ;;  %v1497_v40 = vadd.f32 0.10882225, %v1496_v45  ;;  %v1667_v36 = vstv %s3963_s5  ;;  %v1608_v59 = vstv %s3912_s13  ;;  %s4071_s0 = sld [smem:[#allocation7 + $0x23]] }
 0x15a   :  { %v1601_v7 = vmul.f32 %v1600_v50, %v4034_v12  ;;  %v1618_v43 = vstv %s3917_s14  ;;  %v1621_v56 = vstv %s3921_s15  ;;  %v1625_v46 = vstv %s3927_s16  ;;  %s4075_s12 = sld [smem:[#allocation7 + $0x24]] }
 0x15b   :  { %v1398_v44 = vmul.f32 %v1397_v17, %v3933_v27  ;;  %v1498_v18 = vmul.f32 %v1497_v40, %v3882_v11  ;;  %v1528_v17 = vstv %s3875_s27  ;;  %v4023_v40 = vld [vmem:[#allocation3 + $0x10] sm:$0x1]  ;;  %s4052_s27 = sld [smem:[#allocation7 + $0x1f]]  ;;  %v1622_v15 = vmul.f32 %v1621_v56, %v3966_v30 }
 0x15c   :  { %v1529_v45 = vsub.f32 %v1351_v62, %v1528_v17  ;;  %v1594_v60 = vmul.f32 %v1593_v6, %v4023_v40  ;;  %v1616_v62 = vmul.f32 %v1615_v55, %v3957_v52  ;;  %s4080_s13 = sld [smem:[#allocation8 + $0x3]]  ;;  %v1668_v57 = vmul.f32 %v1667_v36, %v3957_v52 }
 0x15d   :  { %v1399_v8 = vadd.f32 -0.028581347, %v1398_v44  ;;  %v1499_v20 = vadd.f32 -0.14248416, %v1498_v18  ;;  %v1539_v44 = vstv %s3890_s8  ;;  %s4086_s14 = sld [smem:[#allocation7 + $0x25]]  ;;  %v1677_v36 = vstv %s4009_s23 }
 0x15e   :  { %v1532_v18 = vmul.f32 %v1531_v4, %v1529_v45  ;;  %v1619_v2 = vadd.f32 %v1618_v43, %v1616_v62  ;;  %s4090_s15 = sld [smem:[#allocation7 + $0x26]] }
 0x15f   :  { %v1400_v9 = vmul.f32 %v1399_v8, %v3933_v27  ;;  %v1500_v3 = vmul.f32 %v1499_v20, %v3882_v11  ;;  %v1547_v8 = vstv %s3896_s9  ;;  %v4044_v20 = vld [vmem:[#allocation3 + $0x17] sm:$0x1]  ;;  %s4095_s16 = sld [smem:[#allocation7 + $0x27]] }
 0x160   :  { %1534 = vst [vmem:[#allocation13 + $0x15] sm:$0x1] %v1532_v18  ;;  %v1609_v63 = vmul.f32 %v1608_v59, %v4044_v20  ;;  %v1623_v4 = vadd.f32 %v1622_v15, %v1619_v2  ;;  %v1659_v2 = vstv %s3988_s20  ;;  %s4140_s5 = sld [smem:[#allocation7 + $0x2e]] }
 0x161   :  { %v1401_v51 = vadd.f32 0.055144176, %v1400_v9  ;;  %v1501_v31 = vadd.f32 0.19996625, %v1500_v3  ;;  %v4042_v9 = vld [vmem:[#allocation3 + $0x16] sm:$0x1]  ;;  %v1595_v3 = vadd.f32 %v1594_v60, %v1591_v53 }
 0x162   :  { %v1605_v54 = vmul.f32 %v1604_v10, %v4042_v9  ;;  %s4145_s9 = sld [smem:[#allocation7 + $0x2f]] }
 0x163   :  { %v1402_v28 = vmul.f32 %v1401_v51, %v3933_v27  ;;  %v1502_v48 = vmul.f32 %v1501_v31, %v3882_v11  ;;  %v1602_v31 = vadd.f32 %v1601_v7, %v1598_v29  ;;  %v1611_v37 = vadd.f32 %v1595_v3, %v1580_v14  ;;  %s4165_s20 = sld [smem:[#allocation7 + $0x32]] }
 0x164   :  { %v1640_v29 = vstv %s3944_s4  ;;  %s4154_s4 = sld [smem:[#allocation8 + $0x4]] }
 0x165   :  { %v1403_v42 = vadd.f32 -0.08222694, %v1402_v28  ;;  %v1503_v16 = vadd.f32 -0.33333194, %v1502_v48  ;;  %v1606_v45 = vadd.f32 %v1605_v54, %v1602_v31  ;;  %v1641_v24 = vmul.f32 %v1640_v29, %v3995_v22  ;;  %s4180_s23 = sld [smem:[#allocation7 + $0x35]] }
 0x166   :  { %v1648_v54 = vstv %s3950_s7  ;;  %s4122_s7 = sld [smem:[#allocation7 + $0x2b]]  ;;  %v1733_v47 = vstv %s4095_s16 }
 0x167   :  { %v1404_v25 = vmul.f32 %v1403_v42, %v3933_v27  ;;  %v1504_v33 = vmul.f32 %v1503_v16, %v3882_v11  ;;  %v1629_v42 = vstv %s3929_s17  ;;  %v1636_v16 = vstv %s3939_s3  ;;  %s4102_s17 = sld [smem:[#allocation7 + $0x28]] }
 0x168   :  { %v1630_v14 = vmul.f32 %v1629_v42, %v3993_v58  ;;  %v1610_v6 = vadd.f32 %v1609_v63, %v1606_v45  ;;  %v1637_v60 = vmul.f32 %v1636_v16, %v3982_v23  ;;  %v1651_v63 = vstv %s3953_s6  ;;  %s4117_s6 = sld [smem:[#allocation7 + $0x2a]] }
 0x169   :  { %v1405_v38 = vadd.f32 0.10882225, %v1404_v25  ;;  %v1505_v51 = vadd.f32 1.0, %v1504_v33  ;;  %v1633_v25 = vstv %s3936_s1  ;;  %v1649_v56 = vmul.f32 %v1648_v54, %v4025_v32  ;;  %s4129_s1 = sld [smem:[#allocation7 + $0x2c]] }
 0x16a   :  { %v1634_v21 = vmul.f32 %v1633_v25, %v3968_v19  ;;  %v1612_v10 = vadd.f32 %v1611_v37, %v1610_v6  ;;  %v1652_v1 = vmul.f32 %v1651_v63, %v4034_v12  ;;  %v1673_v45 = vstv %s4005_s22  ;;  %s4149_s3 = sld [smem:[#allocation7 + $0x30]] }
 0x16b   :  { %v1406_v11 = vmul.f32 %v1405_v38, %v3933_v27  ;;  %v1506_v28 = vmul.f32 %v1505_v51, %v3868_v35  ;;  %v1626_v35 = vmul.f32 %v1625_v46, %v3980_v61  ;;  %v1645_v51 = vmul.f32 %v1644_v26, %v4023_v40  ;;  %s4176_s22 = sld [smem:[#allocation7 + $0x34]] }
 0x16c   :  { %1613 = vst [vmem:[#allocation13] sm:$0x1] %v1612_v10  ;;  %v1653_v42 = vadd.f32 %v1652_v1, %v1649_v56  ;;  %v1692_v10 = vstv %s4038_s26  ;;  %v1703_v54 = vstv %s4063_s10  ;;  %s4201_s26 = sld [smem:[#allocation7 + $0x39]] }
 0x16d   :  { %v1407_v55 = vadd.f32 -0.14248416, %v1406_v11  ;;  %v1508_v17 = vsub.f32 1.5707964, %v1506_v28  ;;  %v1627_v33 = vadd.f32 %v1626_v35, %v1623_v4  ;;  %v1638_v11 = vadd.f32 %v1637_v60, %v1634_v21  ;;  %s4207_s28 = sld [smem:[#allocation7 + $0x3a]] }
 0x16e   :  { %v1685_v21 = vstv %s4027_s24  ;;  %v1688_v60 = vstv %s4032_s25  ;;  %v1704_v49 = vmul.f32 %v1703_v54, %v4034_v12  ;;  %s4191_s24 = sld [smem:[#allocation7 + $0x37]] }
 0x16f   :  { %v1408_v48 = vmul.f32 %v1407_v55, %v3933_v27  ;;  %v1509_v53 = vsel %vm1507_vm10, %v1508_v17, %v1506_v28  ;;  %v1631_v62 = vadd.f32 %v1630_v14, %v1627_v33  ;;  %v1642_v43 = vadd.f32 %v1641_v24, %v1638_v11  ;;  %s4196_s25 = sld [smem:[#allocation7 + $0x38]] }
 0x170   :  { %v1511_v38 = vsub.f32 3.1415927, %v1509_v53  ;;  %v1655_v55 = vstv %s3977_s18  ;;  %v1670_v17 = vstv %s4001_s21  ;;  %v1674_v14 = vmul.f32 %v1673_v45, %v3966_v30  ;;  %s4161_s18 = sld [smem:[#allocation7 + $0x31]] }
 0x171   :  { %v1409_v18 = vadd.f32 0.19996625, %v1408_v48  ;;  %v1656_v37 = vmul.f32 %v1655_v55, %v4042_v9  ;;  %v1646_v46 = vadd.f32 %v1645_v51, %v1642_v43  ;;  %v1660_v48 = vmul.f32 %v1659_v2, %v4044_v20  ;;  %s4170_s21 = sld [smem:[#allocation7 + $0x33]] }
 0x172   :  { %v1512_v59 = vsel %vm1510_vm11, %v1509_v53, %v1511_v38  ;;  %v1671_v16 = vadd.f32 %v1670_v17, %v1668_v57  ;;  %v1696_v24 = vstv %s4052_s27  ;;  %v1707_v43 = vstv %s4066_s11  ;;  %s4212_s27 = sld [smem:[#allocation7 + $0x3b]] }
 0x173   :  { %v1410_v50 = vmul.f32 %v1409_v18, %v3933_v27  ;;  %v1514_v7 = vsub.f32 0.0, %v1512_v59  ;;  %v1657_v35 = vadd.f32 %v1656_v37, %v1653_v42  ;;  %v1662_v4 = vadd.f32 %v1646_v46, %v1631_v62  ;;  %s4217_s8 = sld [smem:[#allocation7 + $0x3c]] }
 0x174   :  { %v1681_v18 = vstv %s4016_s19  ;;  %v1675_v33 = vadd.f32 %v1674_v14, %v1671_v16  ;;  %v1693_v62 = vmul.f32 %v1692_v10, %v3995_v22  ;;  %v1697_v11 = vmul.f32 %v1696_v24, %v4023_v40  ;;  %s4185_s19 = sld [smem:[#allocation7 + $0x36]] }
 0x175   :  { %v1411_v3 = vadd.f32 -0.33333194, %v1410_v50  ;;  %v1515_v31 = vsel %vm1513_vm12, %v1512_v59, %v1514_v7  ;;  %v1661_v53 = vadd.f32 %v1660_v48, %v1657_v35  ;;  %v1682_v6 = vmul.f32 %v1681_v18, %v3993_v58  ;;  %s4227_s10 = sld [smem:[#allocation7 + $0x3d]] }
 0x176   :  { %v1545_v15 = vsub.f32 %v1515_v31, %v1544_v0  ;;  %v1689_v50 = vmul.f32 %v1688_v60, %v3982_v23  ;;  %v1700_v7 = vstv %s4056_s29  ;;  %v1708_v55 = vmul.f32 %v1707_v43, %v4042_v9  ;;  %s4222_s29 = sld [smem:[#allocation8 + $0x5]] }
 0x177   :  { %v1412_v28 = vmul.f32 %v1411_v3, %v3933_v27  ;;  %v1663_v29 = vadd.f32 %v1662_v4, %v1661_v53  ;;  %v1701_v39 = vmul.f32 %v1700_v7, %v4025_v32  ;;  %v1722_v42 = vstv %s4080_s13  ;;  %s4232_s11 = sld [smem:[#allocation7 + $0x3e]] }
 0x178   :  { %v1548_v0 = vmul.f32 %v1547_v8, %v1545_v15  ;;  %v1678_v8 = vmul.f32 %v1677_v36, %v3980_v61  ;;  %v1719_v15 = vstv %s4075_s12  ;;  %v1725_v48 = vstv %s4086_s14  ;;  %s4242_s12 = sld [smem:[#allocation7 + $0x40]] }
 0x179   :  { %v1413_v27 = vadd.f32 1.0, %v1412_v28  ;;  %1665 = vst [vmem:[#allocation13 + $0x1] sm:$0x1] %v1663_v29  ;;  %v1711_v28 = vstv %s4071_s0  ;;  %v1705_v37 = vadd.f32 %v1704_v49, %v1701_v39  ;;  %v1720_v13 = vmul.f32 %v1719_v15, %v3957_v52  ;;  %s4237_s0 = sld [smem:[#allocation7 + $0x3f]] }
 0x17a   :  { %1550 = vst [vmem:[#allocation13 + $0x17] sm:$0x1] %v1548_v0  ;;  %v1679_v59 = vadd.f32 %v1678_v8, %v1675_v33  ;;  %v1712_v2 = vmul.f32 %v1711_v28, %v4044_v20  ;;  %v1726_v17 = vmul.f32 %v1725_v48, %v3966_v30  ;;  %v1729_v45 = vstv %s4090_s15  ;;  %s4246_s13 = sld [smem:[#allocation7 + $0x41]] }
 0x17b   :  { %v1414_v25 = vmul.f32 %v1413_v27, %v3923_v34  ;;  %v1686_v34 = vmul.f32 %v1685_v21, %v3968_v19  ;;  %v1709_v57 = vadd.f32 %v1708_v55, %v1705_v37  ;;  %v1723_v4 = vadd.f32 %v1722_v42, %v1720_v13  ;;  %s4251_s14 = sld [smem:[#allocation7 + $0x42]] }
 0x17c   :  { %v1683_v63 = vadd.f32 %v1682_v6, %v1679_v59  ;;  %v1730_v14 = vmul.f32 %v1729_v45, %v3980_v61  ;;  %v1737_v16 = vstv %s4102_s17  ;;  %v1740_v36 = vstv %s4109_s30  ;;  %s4255_s15 = sld [smem:[#allocation7 + $0x43]] }
 0x17d   :  { %v1416_v38 = vsub.f32 1.5707964, %v1414_v25  ;;  %v1690_v3 = vadd.f32 %v1689_v50, %v1686_v34  ;;  %v1727_v53 = vadd.f32 %v1726_v17, %v1723_v4  ;;  %v1738_v8 = vmul.f32 %v1737_v16, %v3968_v19  ;;  %s4261_s16 = sld [smem:[#allocation7 + $0x44]] }
 0x17e   :  { %v1741_v21 = vmul.f32 %v1740_v36, %v3982_v23  ;;  %v1748_v33 = vstv %s4122_s7  ;;  %v1752_v29 = vstv %s4129_s1  ;;  %v1755_v24 = vstv %s4135_s2  ;;  %s4264_s17 = sld [smem:[#allocation7 + $0x45]] }
 0x17f   :  { %v1417_v26 = vsel %vm1415_vm13, %v1416_v38, %v1414_v25  ;;  %v1694_v1 = vadd.f32 %v1693_v62, %v1690_v3  ;;  %v1713_v25 = vadd.f32 %v1712_v2, %v1709_v57  ;;  %v1744_v38 = vstv %s4117_s6  ;;  %s4270_s30 = sld [smem:[#allocation7 + $0x46]] }
 0x180   :  { %v1419_v51 = vsub.f32 3.1415927, %v1417_v26  ;;  %v1731_v34 = vadd.f32 %v1730_v14, %v1727_v53  ;;  %v1749_v60 = vmul.f32 %v1748_v33, %v4023_v40  ;;  %v1742_v50 = vadd.f32 %v1741_v21, %v1738_v8  ;;  %s4274_s6 = sld [smem:[#allocation7 + $0x47]] }
 0x181   :  { %v1698_v46 = vadd.f32 %v1697_v11, %v1694_v1  ;;  %v1753_v10 = vmul.f32 %v1752_v29, %v4025_v32  ;;  %v1756_v62 = vmul.f32 %v1755_v24, %v4034_v12  ;;  %v1771_v54 = vstv %s4149_s3  ;;  %s4391_s2 = sld [smem:[#allocation35_spill]] }
 0x182   :  { %v1420_v56 = vsel %vm1418_vm14, %v1417_v26, %v1419_v51  ;;  %v1759_v26 = vstv %s4140_s5  ;;  %v1763_v51 = vstv %s4145_s9  ;;  %v1772_v49 = vmul.f32 %v1771_v54, %v3957_v52  ;;  %s2223_s5 = smov [#allocation13]  }
 0x183   :  { %v1422_v31 = vsub.f32 0.0, %v1420_v56  ;;  %v1714_v35 = vadd.f32 %v1698_v46, %v1683_v63  ;;  %v1760_v11 = vmul.f32 %v1759_v26, %v4042_v9  ;;  %v1764_v7 = vmul.f32 %v1763_v51, %v4044_v20  ;;  %s1884_s9 = sshll.u32 %s2223_s5, 4  ;;  %s1885_s9 = int_to_ptr.vmem [resolvable:$true] %s1884_s9 }
 0x184   :  { %v1774_v63 = vstv %s4154_s4  ;;  %v1757_v39 = vadd.f32 %v1756_v62, %v1753_v10  ;;  %v1777_v43 = vstv %s4161_s18  ;;  %v1789_v46 = vstv %s4176_s22  ;;  %s4392_s18 = sld [smem:[#allocation36_spill]]  ;;  %s4394_s22 = smov 16  }
 0x185   :  { %v1423_v27 = vsel %vm1421_vm15, %v1420_v56, %v1422_v31  ;;  %v1715_v6 = vadd.f32 %v1714_v35, %v1713_v25  ;;  %v1781_v56 = vstv %s4165_s20  ;;  %v1778_v55 = vmul.f32 %v1777_v43, %v3966_v30 }
 0x186   :  { %v1537_v0 = vsub.f32 %v1423_v27, %v1536_v5  ;;  %v1734_v5 = vmul.f32 %v1733_v47, %v3993_v58  ;;  %v1782_v28 = vmul.f32 %v1781_v56, %v3980_v61  ;;  %v1785_v31 = vstv %s4170_s21  ;;  %s4393_s21 = smov 1  }
 0x187   :  { %1717 = vst [vmem:[#allocation13 + $0x2] sm:$0x1] %v1715_v6  ;;  %v1761_v37 = vadd.f32 %v1760_v11, %v1757_v39  ;;  %v1775_v2 = vadd.f32 %v1774_v63, %v1772_v49  ;;  %v1786_v15 = vmul.f32 %v1785_v31, %v3993_v58  ;;  %v1790_v42 = vmul.f32 %v1789_v46, %v3968_v19 }
 0x188   :  { %v1540_v18 = vmul.f32 %v1539_v44, %v1537_v0  ;;  %v1745_v44 = vmul.f32 %v1744_v38, %v3995_v22  ;;  %v1735_v59 = vadd.f32 %v1734_v5, %v1731_v34  ;;  %v1792_v48 = vstv %s4180_s23 }
 0x189   :  { %v1796_v27 = vstv %s4185_s19  ;;  %v1765_v57 = vadd.f32 %v1764_v7, %v1761_v37  ;;  %v1779_v17 = vadd.f32 %v1778_v55, %v1775_v2  ;;  %v1793_v45 = vmul.f32 %v1792_v48, %v3982_v23 }
 0x18a   :  { %1542 = vst [vmem:[#allocation13 + $0x16] sm:$0x1] %v1540_v18  ;;  %v1746_v3 = vadd.f32 %v1745_v44, %v1742_v50  ;;  %v1797_v0 = vmul.f32 %v1796_v27, %v3995_v22  ;;  %v1800_v35 = vstv %s4191_s24  ;;  %v1804_v4 = vstv %s4196_s25  ;;  %s1886_s20 = sshll.u32 %s4392_s18, 4  ;;  %s1887_s20 = int_to_ptr.hbm [resolvable:$true] %s1886_s20 }
 0x18b   :  { %v1807_v14 = vstv %s4201_s26  ;;  %v1811_v25 = vstv %s4207_s28  ;;  %v1783_v16 = vadd.f32 %v1782_v28, %v1779_v17  ;;  %v1794_v36 = vadd.f32 %v1793_v45, %v1790_v42 }
 0x18c   :  { %v1750_v1 = vadd.f32 %v1749_v60, %v1746_v3  ;;  %v1801_v18 = vmul.f32 %v1800_v35, %v4023_v40  ;;  %v1805_v53 = vmul.f32 %v1804_v4, %v4025_v32  ;;  %v1808_v5 = vmul.f32 %v1807_v14, %v4034_v12 }
 0x18d   :  { %v1812_v8 = vmul.f32 %v1811_v25, %v4042_v9  ;;  %v1815_v6 = vstv %s4212_s27  ;;  %v1787_v21 = vadd.f32 %v1786_v15, %v1783_v16  ;;  %v1798_v38 = vadd.f32 %v1797_v0, %v1794_v36 }
 0x18e   :  { %v1766_v13 = vadd.f32 %v1750_v1, %v1735_v59  ;;  %v1816_v33 = vmul.f32 %v1815_v6, %v4044_v20  ;;  %v1823_v34 = vstv %s4217_s8  ;;  %v1809_v44 = vadd.f32 %v1808_v5, %v1805_v53 }
 0x18f   :  { %v1824_v60 = vmul.f32 %v1823_v34, %v3957_v52  ;;  %v1826_v29 = vstv %s4222_s29  ;;  %v1829_v50 = vstv %s4227_s10  ;;  %v1802_v10 = vadd.f32 %v1801_v18, %v1798_v38 }
 0x190   :  { %v1767_v47 = vadd.f32 %v1766_v13, %v1765_v57  ;;  %v1830_v24 = vmul.f32 %v1829_v50, %v3966_v30  ;;  %v1833_v26 = vstv %s4232_s11  ;;  %v1837_v59 = vstv %s4237_s0 }
 0x191   :  { %v1813_v62 = vadd.f32 %v1812_v8, %v1809_v44  ;;  %v1827_v11 = vadd.f32 %v1826_v29, %v1824_v60  ;;  %v1834_v51 = vmul.f32 %v1833_v26, %v3980_v61  ;;  %v1838_v3 = vmul.f32 %v1837_v59, %v3993_v58 }
 0x192   :  { %1769 = vst [vmem:[#allocation13 + $0x3] sm:$0x1] %v1767_v47  ;;  %v1818_v7 = vadd.f32 %v1802_v10, %v1787_v21  ;;  %v1841_v54 = vstv %s4242_s12  ;;  %v1844_v63 = vstv %s4246_s13  ;;  %v1848_v52 = vstv %s4251_s14 }
 0x193   :  { %v1817_v39 = vadd.f32 %v1816_v33, %v1813_v62  ;;  %v1831_v49 = vadd.f32 %v1830_v24, %v1827_v11  ;;  %v1842_v30 = vmul.f32 %v1841_v54, %v3968_v19  ;;  %v1845_v43 = vmul.f32 %v1844_v63, %v3982_v23 }
 0x194   :  { %v1849_v56 = vmul.f32 %v1848_v52, %v3995_v22  ;;  %v1852_v1 = vstv %s4255_s15  ;;  %v1856_v55 = vstv %s4261_s16  ;;  %v1859_v28 = vstv %s4264_s17 }
 0x195   :  { %v1819_v61 = vadd.f32 %v1818_v7, %v1817_v39  ;;  %v1835_v31 = vadd.f32 %v1834_v51, %v1831_v49  ;;  %v1846_v58 = vadd.f32 %v1845_v43, %v1842_v30  ;;  %v1853_v37 = vmul.f32 %v1852_v1, %v4023_v40 }
 0x196   :  { %v1857_v2 = vmul.f32 %v1856_v55, %v4025_v32  ;;  %v1860_v15 = vmul.f32 %v1859_v28, %v4034_v12  ;;  %v1863_v46 = vstv %s4270_s30  ;;  %v1867_v13 = vstv %s4274_s6 }
 0x197   :  { %1821 = vst [vmem:[#allocation13 + $0x4] sm:$0x1] %v1819_v61  ;;  %v1839_v19 = vadd.f32 %v1838_v3, %v1835_v31  ;;  %v1850_v42 = vadd.f32 %v1849_v56, %v1846_v58  ;;  %v1864_v23 = vmul.f32 %v1863_v46, %v4042_v9  ;;  %v1868_v48 = vmul.f32 %v1867_v13, %v4044_v20 }
 0x198   :  { %v1861_v22 = vadd.f32 %v1860_v15, %v1857_v2  ;;  %v1875_v27 = vmul.f32 0.5, %v4013_v41  ;;  %v1876_v40 = vstv %s4391_s2 }
 0x199   :  { %v1854_v57 = vadd.f32 %v1853_v37, %v1850_v42 }
 0x19a   :  { %v1865_v32 = vadd.f32 %v1864_v23, %v1861_v22  ;;  %v1877_v17 = vsub.f32 %v1876_v40, %v1875_v27 }
 0x19b   :  { %v1870_v12 = vadd.f32 %v1854_v57, %v1839_v19 }
 0x19c   :  { %v1869_v9 = vadd.f32 %v1868_v48, %v1865_v32  ;;  %1879 = vst [vmem:[#allocation13 + $0x18] sm:$0x1] %v1877_v17 }
 0x19e   :  { %v1871_v45 = vadd.f32 %v1870_v12, %v1869_v9 }
 0x1a0   :  { %1873 = vst [vmem:[#allocation13 + $0x5] sm:$0x1] %v1871_v45 }
 0x1a1   :  { %1892 = dma.vmem_to_hbm [thread:$0]  %s1885_s9, 400, %s1887_s20, [#allocation5], %s4394_s22, %s4394_s22, %s4393_s21  }
 0x1a2   :  { %2214 = dma.done.wait [#allocation5], 400  }
 0x1a3   :  { %2215 = vsyncadd [#allocation5], 4294966896 }
 0x1a4   :  { %1897 = vsyncpa [#allocation4], 1 }
 0x1a5   :  { %1898 = vsyncpa [#allocation5], 1 }
 0x1a6   :  { %1899 = vsyncpa [#allocation6], 1 }
 0x1a7   :  { %1900 = vsyncpa [#allocation9], 1 }
 0x1a8   :  { %1901 = vsyncpa [#allocation12], 1 }

</bundles_post_ra>
